<compile_context>
chip_gen: v5e
topology: v5e:2x2
jax: 0.10.0
libtpu: 0.0.40
codegen_flags: <defaults>
</compile_context>

<pallas_src>
import math

import jax
import jax.numpy as jnp
from jax.experimental import pallas as pl
from jax.experimental.pallas import tpu as pltpu

# Static shapes implied by the PyTorch module (x = torch.randn(1, 3, 64, 64)).
C0, C1, C2, C3 = 3, 64, 64, 128          # channels
H1, H2, H3 = 32, 16, 8                   # conv output spatial sizes
M1, M2, M3 = H1 * H1, H2 * H2, H3 * H3   # GEMM M dims
K1, K2, K3 = 9 * C0, 9 * C1, 9 * C2      # GEMM K dims


def _sel2(d, q):
    """Conv-2 tap selector.  Tap offset d in {0,1,2}, output parity q in {0,1}
    -> (level-1 parity bit, level-2 parity bit, slice start in the s1 plane)."""
    if d == 0:
        return 1, 1 - q, 7 + q
    if d == 1:
        return 0, q, 8
    return 1, q, 8


def _sel3(d):
    """Conv-3 tap selector: tap offset -> (parity bit, slice start in s2)."""
    if d == 0:
        return 1, 7
    if d == 1:
        return 0, 8
    return 1, 8


def _fused_conv_kernel(p1_ref, w1_ref, b1_ref, w2_ref, b2_ref, w3_ref, b3_ref,
                       o1_ref, o2_ref, o3_ref, s1_ref, s2_ref):
    # ---------------- conv1: (1024, 27) @ (27, 64) ----------------
    acc1 = jnp.dot(p1_ref[...], w1_ref[...],
                   preferred_element_type=jnp.float32) + b1_ref[...]
    o1_ref[...] = acc1.T        # (64, 1024): lane-dense, quadtree spatial order

    # Stage conv1 activation for conv2: 16 parity planes (p, q, a, b), data in
    # the 8-aligned [8:16, 8:16] window, zero border at row/col 7 = padding.
    s1_ref[...] = jnp.zeros(s1_ref.shape, s1_ref.dtype)
    s1_ref[:, pl.ds(8, 8), pl.ds(8, 8), :] = acc1.reshape(16, 8, 8, C1)

    s2_ref[...] = jnp.zeros(s2_ref.shape, s2_ref.dtype)

    # -------- conv2: 4 output-parity groups x 9 per-tap accumulating dots ----
    for qy in range(2):
        for qx in range(2):
            acc2 = None
            for di in range(3):
                p, a, r0 = _sel2(di, qy)
                for dj in range(3):
                    q, b, c0 = _sel2(dj, qx)
                    plane = ((p * 2 + q) * 2 + a) * 2 + b
                    slab = s1_ref[plane, pl.ds(r0, 8), pl.ds(c0, 8), :]
                    lhs = slab.reshape(64, C1).astype(jnp.bfloat16)  # 64 = 8x8 pix
                    tap = di * 3 + dj
                    part = jnp.dot(lhs, w2_ref[pl.ds(tap * C1, C1), :],
                                   preferred_element_type=jnp.float32)
                    acc2 = part if acc2 is None else acc2 + part
            acc2 = acc2 + b2_ref[...]
            o2_ref[qy, qx, :, :] = acc2
            s2_ref[2 * qy + qx, pl.ds(8, 8), pl.ds(8, 8), :] = (
                acc2.reshape(8, 8, C2))

    # ---------------- conv3: 9 per-tap dots, (64, 64) @ (64, 128) ------------
    acc3 = None
    for di in range(3):
        p, r0 = _sel3(di)
        for dj in range(3):
            q, c0 = _sel3(dj)
            slab = s2_ref[2 * p + q, pl.ds(r0, 8), pl.ds(c0, 8), :]
            lhs = slab.reshape(64, C2).astype(jnp.bfloat16)
            tap = di * 3 + dj
            part = jnp.dot(lhs, w3_ref[pl.ds(tap * C2, C2), :],
                           preferred_element_type=jnp.float32)
            acc3 = part if acc3 is None else acc3 + part
    acc3 = acc3 + b3_ref[...]
    o3_ref[...] = acc3.T        # (128, 64) -> metadata-only reshape to NCHW


def _fused_convs(p1, w1, b1, w2, b2, w3, b3):
    cost = pl.CostEstimate(
        flops=2 * (M1 * K1 * C1 + M2 * K2 * C2 + M3 * K3 * C3),
        transcendentals=0,
        bytes_accessed=(p1.size * 2 + (w1.size + w2.size + w3.size) * 2
                        + (b1.size + b2.size + b3.size) * 4
                        + (C1 * M1 + C2 * M2 + C3 * M3) * 4),
    )
    return pl.pallas_call(
        _fused_conv_kernel,
        out_shape=(
            jax.ShapeDtypeStruct((C1, M1), jnp.float32),        # t1, channel-major
            jax.ShapeDtypeStruct((2, 2, 64, C2), jnp.float32),  # t2, per parity group
            jax.ShapeDtypeStruct((C3, M3), jnp.float32),        # t3, channel-major
        ),
        grid=(1,),
        in_specs=[
            pl.BlockSpec((M1, K1), lambda i: (0, 0)),
            pl.BlockSpec((K1, C1), lambda i: (0, 0)),
            pl.BlockSpec((1, C1), lambda i: (0, 0)),
            pl.BlockSpec((K2, C2), lambda i: (0, 0)),
            pl.BlockSpec((1, C2), lambda i: (0, 0)),
            pl.BlockSpec((K3, C3), lambda i: (0, 0)),
            pl.BlockSpec((1, C3), lambda i: (0, 0)),
        ],
        out_specs=(
            pl.BlockSpec((C1, M1), lambda i: (0, 0)),
            pl.BlockSpec((2, 2, 64, C2), lambda i: (0, 0, 0, 0)),
            pl.BlockSpec((C3, M3), lambda i: (0, 0)),
        ),
        scratch_shapes=[
            pltpu.VMEM((16, 16, 16, C1), jnp.float32),  # conv2 input parity planes
            pltpu.VMEM((4, 16, 16, C2), jnp.float32),   # conv3 input parity planes
        ],
        compiler_params=pltpu.CompilerParams(
            dimension_semantics=("arbitrary",)),
        cost_estimate=cost,
    )(p1, w1, b1, w2, b2, w3, b3)


def _build_l1_patches(x):
    """x: (1, 3, 64, 64) -> conv1 im2col patches (1024, 27) bf16 with the
    spatial (M) dim in 2-level parity (quadtree) order."""
    xt = jnp.transpose(x[0], (1, 2, 0))                  # (64, 64, 3) HWC
    xp = jnp.pad(xt, ((1, 1), (1, 1), (0, 0)))           # (66, 66, 3)
    taps = [xp[di:di + 2 * H1:2, dj:dj + 2 * H1:2, :]
            for di in range(3) for dj in range(3)]
    patches = jnp.concatenate(taps, axis=-1)             # (32, 32, 27)
    # (Y, a, p, X, b, q, k) -> (p, q, a, b, Y, X, k);  y = 4Y+2a+p, x = 4X+2b+q
    pr = patches.reshape(8, 2, 2, 8, 2, 2, K1)
    pr = jnp.transpose(pr, (2, 5, 1, 4, 0, 3, 6))
    return pr.reshape(M1, K1).astype(jnp.bfloat16)


def model_forward(x, params):
    """Forward pass of the PyTorch Model (returns t1..t11)."""
    # TODO(synk): generalize to batch > 1 (fold batch into the GEMM M dims and
    # expose it as a "parallel" grid axis so v7x's 2 TensorCores split it).
    p1 = _build_l1_patches(x)
    o1, o2, o3 = _fused_convs(
        p1,
        params[0]["w_mat"], params[0]["b_row"],
        params[1]["w_mat"], params[1]["b_row"],
        params[2]["w_mat"], params[2]["b_row"])
    # Undo the quadtree spatial ordering (tiny output-side XLA transposes).
    t1 = (o1.reshape(C1, 2, 2, 2, 2, 8, 8)
            .transpose(0, 5, 3, 1, 6, 4, 2)
            .reshape(1, C1, H1, H1))
    t2 = (o2.reshape(2, 2, 8, 8, C2)
            .transpose(4, 2, 0, 3, 1)
            .reshape(1, C2, H2, H2))
    t3 = o3.reshape(1, C3, H3, H3)
    # torch.flatten variants: metadata-only reshapes.
    t4 = t3.reshape(t3.shape[0], -1)                   # flatten(t3, 1)
    t5 = t4.reshape(t4.shape[0], -1)                   # flatten(t4, 1)
    t6 = x.reshape(x.shape[0], -1)                     # flatten(x, 1)
    t7 = x.reshape(x.shape[0], x.shape[1], -1)         # flatten(x, 2)
    t8 = x.reshape(x.shape)                            # flatten(x, 3)  (no-op)
    t9 = x.reshape(x.shape)                            # flatten(x, -1) (no-op)
    t10 = x.reshape(x.shape[0], x.shape[1], -1)        # flatten(x, -2)
    t11 = x.reshape(-1)                                # flatten(x, 0)
    return t1, t2, t3, t4, t5, t6, t7, t8, t9, t10, t11


def init_conv_params(key, cin, cout, k=3):
    kw_, kb_ = jax.random.split(key)
    fan_in = cin * k * k
    bound = 1.0 / math.sqrt(fan_in)
    w_oihw = jax.random.uniform(kw_, (cout, cin, k, k), jnp.float32, -bound, bound)
    b = jax.random.uniform(kb_, (cout,), jnp.float32, -bound, bound)
    # Hoisted re-layout: tap-major (kh, kw, cin) x cout bf16 matrix + bias row.
    w_mat = jnp.transpose(w_oihw, (2, 3, 1, 0)).reshape(k * k * cin, cout)
    return {
        "w_oihw": w_oihw,
        "b": b,
        "w_mat": w_mat.astype(jnp.bfloat16),
        "b_row": b.reshape(1, cout),
    }


def _ref_conv(x, w, b):
    out = jax.lax.conv_general_dilated(
        x, w, window_strides=(2, 2), padding=((1, 1), (1, 1)),
        dimension_numbers=("NCHW", "OIHW", "NCHW"),
        precision=jax.lax.Precision.HIGHEST)
    return out + b.reshape(1, -1, 1, 1)


if __name__ == "__main__":
    key = jax.random.PRNGKey(0)
    kx, k1, k2, k3 = jax.random.split(key, 4)

    # Shape implied by the PyTorch module: x = torch.randn(1, 3, 64, 64).
    x = jax.random.normal(kx, (1, C0, 64, 64), dtype=jnp.float32)
    params = (
        init_conv_params(k1, C0, C1),
        init_conv_params(k2, C1, C2),
        init_conv_params(k3, C2, C3),
    )

    fwd = jax.jit(model_forward)
    outs = jax.block_until_ready(fwd(x, params))
    t1, t2, t3, t4, t5, t6, t7, t8, t9, t10, t11 = outs

    # f32 reference conv chain gates the bf16 MXU fast path.
    r1 = _ref_conv(x, params[0]["w_oihw"], params[0]["b"])
    r2 = _ref_conv(r1, params[1]["w_oihw"], params[1]["b"])
    r3 = _ref_conv(r2, params[2]["w_oihw"], params[2]["b"])

    assert t1.shape == (1, C1, H1, H1)
    assert t2.shape == (1, C2, H2, H2)
    assert t3.shape == (1, C3, H3, H3)
    assert bool(jnp.allclose(t1, r1, rtol=3e-2, atol=3e-2))
    assert bool(jnp.allclose(t2, r2, rtol=3e-2, atol=3e-2))
    assert bool(jnp.allclose(t3, r3, rtol=3e-2, atol=3e-2))
    assert t4.shape == (1, C3 * H3 * H3) and t5.shape == t4.shape
    assert t6.shape == (1, C0 * 64 * 64)
    assert t7.shape == (1, C0, 64 * 64) and t10.shape == t7.shape
    assert t8.shape == (1, C0, 64, 64) and t9.shape == t8.shape
    assert t11.shape == (C0 * 64 * 64,)

    print("KERNEL_OK")
</pallas_src>

<mosaic_0001>
module attributes {stable_mosaic.version = 11 : i64} {
  func.func @_fused_conv_kernel(%arg0: i32, %arg1: memref<1024x27xbf16, #tpu.memory_space<vmem>>, %arg2: memref<27x64xbf16, #tpu.memory_space<vmem>>, %arg3: memref<1x64xf32, #tpu.memory_space<vmem>>, %arg4: memref<576x64xbf16, #tpu.memory_space<vmem>>, %arg5: memref<1x64xf32, #tpu.memory_space<vmem>>, %arg6: memref<576x128xbf16, #tpu.memory_space<vmem>>, %arg7: memref<1x128xf32, #tpu.memory_space<vmem>>, %arg8: memref<64x1024xf32, #tpu.memory_space<vmem>>, %arg9: memref<2x2x64x64xf32, #tpu.memory_space<vmem>>, %arg10: memref<128x64xf32, #tpu.memory_space<vmem>>, %arg11: memref<16x16x16x64xf32, #tpu.memory_space<vmem>>, %arg12: memref<4x16x16x64xf32, #tpu.memory_space<vmem>>) attributes {dimension_semantics = [#tpu.dimension_semantics<arbitrary>], iteration_bounds = array<i64: 1>, scalar_prefetch = 0 : i64, scratch_operands = 2 : i64, tpu.core_type = #tpu.core_type<tc>, window_params = [{pipeline_mode = #tpu.pipeline_mode<synchronous>, transform_indices = @transform_0, window_bounds = array<i64: 1024, 27>}, {pipeline_mode = #tpu.pipeline_mode<synchronous>, transform_indices = @transform_1, window_bounds = array<i64: 27, 64>}, {pipeline_mode = #tpu.pipeline_mode<synchronous>, transform_indices = @transform_2, window_bounds = array<i64: 1, 64>}, {pipeline_mode = #tpu.pipeline_mode<synchronous>, transform_indices = @transform_3, window_bounds = array<i64: 576, 64>}, {pipeline_mode = #tpu.pipeline_mode<synchronous>, transform_indices = @transform_4, window_bounds = array<i64: 1, 64>}, {pipeline_mode = #tpu.pipeline_mode<synchronous>, transform_indices = @transform_5, window_bounds = array<i64: 576, 128>}, {pipeline_mode = #tpu.pipeline_mode<synchronous>, transform_indices = @transform_6, window_bounds = array<i64: 1, 128>}, {pipeline_mode = #tpu.pipeline_mode<synchronous>, transform_indices = @transform_7, window_bounds = array<i64: 64, 1024>}, {pipeline_mode = #tpu.pipeline_mode<synchronous>, transform_indices = @transform_8, window_bounds = array<i64: 2, 2, 64, 64>}, {pipeline_mode = #tpu.pipeline_mode<synchronous>, transform_indices = @transform_9, window_bounds = array<i64: 128, 64>}]} {
    %c0 = arith.constant 0 : index
    %c0_0 = arith.constant 0 : index
    %0 = vector.load %arg1[%c0, %c0_0] : memref<1024x27xbf16, #tpu.memory_space<vmem>>, vector<1024x27xbf16>
    %c0_1 = arith.constant 0 : index
    %c0_2 = arith.constant 0 : index
    %1 = vector.load %arg2[%c0_1, %c0_2] : memref<27x64xbf16, #tpu.memory_space<vmem>>, vector<27x64xbf16>
    %cst = arith.constant dense<0.000000e+00> : vector<1024x64xf32>
    %2 = tpu.matmul %0, %1, %cst {dimension_numbers = #tpu.dot_dimension_numbers<[1], [0], [0], [1], [0, 0, 1, 1], [], []>} : vector<1024x27xbf16>, vector<27x64xbf16>, vector<1024x64xf32> -> vector<1024x64xf32>
    %c0_3 = arith.constant 0 : index
    %c0_4 = arith.constant 0 : index
    %3 = vector.load %arg3[%c0_3, %c0_4] : memref<1x64xf32, #tpu.memory_space<vmem>>, vector<1x64xf32>
    %4 = vector.broadcast %3 : vector<1x64xf32> to vector<1024x64xf32>
    %5 = arith.addf %2, %4 : vector<1024x64xf32>
    %6 = tpu.transpose %5, [1, 0] : vector<1024x64xf32> -> vector<64x1024xf32>
    %c0_5 = arith.constant 0 : index
    %c0_6 = arith.constant 0 : index
    %7 = vector.load %arg8[%c0_5, %c0_6] : memref<64x1024xf32, #tpu.memory_space<vmem>>, vector<64x1024xf32>
    tpu.vector_store %arg8[%c0_5, %c0_6], %6 {strides = array<i32>} : memref<64x1024xf32, #tpu.memory_space<vmem>>, vector<64x1024xf32>,
    %cst_7 = arith.constant 0.000000e+00 : f32
    %8 = vector.broadcast %cst_7 : f32 to vector<16x16x16x64xf32>
    %c0_8 = arith.constant 0 : index
    %c0_9 = arith.constant 0 : index
    %c0_10 = arith.constant 0 : index
    %c0_11 = arith.constant 0 : index
    %9 = vector.load %arg11[%c0_8, %c0_9, %c0_10, %c0_11] : memref<16x16x16x64xf32, #tpu.memory_space<vmem>>, vector<16x16x16x64xf32>
    tpu.vector_store %arg11[%c0_8, %c0_9, %c0_10, %c0_11], %8 {strides = array<i32>} : memref<16x16x16x64xf32, #tpu.memory_space<vmem>>, vector<16x16x16x64xf32>,
    %10 = vector.shape_cast %5 : vector<1024x64xf32> to vector<16x8x8x64xf32>
    %c0_12 = arith.constant 0 : index
    %c8 = arith.constant 8 : index
    %c8_13 = arith.constant 8 : index
    %c0_14 = arith.constant 0 : index
    %11 = vector.load %arg11[%c0_12, %c8, %c8_13, %c0_14] : memref<16x16x16x64xf32, #tpu.memory_space<vmem>>, vector<16x8x8x64xf32>
    tpu.vector_store %arg11[%c0_12, %c8, %c8_13, %c0_14], %10 {strides = array<i32>} : memref<16x16x16x64xf32, #tpu.memory_space<vmem>>, vector<16x8x8x64xf32>,
    %cst_15 = arith.constant 0.000000e+00 : f32
    %12 = vector.broadcast %cst_15 : f32 to vector<4x16x16x64xf32>
    %c0_16 = arith.constant 0 : index
    %c0_17 = arith.constant 0 : index
    %c0_18 = arith.constant 0 : index
    %c0_19 = arith.constant 0 : index
    %13 = vector.load %arg12[%c0_16, %c0_17, %c0_18, %c0_19] : memref<4x16x16x64xf32, #tpu.memory_space<vmem>>, vector<4x16x16x64xf32>
    tpu.vector_store %arg12[%c0_16, %c0_17, %c0_18, %c0_19], %12 {strides = array<i32>} : memref<4x16x16x64xf32, #tpu.memory_space<vmem>>, vector<4x16x16x64xf32>,
    %c15 = arith.constant 15 : index
    %c7 = arith.constant 7 : index
    %c7_20 = arith.constant 7 : index
    %c0_21 = arith.constant 0 : index
    %14 = vector.load %arg11[%c15, %c7, %c7_20, %c0_21] : memref<16x16x16x64xf32, #tpu.memory_space<vmem>>, vector<1x8x8x64xf32>
    %15 = vector.shape_cast %14 : vector<1x8x8x64xf32> to vector<8x8x64xf32>
    %16 = vector.shape_cast %15 : vector<8x8x64xf32> to vector<64x64xf32>
    %17 = arith.truncf %16 : vector<64x64xf32> to vector<64x64xbf16>
    %c0_22 = arith.constant 0 : index
    %c0_23 = arith.constant 0 : index
    %18 = vector.load %arg4[%c0_22, %c0_23] : memref<576x64xbf16, #tpu.memory_space<vmem>>, vector<64x64xbf16>
    %cst_24 = arith.constant dense<0.000000e+00> : vector<64x64xf32>
    %19 = tpu.matmul %17, %18, %cst_24 {dimension_numbers = #tpu.dot_dimension_numbers<[1], [0], [0], [1], [0, 0, 1, 1], [], []>} : vector<64x64xbf16>, vector<64x64xbf16>, vector<64x64xf32> -> vector<64x64xf32>
    %c10 = arith.constant 10 : index
    %c7_25 = arith.constant 7 : index
    %c8_26 = arith.constant 8 : index
    %c0_27 = arith.constant 0 : index
    %20 = vector.load %arg11[%c10, %c7_25, %c8_26, %c0_27] : memref<16x16x16x64xf32, #tpu.memory_space<vmem>>, vector<1x8x8x64xf32>
    %21 = vector.shape_cast %20 : vector<1x8x8x64xf32> to vector<8x8x64xf32>
    %22 = vector.shape_cast %21 : vector<8x8x64xf32> to vector<64x64xf32>
    %23 = arith.truncf %22 : vector<64x64xf32> to vector<64x64xbf16>
    %c64 = arith.constant 64 : index
    %c0_28 = arith.constant 0 : index
    %24 = vector.load %arg4[%c64, %c0_28] : memref<576x64xbf16, #tpu.memory_space<vmem>>, vector<64x64xbf16>
    %cst_29 = arith.constant dense<0.000000e+00> : vector<64x64xf32>
    %25 = tpu.matmul %23, %24, %cst_29 {dimension_numbers = #tpu.dot_dimension_numbers<[1], [0], [0], [1], [0, 0, 1, 1], [], []>} : vector<64x64xbf16>, vector<64x64xbf16>, vector<64x64xf32> -> vector<64x64xf32>
    %26 = arith.addf %19, %25 : vector<64x64xf32>
    %c14 = arith.constant 14 : index
    %c7_30 = arith.constant 7 : index
    %c8_31 = arith.constant 8 : index
    %c0_32 = arith.constant 0 : index
    %27 = vector.load %arg11[%c14, %c7_30, %c8_31, %c0_32] : memref<16x16x16x64xf32, #tpu.memory_space<vmem>>, vector<1x8x8x64xf32>
    %28 = vector.shape_cast %27 : vector<1x8x8x64xf32> to vector<8x8x64xf32>
    %29 = vector.shape_cast %28 : vector<8x8x64xf32> to vector<64x64xf32>
    %30 = arith.truncf %29 : vector<64x64xf32> to vector<64x64xbf16>
    %c128 = arith.constant 128 : index
    %c0_33 = arith.constant 0 : index
    %31 = vector.load %arg4[%c128, %c0_33] : memref<576x64xbf16, #tpu.memory_space<vmem>>, vector<64x64xbf16>
    %cst_34 = arith.constant dense<0.000000e+00> : vector<64x64xf32>
    %32 = tpu.matmul %30, %31, %cst_34 {dimension_numbers = #tpu.dot_dimension_numbers<[1], [0], [0], [1], [0, 0, 1, 1], [], []>} : vector<64x64xbf16>, vector<64x64xbf16>, vector<64x64xf32> -> vector<64x64xf32>
    %33 = arith.addf %26, %32 : vector<64x64xf32>
    %c5 = arith.constant 5 : index
    %c8_35 = arith.constant 8 : index
    %c7_36 = arith.constant 7 : index
    %c0_37 = arith.constant 0 : index
    %34 = vector.load %arg11[%c5, %c8_35, %c7_36, %c0_37] : memref<16x16x16x64xf32, #tpu.memory_space<vmem>>, vector<1x8x8x64xf32>
    %35 = vector.shape_cast %34 : vector<1x8x8x64xf32> to vector<8x8x64xf32>
    %36 = vector.shape_cast %35 : vector<8x8x64xf32> to vector<64x64xf32>
    %37 = arith.truncf %36 : vector<64x64xf32> to vector<64x64xbf16>
    %c192 = arith.constant 192 : index
    %c0_38 = arith.constant 0 : index
    %38 = vector.load %arg4[%c192, %c0_38] : memref<576x64xbf16, #tpu.memory_space<vmem>>, vector<64x64xbf16>
    %cst_39 = arith.constant dense<0.000000e+00> : vector<64x64xf32>
    %39 = tpu.matmul %37, %38, %cst_39 {dimension_numbers = #tpu.dot_dimension_numbers<[1], [0], [0], [1], [0, 0, 1, 1], [], []>} : vector<64x64xbf16>, vector<64x64xbf16>, vector<64x64xf32> -> vector<64x64xf32>
    %40 = arith.addf %33, %39 : vector<64x64xf32>
    %c0_40 = arith.constant 0 : index
    %c8_41 = arith.constant 8 : index
    %c8_42 = arith.constant 8 : index
    %c0_43 = arith.constant 0 : index
    %41 = vector.load %arg11[%c0_40, %c8_41, %c8_42, %c0_43] : memref<16x16x16x64xf32, #tpu.memory_space<vmem>>, vector<1x8x8x64xf32>
    %42 = vector.shape_cast %41 : vector<1x8x8x64xf32> to vector<8x8x64xf32>
    %43 = vector.shape_cast %42 : vector<8x8x64xf32> to vector<64x64xf32>
    %44 = arith.truncf %43 : vector<64x64xf32> to vector<64x64xbf16>
    %c256 = arith.constant 256 : index
    %c0_44 = arith.constant 0 : index
    %45 = vector.load %arg4[%c256, %c0_44] : memref<576x64xbf16, #tpu.memory_space<vmem>>, vector<64x64xbf16>
    %cst_45 = arith.constant dense<0.000000e+00> : vector<64x64xf32>
    %46 = tpu.matmul %44, %45, %cst_45 {dimension_numbers = #tpu.dot_dimension_numbers<[1], [0], [0], [1], [0, 0, 1, 1], [], []>} : vector<64x64xbf16>, vector<64x64xbf16>, vector<64x64xf32> -> vector<64x64xf32>
    %47 = arith.addf %40, %46 : vector<64x64xf32>
    %c4 = arith.constant 4 : index
    %c8_46 = arith.constant 8 : index
    %c8_47 = arith.constant 8 : index
    %c0_48 = arith.constant 0 : index
    %48 = vector.load %arg11[%c4, %c8_46, %c8_47, %c0_48] : memref<16x16x16x64xf32, #tpu.memory_space<vmem>>, vector<1x8x8x64xf32>
    %49 = vector.shape_cast %48 : vector<1x8x8x64xf32> to vector<8x8x64xf32>
    %50 = vector.shape_cast %49 : vector<8x8x64xf32> to vector<64x64xf32>
    %51 = arith.truncf %50 : vector<64x64xf32> to vector<64x64xbf16>
    %c320 = arith.constant 320 : index
    %c0_49 = arith.constant 0 : index
    %52 = vector.load %arg4[%c320, %c0_49] : memref<576x64xbf16, #tpu.memory_space<vmem>>, vector<64x64xbf16>
    %cst_50 = arith.constant dense<0.000000e+00> : vector<64x64xf32>
    %53 = tpu.matmul %51, %52, %cst_50 {dimension_numbers = #tpu.dot_dimension_numbers<[1], [0], [0], [1], [0, 0, 1, 1], [], []>} : vector<64x64xbf16>, vector<64x64xbf16>, vector<64x64xf32> -> vector<64x64xf32>
    %54 = arith.addf %47, %53 : vector<64x64xf32>
    %c13 = arith.constant 13 : index
    %c8_51 = arith.constant 8 : index
    %c7_52 = arith.constant 7 : index
    %c0_53 = arith.constant 0 : index
    %55 = vector.load %arg11[%c13, %c8_51, %c7_52, %c0_53] : memref<16x16x16x64xf32, #tpu.memory_space<vmem>>, vector<1x8x8x64xf32>
    %56 = vector.shape_cast %55 : vector<1x8x8x64xf32> to vector<8x8x64xf32>
    %57 = vector.shape_cast %56 : vector<8x8x64xf32> to vector<64x64xf32>
    %58 = arith.truncf %57 : vector<64x64xf32> to vector<64x64xbf16>
    %c384 = arith.constant 384 : index
    %c0_54 = arith.constant 0 : index
    %59 = vector.load %arg4[%c384, %c0_54] : memref<576x64xbf16, #tpu.memory_space<vmem>>, vector<64x64xbf16>
    %cst_55 = arith.constant dense<0.000000e+00> : vector<64x64xf32>
    %60 = tpu.matmul %58, %59, %cst_55 {dimension_numbers = #tpu.dot_dimension_numbers<[1], [0], [0], [1], [0, 0, 1, 1], [], []>} : vector<64x64xbf16>, vector<64x64xbf16>, vector<64x64xf32> -> vector<64x64xf32>
    %61 = arith.addf %54, %60 : vector<64x64xf32>
    %c8_56 = arith.constant 8 : index
    %c8_57 = arith.constant 8 : index
    %c8_58 = arith.constant 8 : index
    %c0_59 = arith.constant 0 : index
    %62 = vector.load %arg11[%c8_56, %c8_57, %c8_58, %c0_59] : memref<16x16x16x64xf32, #tpu.memory_space<vmem>>, vector<1x8x8x64xf32>
    %63 = vector.shape_cast %62 : vector<1x8x8x64xf32> to vector<8x8x64xf32>
    %64 = vector.shape_cast %63 : vector<8x8x64xf32> to vector<64x64xf32>
    %65 = arith.truncf %64 : vector<64x64xf32> to vector<64x64xbf16>
    %c448 = arith.constant 448 : index
    %c0_60 = arith.constant 0 : index
    %66 = vector.load %arg4[%c448, %c0_60] : memref<576x64xbf16, #tpu.memory_space<vmem>>, vector<64x64xbf16>
    %cst_61 = arith.constant dense<0.000000e+00> : vector<64x64xf32>
    %67 = tpu.matmul %65, %66, %cst_61 {dimension_numbers = #tpu.dot_dimension_numbers<[1], [0], [0], [1], [0, 0, 1, 1], [], []>} : vector<64x64xbf16>, vector<64x64xbf16>, vector<64x64xf32> -> vector<64x64xf32>
    %68 = arith.addf %61, %67 : vector<64x64xf32>
    %c12 = arith.constant 12 : index
    %c8_62 = arith.constant 8 : index
    %c8_63 = arith.constant 8 : index
    %c0_64 = arith.constant 0 : index
    %69 = vector.load %arg11[%c12, %c8_62, %c8_63, %c0_64] : memref<16x16x16x64xf32, #tpu.memory_space<vmem>>, vector<1x8x8x64xf32>
    %70 = vector.shape_cast %69 : vector<1x8x8x64xf32> to vector<8x8x64xf32>
    %71 = vector.shape_cast %70 : vector<8x8x64xf32> to vector<64x64xf32>
    %72 = arith.truncf %71 : vector<64x64xf32> to vector<64x64xbf16>
    %c512 = arith.constant 512 : index
    %c0_65 = arith.constant 0 : index
    %73 = vector.load %arg4[%c512, %c0_65] : memref<576x64xbf16, #tpu.memory_space<vmem>>, vector<64x64xbf16>
    %cst_66 = arith.constant dense<0.000000e+00> : vector<64x64xf32>
    %74 = tpu.matmul %72, %73, %cst_66 {dimension_numbers = #tpu.dot_dimension_numbers<[1], [0], [0], [1], [0, 0, 1, 1], [], []>} : vector<64x64xbf16>, vector<64x64xbf16>, vector<64x64xf32> -> vector<64x64xf32>
    %75 = arith.addf %68, %74 : vector<64x64xf32>
    %c0_67 = arith.constant 0 : index
    %c0_68 = arith.constant 0 : index
    %76 = vector.load %arg5[%c0_67, %c0_68] : memref<1x64xf32, #tpu.memory_space<vmem>>, vector<1x64xf32>
    %77 = vector.broadcast %76 : vector<1x64xf32> to vector<64x64xf32>
    %78 = arith.addf %75, %77 : vector<64x64xf32>
    %c0_69 = arith.constant 0 : index
    %c0_70 = arith.constant 0 : index
    %c0_71 = arith.constant 0 : index
    %c0_72 = arith.constant 0 : index
    %79 = vector.load %arg9[%c0_69, %c0_70, %c0_71, %c0_72] : memref<2x2x64x64xf32, #tpu.memory_space<vmem>>, vector<1x1x64x64xf32>
    %80 = vector.shape_cast %79 : vector<1x1x64x64xf32> to vector<64x64xf32>
    %81 = vector.shape_cast %78 : vector<64x64xf32> to vector<1x1x64x64xf32>
    tpu.vector_store %arg9[%c0_69, %c0_70, %c0_71, %c0_72], %81 {strides = array<i32>} : memref<2x2x64x64xf32, #tpu.memory_space<vmem>>, vector<1x1x64x64xf32>,
    %82 = vector.shape_cast %78 : vector<64x64xf32> to vector<8x8x64xf32>
    %c0_73 = arith.constant 0 : index
    %c8_74 = arith.constant 8 : index
    %c8_75 = arith.constant 8 : index
    %c0_76 = arith.constant 0 : index
    %83 = vector.load %arg12[%c0_73, %c8_74, %c8_75, %c0_76] : memref<4x16x16x64xf32, #tpu.memory_space<vmem>>, vector<1x8x8x64xf32>
    %84 = vector.shape_cast %83 : vector<1x8x8x64xf32> to vector<8x8x64xf32>
    %85 = vector.shape_cast %82 : vector<8x8x64xf32> to vector<1x8x8x64xf32>
    tpu.vector_store %arg12[%c0_73, %c8_74, %c8_75, %c0_76], %85 {strides = array<i32>} : memref<4x16x16x64xf32, #tpu.memory_space<vmem>>, vector<1x8x8x64xf32>,
    %c14_77 = arith.constant 14 : index
    %c7_78 = arith.constant 7 : index
    %c8_79 = arith.constant 8 : index
    %c0_80 = arith.constant 0 : index
    %86 = vector.load %arg11[%c14_77, %c7_78, %c8_79, %c0_80] : memref<16x16x16x64xf32, #tpu.memory_space<vmem>>, vector<1x8x8x64xf32>
    %87 = vector.shape_cast %86 : vector<1x8x8x64xf32> to vector<8x8x64xf32>
    %88 = vector.shape_cast %87 : vector<8x8x64xf32> to vector<64x64xf32>
    %89 = arith.truncf %88 : vector<64x64xf32> to vector<64x64xbf16>
    %c0_81 = arith.constant 0 : index
    %c0_82 = arith.constant 0 : index
    %90 = vector.load %arg4[%c0_81, %c0_82] : memref<576x64xbf16, #tpu.memory_space<vmem>>, vector<64x64xbf16>
    %cst_83 = arith.constant dense<0.000000e+00> : vector<64x64xf32>
    %91 = tpu.matmul %89, %90, %cst_83 {dimension_numbers = #tpu.dot_dimension_numbers<[1], [0], [0], [1], [0, 0, 1, 1], [], []>} : vector<64x64xbf16>, vector<64x64xbf16>, vector<64x64xf32> -> vector<64x64xf32>
    %c11 = arith.constant 11 : index
    %c7_84 = arith.constant 7 : index
    %c8_85 = arith.constant 8 : index
    %c0_86 = arith.constant 0 : index
    %92 = vector.load %arg11[%c11, %c7_84, %c8_85, %c0_86] : memref<16x16x16x64xf32, #tpu.memory_space<vmem>>, vector<1x8x8x64xf32>
    %93 = vector.shape_cast %92 : vector<1x8x8x64xf32> to vector<8x8x64xf32>
    %94 = vector.shape_cast %93 : vector<8x8x64xf32> to vector<64x64xf32>
    %95 = arith.truncf %94 : vector<64x64xf32> to vector<64x64xbf16>
    %c64_87 = arith.constant 64 : index
    %c0_88 = arith.constant 0 : index
    %96 = vector.load %arg4[%c64_87, %c0_88] : memref<576x64xbf16, #tpu.memory_space<vmem>>, vector<64x64xbf16>
    %cst_89 = arith.constant dense<0.000000e+00> : vector<64x64xf32>
    %97 = tpu.matmul %95, %96, %cst_89 {dimension_numbers = #tpu.dot_dimension_numbers<[1], [0], [0], [1], [0, 0, 1, 1], [], []>} : vector<64x64xbf16>, vector<64x64xbf16>, vector<64x64xf32> -> vector<64x64xf32>
    %98 = arith.addf %91, %97 : vector<64x64xf32>
    %c15_90 = arith.constant 15 : index
    %c7_91 = arith.constant 7 : index
    %c8_92 = arith.constant 8 : index
    %c0_93 = arith.constant 0 : index
    %99 = vector.load %arg11[%c15_90, %c7_91, %c8_92, %c0_93] : memref<16x16x16x64xf32, #tpu.memory_space<vmem>>, vector<1x8x8x64xf32>
    %100 = vector.shape_cast %99 : vector<1x8x8x64xf32> to vector<8x8x64xf32>
    %101 = vector.shape_cast %100 : vector<8x8x64xf32> to vector<64x64xf32>
    %102 = arith.truncf %101 : vector<64x64xf32> to vector<64x64xbf16>
    %c128_94 = arith.constant 128 : index
    %c0_95 = arith.constant 0 : index
    %103 = vector.load %arg4[%c128_94, %c0_95] : memref<576x64xbf16, #tpu.memory_space<vmem>>, vector<64x64xbf16>
    %cst_96 = arith.constant dense<0.000000e+00> : vector<64x64xf32>
    %104 = tpu.matmul %102, %103, %cst_96 {dimension_numbers = #tpu.dot_dimension_numbers<[1], [0], [0], [1], [0, 0, 1, 1], [], []>} : vector<64x64xbf16>, vector<64x64xbf16>, vector<64x64xf32> -> vector<64x64xf32>
    %105 = arith.addf %98, %104 : vector<64x64xf32>
    %c4_97 = arith.constant 4 : index
    %c8_98 = arith.constant 8 : index
    %c8_99 = arith.constant 8 : index
    %c0_100 = arith.constant 0 : index
    %106 = vector.load %arg11[%c4_97, %c8_98, %c8_99, %c0_100] : memref<16x16x16x64xf32, #tpu.memory_space<vmem>>, vector<1x8x8x64xf32>
    %107 = vector.shape_cast %106 : vector<1x8x8x64xf32> to vector<8x8x64xf32>
    %108 = vector.shape_cast %107 : vector<8x8x64xf32> to vector<64x64xf32>
    %109 = arith.truncf %108 : vector<64x64xf32> to vector<64x64xbf16>
    %c192_101 = arith.constant 192 : index
    %c0_102 = arith.constant 0 : index
    %110 = vector.load %arg4[%c192_101, %c0_102] : memref<576x64xbf16, #tpu.memory_space<vmem>>, vector<64x64xbf16>
    %cst_103 = arith.constant dense<0.000000e+00> : vector<64x64xf32>
    %111 = tpu.matmul %109, %110, %cst_103 {dimension_numbers = #tpu.dot_dimension_numbers<[1], [0], [0], [1], [0, 0, 1, 1], [], []>} : vector<64x64xbf16>, vector<64x64xbf16>, vector<64x64xf32> -> vector<64x64xf32>
    %112 = arith.addf %105, %111 : vector<64x64xf32>
    %c1 = arith.constant 1 : index
    %c8_104 = arith.constant 8 : index
    %c8_105 = arith.constant 8 : index
    %c0_106 = arith.constant 0 : index
    %113 = vector.load %arg11[%c1, %c8_104, %c8_105, %c0_106] : memref<16x16x16x64xf32, #tpu.memory_space<vmem>>, vector<1x8x8x64xf32>
    %114 = vector.shape_cast %113 : vector<1x8x8x64xf32> to vector<8x8x64xf32>
    %115 = vector.shape_cast %114 : vector<8x8x64xf32> to vector<64x64xf32>
    %116 = arith.truncf %115 : vector<64x64xf32> to vector<64x64xbf16>
    %c256_107 = arith.constant 256 : index
    %c0_108 = arith.constant 0 : index
    %117 = vector.load %arg4[%c256_107, %c0_108] : memref<576x64xbf16, #tpu.memory_space<vmem>>, vector<64x64xbf16>
    %cst_109 = arith.constant dense<0.000000e+00> : vector<64x64xf32>
    %118 = tpu.matmul %116, %117, %cst_109 {dimension_numbers = #tpu.dot_dimension_numbers<[1], [0], [0], [1], [0, 0, 1, 1], [], []>} : vector<64x64xbf16>, vector<64x64xbf16>, vector<64x64xf32> -> vector<64x64xf32>
    %119 = arith.addf %112, %118 : vector<64x64xf32>
    %c5_110 = arith.constant 5 : index
    %c8_111 = arith.constant 8 : index
    %c8_112 = arith.constant 8 : index
    %c0_113 = arith.constant 0 : index
    %120 = vector.load %arg11[%c5_110, %c8_111, %c8_112, %c0_113] : memref<16x16x16x64xf32, #tpu.memory_space<vmem>>, vector<1x8x8x64xf32>
    %121 = vector.shape_cast %120 : vector<1x8x8x64xf32> to vector<8x8x64xf32>
    %122 = vector.shape_cast %121 : vector<8x8x64xf32> to vector<64x64xf32>
    %123 = arith.truncf %122 : vector<64x64xf32> to vector<64x64xbf16>
    %c320_114 = arith.constant 320 : index
    %c0_115 = arith.constant 0 : index
    %124 = vector.load %arg4[%c320_114, %c0_115] : memref<576x64xbf16, #tpu.memory_space<vmem>>, vector<64x64xbf16>
    %cst_116 = arith.constant dense<0.000000e+00> : vector<64x64xf32>
    %125 = tpu.matmul %123, %124, %cst_116 {dimension_numbers = #tpu.dot_dimension_numbers<[1], [0], [0], [1], [0, 0, 1, 1], [], []>} : vector<64x64xbf16>, vector<64x64xbf16>, vector<64x64xf32> -> vector<64x64xf32>
    %126 = arith.addf %119, %125 : vector<64x64xf32>
    %c12_117 = arith.constant 12 : index
    %c8_118 = arith.constant 8 : index
    %c8_119 = arith.constant 8 : index
    %c0_120 = arith.constant 0 : index
    %127 = vector.load %arg11[%c12_117, %c8_118, %c8_119, %c0_120] : memref<16x16x16x64xf32, #tpu.memory_space<vmem>>, vector<1x8x8x64xf32>
    %128 = vector.shape_cast %127 : vector<1x8x8x64xf32> to vector<8x8x64xf32>
    %129 = vector.shape_cast %128 : vector<8x8x64xf32> to vector<64x64xf32>
    %130 = arith.truncf %129 : vector<64x64xf32> to vector<64x64xbf16>
    %c384_121 = arith.constant 384 : index
    %c0_122 = arith.constant 0 : index
    %131 = vector.load %arg4[%c384_121, %c0_122] : memref<576x64xbf16, #tpu.memory_space<vmem>>, vector<64x64xbf16>
    %cst_123 = arith.constant dense<0.000000e+00> : vector<64x64xf32>
    %132 = tpu.matmul %130, %131, %cst_123 {dimension_numbers = #tpu.dot_dimension_numbers<[1], [0], [0], [1], [0, 0, 1, 1], [], []>} : vector<64x64xbf16>, vector<64x64xbf16>, vector<64x64xf32> -> vector<64x64xf32>
    %133 = arith.addf %126, %132 : vector<64x64xf32>
    %c9 = arith.constant 9 : index
    %c8_124 = arith.constant 8 : index
    %c8_125 = arith.constant 8 : index
    %c0_126 = arith.constant 0 : index
    %134 = vector.load %arg11[%c9, %c8_124, %c8_125, %c0_126] : memref<16x16x16x64xf32, #tpu.memory_space<vmem>>, vector<1x8x8x64xf32>
    %135 = vector.shape_cast %134 : vector<1x8x8x64xf32> to vector<8x8x64xf32>
    %136 = vector.shape_cast %135 : vector<8x8x64xf32> to vector<64x64xf32>
    %137 = arith.truncf %136 : vector<64x64xf32> to vector<64x64xbf16>
    %c448_127 = arith.constant 448 : index
    %c0_128 = arith.constant 0 : index
    %138 = vector.load %arg4[%c448_127, %c0_128] : memref<576x64xbf16, #tpu.memory_space<vmem>>, vector<64x64xbf16>
    %cst_129 = arith.constant dense<0.000000e+00> : vector<64x64xf32>
    %139 = tpu.matmul %137, %138, %cst_129 {dimension_numbers = #tpu.dot_dimension_numbers<[1], [0], [0], [1], [0, 0, 1, 1], [], []>} : vector<64x64xbf16>, vector<64x64xbf16>, vector<64x64xf32> -> vector<64x64xf32>
    %140 = arith.addf %133, %139 : vector<64x64xf32>
    %c13_130 = arith.constant 13 : index
    %c8_131 = arith.constant 8 : index
    %c8_132 = arith.constant 8 : index
    %c0_133 = arith.constant 0 : index
    %141 = vector.load %arg11[%c13_130, %c8_131, %c8_132, %c0_133] : memref<16x16x16x64xf32, #tpu.memory_space<vmem>>, vector<1x8x8x64xf32>
    %142 = vector.shape_cast %141 : vector<1x8x8x64xf32> to vector<8x8x64xf32>
    %143 = vector.shape_cast %142 : vector<8x8x64xf32> to vector<64x64xf32>
    %144 = arith.truncf %143 : vector<64x64xf32> to vector<64x64xbf16>
    %c512_134 = arith.constant 512 : index
    %c0_135 = arith.constant 0 : index
    %145 = vector.load %arg4[%c512_134, %c0_135] : memref<576x64xbf16, #tpu.memory_space<vmem>>, vector<64x64xbf16>
    %cst_136 = arith.constant dense<0.000000e+00> : vector<64x64xf32>
    %146 = tpu.matmul %144, %145, %cst_136 {dimension_numbers = #tpu.dot_dimension_numbers<[1], [0], [0], [1], [0, 0, 1, 1], [], []>} : vector<64x64xbf16>, vector<64x64xbf16>, vector<64x64xf32> -> vector<64x64xf32>
    %147 = arith.addf %140, %146 : vector<64x64xf32>
    %c0_137 = arith.constant 0 : index
    %c0_138 = arith.constant 0 : index
    %148 = vector.load %arg5[%c0_137, %c0_138] : memref<1x64xf32, #tpu.memory_space<vmem>>, vector<1x64xf32>
    %149 = vector.broadcast %148 : vector<1x64xf32> to vector<64x64xf32>
    %150 = arith.addf %147, %149 : vector<64x64xf32>
    %c0_139 = arith.constant 0 : index
    %c1_140 = arith.constant 1 : index
    %c0_141 = arith.constant 0 : index
    %c0_142 = arith.constant 0 : index
    %151 = vector.load %arg9[%c0_139, %c1_140, %c0_141, %c0_142] : memref<2x2x64x64xf32, #tpu.memory_space<vmem>>, vector<1x1x64x64xf32>
    %152 = vector.shape_cast %151 : vector<1x1x64x64xf32> to vector<64x64xf32>
    %153 = vector.shape_cast %150 : vector<64x64xf32> to vector<1x1x64x64xf32>
    tpu.vector_store %arg9[%c0_139, %c1_140, %c0_141, %c0_142], %153 {strides = array<i32>} : memref<2x2x64x64xf32, #tpu.memory_space<vmem>>, vector<1x1x64x64xf32>,
    %154 = vector.shape_cast %150 : vector<64x64xf32> to vector<8x8x64xf32>
    %c1_143 = arith.constant 1 : index
    %c8_144 = arith.constant 8 : index
    %c8_145 = arith.constant 8 : index
    %c0_146 = arith.constant 0 : index
    %155 = vector.load %arg12[%c1_143, %c8_144, %c8_145, %c0_146] : memref<4x16x16x64xf32, #tpu.memory_space<vmem>>, vector<1x8x8x64xf32>
    %156 = vector.shape_cast %155 : vector<1x8x8x64xf32> to vector<8x8x64xf32>
    %157 = vector.shape_cast %154 : vector<8x8x64xf32> to vector<1x8x8x64xf32>
    tpu.vector_store %arg12[%c1_143, %c8_144, %c8_145, %c0_146], %157 {strides = array<i32>} : memref<4x16x16x64xf32, #tpu.memory_space<vmem>>, vector<1x8x8x64xf32>,
    %c13_147 = arith.constant 13 : index
    %c8_148 = arith.constant 8 : index
    %c7_149 = arith.constant 7 : index
    %c0_150 = arith.constant 0 : index
    %158 = vector.load %arg11[%c13_147, %c8_148, %c7_149, %c0_150] : memref<16x16x16x64xf32, #tpu.memory_space<vmem>>, vector<1x8x8x64xf32>
    %159 = vector.shape_cast %158 : vector<1x8x8x64xf32> to vector<8x8x64xf32>
    %160 = vector.shape_cast %159 : vector<8x8x64xf32> to vector<64x64xf32>
    %161 = arith.truncf %160 : vector<64x64xf32> to vector<64x64xbf16>
    %c0_151 = arith.constant 0 : index
    %c0_152 = arith.constant 0 : index
    %162 = vector.load %arg4[%c0_151, %c0_152] : memref<576x64xbf16, #tpu.memory_space<vmem>>, vector<64x64xbf16>
    %cst_153 = arith.constant dense<0.000000e+00> : vector<64x64xf32>
    %163 = tpu.matmul %161, %162, %cst_153 {dimension_numbers = #tpu.dot_dimension_numbers<[1], [0], [0], [1], [0, 0, 1, 1], [], []>} : vector<64x64xbf16>, vector<64x64xbf16>, vector<64x64xf32> -> vector<64x64xf32>
    %c8_154 = arith.constant 8 : index
    %c8_155 = arith.constant 8 : index
    %c8_156 = arith.constant 8 : index
    %c0_157 = arith.constant 0 : index
    %164 = vector.load %arg11[%c8_154, %c8_155, %c8_156, %c0_157] : memref<16x16x16x64xf32, #tpu.memory_space<vmem>>, vector<1x8x8x64xf32>
    %165 = vector.shape_cast %164 : vector<1x8x8x64xf32> to vector<8x8x64xf32>
    %166 = vector.shape_cast %165 : vector<8x8x64xf32> to vector<64x64xf32>
    %167 = arith.truncf %166 : vector<64x64xf32> to vector<64x64xbf16>
    %c64_158 = arith.constant 64 : index
    %c0_159 = arith.constant 0 : index
    %168 = vector.load %arg4[%c64_158, %c0_159] : memref<576x64xbf16, #tpu.memory_space<vmem>>, vector<64x64xbf16>
    %cst_160 = arith.constant dense<0.000000e+00> : vector<64x64xf32>
    %169 = tpu.matmul %167, %168, %cst_160 {dimension_numbers = #tpu.dot_dimension_numbers<[1], [0], [0], [1], [0, 0, 1, 1], [], []>} : vector<64x64xbf16>, vector<64x64xbf16>, vector<64x64xf32> -> vector<64x64xf32>
    %170 = arith.addf %163, %169 : vector<64x64xf32>
    %c12_161 = arith.constant 12 : index
    %c8_162 = arith.constant 8 : index
    %c8_163 = arith.constant 8 : index
    %c0_164 = arith.constant 0 : index
    %171 = vector.load %arg11[%c12_161, %c8_162, %c8_163, %c0_164] : memref<16x16x16x64xf32, #tpu.memory_space<vmem>>, vector<1x8x8x64xf32>
    %172 = vector.shape_cast %171 : vector<1x8x8x64xf32> to vector<8x8x64xf32>
    %173 = vector.shape_cast %172 : vector<8x8x64xf32> to vector<64x64xf32>
    %174 = arith.truncf %173 : vector<64x64xf32> to vector<64x64xbf16>
    %c128_165 = arith.constant 128 : index
    %c0_166 = arith.constant 0 : index
    %175 = vector.load %arg4[%c128_165, %c0_166] : memref<576x64xbf16, #tpu.memory_space<vmem>>, vector<64x64xbf16>
    %cst_167 = arith.constant dense<0.000000e+00> : vector<64x64xf32>
    %176 = tpu.matmul %174, %175, %cst_167 {dimension_numbers = #tpu.dot_dimension_numbers<[1], [0], [0], [1], [0, 0, 1, 1], [], []>} : vector<64x64xbf16>, vector<64x64xbf16>, vector<64x64xf32> -> vector<64x64xf32>
    %177 = arith.addf %170, %176 : vector<64x64xf32>
    %c7_168 = arith.constant 7 : index
    %c8_169 = arith.constant 8 : index
    %c7_170 = arith.constant 7 : index
    %c0_171 = arith.constant 0 : index
    %178 = vector.load %arg11[%c7_168, %c8_169, %c7_170, %c0_171] : memref<16x16x16x64xf32, #tpu.memory_space<vmem>>, vector<1x8x8x64xf32>
    %179 = vector.shape_cast %178 : vector<1x8x8x64xf32> to vector<8x8x64xf32>
    %180 = vector.shape_cast %179 : vector<8x8x64xf32> to vector<64x64xf32>
    %181 = arith.truncf %180 : vector<64x64xf32> to vector<64x64xbf16>
    %c192_172 = arith.constant 192 : index
    %c0_173 = arith.constant 0 : index
    %182 = vector.load %arg4[%c192_172, %c0_173] : memref<576x64xbf16, #tpu.memory_space<vmem>>, vector<64x64xbf16>
    %cst_174 = arith.constant dense<0.000000e+00> : vector<64x64xf32>
    %183 = tpu.matmul %181, %182, %cst_174 {dimension_numbers = #tpu.dot_dimension_numbers<[1], [0], [0], [1], [0, 0, 1, 1], [], []>} : vector<64x64xbf16>, vector<64x64xbf16>, vector<64x64xf32> -> vector<64x64xf32>
    %184 = arith.addf %177, %183 : vector<64x64xf32>
    %c2 = arith.constant 2 : index
    %c8_175 = arith.constant 8 : index
    %c8_176 = arith.constant 8 : index
    %c0_177 = arith.constant 0 : index
    %185 = vector.load %arg11[%c2, %c8_175, %c8_176, %c0_177] : memref<16x16x16x64xf32, #tpu.memory_space<vmem>>, vector<1x8x8x64xf32>
    %186 = vector.shape_cast %185 : vector<1x8x8x64xf32> to vector<8x8x64xf32>
    %187 = vector.shape_cast %186 : vector<8x8x64xf32> to vector<64x64xf32>
    %188 = arith.truncf %187 : vector<64x64xf32> to vector<64x64xbf16>
    %c256_178 = arith.constant 256 : index
    %c0_179 = arith.constant 0 : index
    %189 = vector.load %arg4[%c256_178, %c0_179] : memref<576x64xbf16, #tpu.memory_space<vmem>>, vector<64x64xbf16>
    %cst_180 = arith.constant dense<0.000000e+00> : vector<64x64xf32>
    %190 = tpu.matmul %188, %189, %cst_180 {dimension_numbers = #tpu.dot_dimension_numbers<[1], [0], [0], [1], [0, 0, 1, 1], [], []>} : vector<64x64xbf16>, vector<64x64xbf16>, vector<64x64xf32> -> vector<64x64xf32>
    %191 = arith.addf %184, %190 : vector<64x64xf32>
    %c6 = arith.constant 6 : index
    %c8_181 = arith.constant 8 : index
    %c8_182 = arith.constant 8 : index
    %c0_183 = arith.constant 0 : index
    %192 = vector.load %arg11[%c6, %c8_181, %c8_182, %c0_183] : memref<16x16x16x64xf32, #tpu.memory_space<vmem>>, vector<1x8x8x64xf32>
    %193 = vector.shape_cast %192 : vector<1x8x8x64xf32> to vector<8x8x64xf32>
    %194 = vector.shape_cast %193 : vector<8x8x64xf32> to vector<64x64xf32>
    %195 = arith.truncf %194 : vector<64x64xf32> to vector<64x64xbf16>
    %c320_184 = arith.constant 320 : index
    %c0_185 = arith.constant 0 : index
    %196 = vector.load %arg4[%c320_184, %c0_185] : memref<576x64xbf16, #tpu.memory_space<vmem>>, vector<64x64xbf16>
    %cst_186 = arith.constant dense<0.000000e+00> : vector<64x64xf32>
    %197 = tpu.matmul %195, %196, %cst_186 {dimension_numbers = #tpu.dot_dimension_numbers<[1], [0], [0], [1], [0, 0, 1, 1], [], []>} : vector<64x64xbf16>, vector<64x64xbf16>, vector<64x64xf32> -> vector<64x64xf32>
    %198 = arith.addf %191, %197 : vector<64x64xf32>
    %c15_187 = arith.constant 15 : index
    %c8_188 = arith.constant 8 : index
    %c7_189 = arith.constant 7 : index
    %c0_190 = arith.constant 0 : index
    %199 = vector.load %arg11[%c15_187, %c8_188, %c7_189, %c0_190] : memref<16x16x16x64xf32, #tpu.memory_space<vmem>>, vector<1x8x8x64xf32>
    %200 = vector.shape_cast %199 : vector<1x8x8x64xf32> to vector<8x8x64xf32>
    %201 = vector.shape_cast %200 : vector<8x8x64xf32> to vector<64x64xf32>
    %202 = arith.truncf %201 : vector<64x64xf32> to vector<64x64xbf16>
    %c384_191 = arith.constant 384 : index
    %c0_192 = arith.constant 0 : index
    %203 = vector.load %arg4[%c384_191, %c0_192] : memref<576x64xbf16, #tpu.memory_space<vmem>>, vector<64x64xbf16>
    %cst_193 = arith.constant dense<0.000000e+00> : vector<64x64xf32>
    %204 = tpu.matmul %202, %203, %cst_193 {dimension_numbers = #tpu.dot_dimension_numbers<[1], [0], [0], [1], [0, 0, 1, 1], [], []>} : vector<64x64xbf16>, vector<64x64xbf16>, vector<64x64xf32> -> vector<64x64xf32>
    %205 = arith.addf %198, %204 : vector<64x64xf32>
    %c10_194 = arith.constant 10 : index
    %c8_195 = arith.constant 8 : index
    %c8_196 = arith.constant 8 : index
    %c0_197 = arith.constant 0 : index
    %206 = vector.load %arg11[%c10_194, %c8_195, %c8_196, %c0_197] : memref<16x16x16x64xf32, #tpu.memory_space<vmem>>, vector<1x8x8x64xf32>
    %207 = vector.shape_cast %206 : vector<1x8x8x64xf32> to vector<8x8x64xf32>
    %208 = vector.shape_cast %207 : vector<8x8x64xf32> to vector<64x64xf32>
    %209 = arith.truncf %208 : vector<64x64xf32> to vector<64x64xbf16>
    %c448_198 = arith.constant 448 : index
    %c0_199 = arith.constant 0 : index
    %210 = vector.load %arg4[%c448_198, %c0_199] : memref<576x64xbf16, #tpu.memory_space<vmem>>, vector<64x64xbf16>
    %cst_200 = arith.constant dense<0.000000e+00> : vector<64x64xf32>
    %211 = tpu.matmul %209, %210, %cst_200 {dimension_numbers = #tpu.dot_dimension_numbers<[1], [0], [0], [1], [0, 0, 1, 1], [], []>} : vector<64x64xbf16>, vector<64x64xbf16>, vector<64x64xf32> -> vector<64x64xf32>
    %212 = arith.addf %205, %211 : vector<64x64xf32>
    %c14_201 = arith.constant 14 : index
    %c8_202 = arith.constant 8 : index
    %c8_203 = arith.constant 8 : index
    %c0_204 = arith.constant 0 : index
    %213 = vector.load %arg11[%c14_201, %c8_202, %c8_203, %c0_204] : memref<16x16x16x64xf32, #tpu.memory_space<vmem>>, vector<1x8x8x64xf32>
    %214 = vector.shape_cast %213 : vector<1x8x8x64xf32> to vector<8x8x64xf32>
    %215 = vector.shape_cast %214 : vector<8x8x64xf32> to vector<64x64xf32>
    %216 = arith.truncf %215 : vector<64x64xf32> to vector<64x64xbf16>
    %c512_205 = arith.constant 512 : index
    %c0_206 = arith.constant 0 : index
    %217 = vector.load %arg4[%c512_205, %c0_206] : memref<576x64xbf16, #tpu.memory_space<vmem>>, vector<64x64xbf16>
    %cst_207 = arith.constant dense<0.000000e+00> : vector<64x64xf32>
    %218 = tpu.matmul %216, %217, %cst_207 {dimension_numbers = #tpu.dot_dimension_numbers<[1], [0], [0], [1], [0, 0, 1, 1], [], []>} : vector<64x64xbf16>, vector<64x64xbf16>, vector<64x64xf32> -> vector<64x64xf32>
    %219 = arith.addf %212, %218 : vector<64x64xf32>
    %c0_208 = arith.constant 0 : index
    %c0_209 = arith.constant 0 : index
    %220 = vector.load %arg5[%c0_208, %c0_209] : memref<1x64xf32, #tpu.memory_space<vmem>>, vector<1x64xf32>
    %221 = vector.broadcast %220 : vector<1x64xf32> to vector<64x64xf32>
    %222 = arith.addf %219, %221 : vector<64x64xf32>
    %c1_210 = arith.constant 1 : index
    %c0_211 = arith.constant 0 : index
    %c0_212 = arith.constant 0 : index
    %c0_213 = arith.constant 0 : index
    %223 = vector.load %arg9[%c1_210, %c0_211, %c0_212, %c0_213] : memref<2x2x64x64xf32, #tpu.memory_space<vmem>>, vector<1x1x64x64xf32>
    %224 = vector.shape_cast %223 : vector<1x1x64x64xf32> to vector<64x64xf32>
    %225 = vector.shape_cast %222 : vector<64x64xf32> to vector<1x1x64x64xf32>
    tpu.vector_store %arg9[%c1_210, %c0_211, %c0_212, %c0_213], %225 {strides = array<i32>} : memref<2x2x64x64xf32, #tpu.memory_space<vmem>>, vector<1x1x64x64xf32>,
    %226 = vector.shape_cast %222 : vector<64x64xf32> to vector<8x8x64xf32>
    %c2_214 = arith.constant 2 : index
    %c8_215 = arith.constant 8 : index
    %c8_216 = arith.constant 8 : index
    %c0_217 = arith.constant 0 : index
    %227 = vector.load %arg12[%c2_214, %c8_215, %c8_216, %c0_217] : memref<4x16x16x64xf32, #tpu.memory_space<vmem>>, vector<1x8x8x64xf32>
    %228 = vector.shape_cast %227 : vector<1x8x8x64xf32> to vector<8x8x64xf32>
    %229 = vector.shape_cast %226 : vector<8x8x64xf32> to vector<1x8x8x64xf32>
    tpu.vector_store %arg12[%c2_214, %c8_215, %c8_216, %c0_217], %229 {strides = array<i32>} : memref<4x16x16x64xf32, #tpu.memory_space<vmem>>, vector<1x8x8x64xf32>,
    %c12_218 = arith.constant 12 : index
    %c8_219 = arith.constant 8 : index
    %c8_220 = arith.constant 8 : index
    %c0_221 = arith.constant 0 : index
    %230 = vector.load %arg11[%c12_218, %c8_219, %c8_220, %c0_221] : memref<16x16x16x64xf32, #tpu.memory_space<vmem>>, vector<1x8x8x64xf32>
    %231 = vector.shape_cast %230 : vector<1x8x8x64xf32> to vector<8x8x64xf32>
    %232 = vector.shape_cast %231 : vector<8x8x64xf32> to vector<64x64xf32>
    %233 = arith.truncf %232 : vector<64x64xf32> to vector<64x64xbf16>
    %c0_222 = arith.constant 0 : index
    %c0_223 = arith.constant 0 : index
    %234 = vector.load %arg4[%c0_222, %c0_223] : memref<576x64xbf16, #tpu.memory_space<vmem>>, vector<64x64xbf16>
    %cst_224 = arith.constant dense<0.000000e+00> : vector<64x64xf32>
    %235 = tpu.matmul %233, %234, %cst_224 {dimension_numbers = #tpu.dot_dimension_numbers<[1], [0], [0], [1], [0, 0, 1, 1], [], []>} : vector<64x64xbf16>, vector<64x64xbf16>, vector<64x64xf32> -> vector<64x64xf32>
    %c9_225 = arith.constant 9 : index
    %c8_226 = arith.constant 8 : index
    %c8_227 = arith.constant 8 : index
    %c0_228 = arith.constant 0 : index
    %236 = vector.load %arg11[%c9_225, %c8_226, %c8_227, %c0_228] : memref<16x16x16x64xf32, #tpu.memory_space<vmem>>, vector<1x8x8x64xf32>
    %237 = vector.shape_cast %236 : vector<1x8x8x64xf32> to vector<8x8x64xf32>
    %238 = vector.shape_cast %237 : vector<8x8x64xf32> to vector<64x64xf32>
    %239 = arith.truncf %238 : vector<64x64xf32> to vector<64x64xbf16>
    %c64_229 = arith.constant 64 : index
    %c0_230 = arith.constant 0 : index
    %240 = vector.load %arg4[%c64_229, %c0_230] : memref<576x64xbf16, #tpu.memory_space<vmem>>, vector<64x64xbf16>
    %cst_231 = arith.constant dense<0.000000e+00> : vector<64x64xf32>
    %241 = tpu.matmul %239, %240, %cst_231 {dimension_numbers = #tpu.dot_dimension_numbers<[1], [0], [0], [1], [0, 0, 1, 1], [], []>} : vector<64x64xbf16>, vector<64x64xbf16>, vector<64x64xf32> -> vector<64x64xf32>
    %242 = arith.addf %235, %241 : vector<64x64xf32>
    %c13_232 = arith.constant 13 : index
    %c8_233 = arith.constant 8 : index
    %c8_234 = arith.constant 8 : index
    %c0_235 = arith.constant 0 : index
    %243 = vector.load %arg11[%c13_232, %c8_233, %c8_234, %c0_235] : memref<16x16x16x64xf32, #tpu.memory_space<vmem>>, vector<1x8x8x64xf32>
    %244 = vector.shape_cast %243 : vector<1x8x8x64xf32> to vector<8x8x64xf32>
    %245 = vector.shape_cast %244 : vector<8x8x64xf32> to vector<64x64xf32>
    %246 = arith.truncf %245 : vector<64x64xf32> to vector<64x64xbf16>
    %c128_236 = arith.constant 128 : index
    %c0_237 = arith.constant 0 : index
    %247 = vector.load %arg4[%c128_236, %c0_237] : memref<576x64xbf16, #tpu.memory_space<vmem>>, vector<64x64xbf16>
    %cst_238 = arith.constant dense<0.000000e+00> : vector<64x64xf32>
    %248 = tpu.matmul %246, %247, %cst_238 {dimension_numbers = #tpu.dot_dimension_numbers<[1], [0], [0], [1], [0, 0, 1, 1], [], []>} : vector<64x64xbf16>, vector<64x64xbf16>, vector<64x64xf32> -> vector<64x64xf32>
    %249 = arith.addf %242, %248 : vector<64x64xf32>
    %c6_239 = arith.constant 6 : index
    %c8_240 = arith.constant 8 : index
    %c8_241 = arith.constant 8 : index
    %c0_242 = arith.constant 0 : index
    %250 = vector.load %arg11[%c6_239, %c8_240, %c8_241, %c0_242] : memref<16x16x16x64xf32, #tpu.memory_space<vmem>>, vector<1x8x8x64xf32>
    %251 = vector.shape_cast %250 : vector<1x8x8x64xf32> to vector<8x8x64xf32>
    %252 = vector.shape_cast %251 : vector<8x8x64xf32> to vector<64x64xf32>
    %253 = arith.truncf %252 : vector<64x64xf32> to vector<64x64xbf16>
    %c192_243 = arith.constant 192 : index
    %c0_244 = arith.constant 0 : index
    %254 = vector.load %arg4[%c192_243, %c0_244] : memref<576x64xbf16, #tpu.memory_space<vmem>>, vector<64x64xbf16>
    %cst_245 = arith.constant dense<0.000000e+00> : vector<64x64xf32>
    %255 = tpu.matmul %253, %254, %cst_245 {dimension_numbers = #tpu.dot_dimension_numbers<[1], [0], [0], [1], [0, 0, 1, 1], [], []>} : vector<64x64xbf16>, vector<64x64xbf16>, vector<64x64xf32> -> vector<64x64xf32>
    %256 = arith.addf %249, %255 : vector<64x64xf32>
    %c3 = arith.constant 3 : index
    %c8_246 = arith.constant 8 : index
    %c8_247 = arith.constant 8 : index
    %c0_248 = arith.constant 0 : index
    %257 = vector.load %arg11[%c3, %c8_246, %c8_247, %c0_248] : memref<16x16x16x64xf32, #tpu.memory_space<vmem>>, vector<1x8x8x64xf32>
    %258 = vector.shape_cast %257 : vector<1x8x8x64xf32> to vector<8x8x64xf32>
    %259 = vector.shape_cast %258 : vector<8x8x64xf32> to vector<64x64xf32>
    %260 = arith.truncf %259 : vector<64x64xf32> to vector<64x64xbf16>
    %c256_249 = arith.constant 256 : index
    %c0_250 = arith.constant 0 : index
    %261 = vector.load %arg4[%c256_249, %c0_250] : memref<576x64xbf16, #tpu.memory_space<vmem>>, vector<64x64xbf16>
    %cst_251 = arith.constant dense<0.000000e+00> : vector<64x64xf32>
    %262 = tpu.matmul %260, %261, %cst_251 {dimension_numbers = #tpu.dot_dimension_numbers<[1], [0], [0], [1], [0, 0, 1, 1], [], []>} : vector<64x64xbf16>, vector<64x64xbf16>, vector<64x64xf32> -> vector<64x64xf32>
    %263 = arith.addf %256, %262 : vector<64x64xf32>
    %c7_252 = arith.constant 7 : index
    %c8_253 = arith.constant 8 : index
    %c8_254 = arith.constant 8 : index
    %c0_255 = arith.constant 0 : index
    %264 = vector.load %arg11[%c7_252, %c8_253, %c8_254, %c0_255] : memref<16x16x16x64xf32, #tpu.memory_space<vmem>>, vector<1x8x8x64xf32>
    %265 = vector.shape_cast %264 : vector<1x8x8x64xf32> to vector<8x8x64xf32>
    %266 = vector.shape_cast %265 : vector<8x8x64xf32> to vector<64x64xf32>
    %267 = arith.truncf %266 : vector<64x64xf32> to vector<64x64xbf16>
    %c320_256 = arith.constant 320 : index
    %c0_257 = arith.constant 0 : index
    %268 = vector.load %arg4[%c320_256, %c0_257] : memref<576x64xbf16, #tpu.memory_space<vmem>>, vector<64x64xbf16>
    %cst_258 = arith.constant dense<0.000000e+00> : vector<64x64xf32>
    %269 = tpu.matmul %267, %268, %cst_258 {dimension_numbers = #tpu.dot_dimension_numbers<[1], [0], [0], [1], [0, 0, 1, 1], [], []>} : vector<64x64xbf16>, vector<64x64xbf16>, vector<64x64xf32> -> vector<64x64xf32>
    %270 = arith.addf %263, %269 : vector<64x64xf32>
    %c14_259 = arith.constant 14 : index
    %c8_260 = arith.constant 8 : index
    %c8_261 = arith.constant 8 : index
    %c0_262 = arith.constant 0 : index
    %271 = vector.load %arg11[%c14_259, %c8_260, %c8_261, %c0_262] : memref<16x16x16x64xf32, #tpu.memory_space<vmem>>, vector<1x8x8x64xf32>
    %272 = vector.shape_cast %271 : vector<1x8x8x64xf32> to vector<8x8x64xf32>
    %273 = vector.shape_cast %272 : vector<8x8x64xf32> to vector<64x64xf32>
    %274 = arith.truncf %273 : vector<64x64xf32> to vector<64x64xbf16>
    %c384_263 = arith.constant 384 : index
    %c0_264 = arith.constant 0 : index
    %275 = vector.load %arg4[%c384_263, %c0_264] : memref<576x64xbf16, #tpu.memory_space<vmem>>, vector<64x64xbf16>
    %cst_265 = arith.constant dense<0.000000e+00> : vector<64x64xf32>
    %276 = tpu.matmul %274, %275, %cst_265 {dimension_numbers = #tpu.dot_dimension_numbers<[1], [0], [0], [1], [0, 0, 1, 1], [], []>} : vector<64x64xbf16>, vector<64x64xbf16>, vector<64x64xf32> -> vector<64x64xf32>
    %277 = arith.addf %270, %276 : vector<64x64xf32>
    %c11_266 = arith.constant 11 : index
    %c8_267 = arith.constant 8 : index
    %c8_268 = arith.constant 8 : index
    %c0_269 = arith.constant 0 : index
    %278 = vector.load %arg11[%c11_266, %c8_267, %c8_268, %c0_269] : memref<16x16x16x64xf32, #tpu.memory_space<vmem>>, vector<1x8x8x64xf32>
    %279 = vector.shape_cast %278 : vector<1x8x8x64xf32> to vector<8x8x64xf32>
    %280 = vector.shape_cast %279 : vector<8x8x64xf32> to vector<64x64xf32>
    %281 = arith.truncf %280 : vector<64x64xf32> to vector<64x64xbf16>
    %c448_270 = arith.constant 448 : index
    %c0_271 = arith.constant 0 : index
    %282 = vector.load %arg4[%c448_270, %c0_271] : memref<576x64xbf16, #tpu.memory_space<vmem>>, vector<64x64xbf16>
    %cst_272 = arith.constant dense<0.000000e+00> : vector<64x64xf32>
    %283 = tpu.matmul %281, %282, %cst_272 {dimension_numbers = #tpu.dot_dimension_numbers<[1], [0], [0], [1], [0, 0, 1, 1], [], []>} : vector<64x64xbf16>, vector<64x64xbf16>, vector<64x64xf32> -> vector<64x64xf32>
    %284 = arith.addf %277, %283 : vector<64x64xf32>
    %c15_273 = arith.constant 15 : index
    %c8_274 = arith.constant 8 : index
    %c8_275 = arith.constant 8 : index
    %c0_276 = arith.constant 0 : index
    %285 = vector.load %arg11[%c15_273, %c8_274, %c8_275, %c0_276] : memref<16x16x16x64xf32, #tpu.memory_space<vmem>>, vector<1x8x8x64xf32>
    %286 = vector.shape_cast %285 : vector<1x8x8x64xf32> to vector<8x8x64xf32>
    %287 = vector.shape_cast %286 : vector<8x8x64xf32> to vector<64x64xf32>
    %288 = arith.truncf %287 : vector<64x64xf32> to vector<64x64xbf16>
    %c512_277 = arith.constant 512 : index
    %c0_278 = arith.constant 0 : index
    %289 = vector.load %arg4[%c512_277, %c0_278] : memref<576x64xbf16, #tpu.memory_space<vmem>>, vector<64x64xbf16>
    %cst_279 = arith.constant dense<0.000000e+00> : vector<64x64xf32>
    %290 = tpu.matmul %288, %289, %cst_279 {dimension_numbers = #tpu.dot_dimension_numbers<[1], [0], [0], [1], [0, 0, 1, 1], [], []>} : vector<64x64xbf16>, vector<64x64xbf16>, vector<64x64xf32> -> vector<64x64xf32>
    %291 = arith.addf %284, %290 : vector<64x64xf32>
    %c0_280 = arith.constant 0 : index
    %c0_281 = arith.constant 0 : index
    %292 = vector.load %arg5[%c0_280, %c0_281] : memref<1x64xf32, #tpu.memory_space<vmem>>, vector<1x64xf32>
    %293 = vector.broadcast %292 : vector<1x64xf32> to vector<64x64xf32>
    %294 = arith.addf %291, %293 : vector<64x64xf32>
    %c1_282 = arith.constant 1 : index
    %c1_283 = arith.constant 1 : index
    %c0_284 = arith.constant 0 : index
    %c0_285 = arith.constant 0 : index
    %295 = vector.load %arg9[%c1_282, %c1_283, %c0_284, %c0_285] : memref<2x2x64x64xf32, #tpu.memory_space<vmem>>, vector<1x1x64x64xf32>
    %296 = vector.shape_cast %295 : vector<1x1x64x64xf32> to vector<64x64xf32>
    %297 = vector.shape_cast %294 : vector<64x64xf32> to vector<1x1x64x64xf32>
    tpu.vector_store %arg9[%c1_282, %c1_283, %c0_284, %c0_285], %297 {strides = array<i32>} : memref<2x2x64x64xf32, #tpu.memory_space<vmem>>, vector<1x1x64x64xf32>,
    %298 = vector.shape_cast %294 : vector<64x64xf32> to vector<8x8x64xf32>
    %c3_286 = arith.constant 3 : index
    %c8_287 = arith.constant 8 : index
    %c8_288 = arith.constant 8 : index
    %c0_289 = arith.constant 0 : index
    %299 = vector.load %arg12[%c3_286, %c8_287, %c8_288, %c0_289] : memref<4x16x16x64xf32, #tpu.memory_space<vmem>>, vector<1x8x8x64xf32>
    %300 = vector.shape_cast %299 : vector<1x8x8x64xf32> to vector<8x8x64xf32>
    %301 = vector.shape_cast %298 : vector<8x8x64xf32> to vector<1x8x8x64xf32>
    tpu.vector_store %arg12[%c3_286, %c8_287, %c8_288, %c0_289], %301 {strides = array<i32>} : memref<4x16x16x64xf32, #tpu.memory_space<vmem>>, vector<1x8x8x64xf32>,
    %c3_290 = arith.constant 3 : index
    %c7_291 = arith.constant 7 : index
    %c7_292 = arith.constant 7 : index
    %c0_293 = arith.constant 0 : index
    %302 = vector.load %arg12[%c3_290, %c7_291, %c7_292, %c0_293] : memref<4x16x16x64xf32, #tpu.memory_space<vmem>>, vector<1x8x8x64xf32>
    %303 = vector.shape_cast %302 : vector<1x8x8x64xf32> to vector<8x8x64xf32>
    %304 = vector.shape_cast %303 : vector<8x8x64xf32> to vector<64x64xf32>
    %305 = arith.truncf %304 : vector<64x64xf32> to vector<64x64xbf16>
    %c0_294 = arith.constant 0 : index
    %c0_295 = arith.constant 0 : index
    %306 = vector.load %arg6[%c0_294, %c0_295] : memref<576x128xbf16, #tpu.memory_space<vmem>>, vector<64x128xbf16>
    %cst_296 = arith.constant dense<0.000000e+00> : vector<64x128xf32>
    %307 = tpu.matmul %305, %306, %cst_296 {dimension_numbers = #tpu.dot_dimension_numbers<[1], [0], [0], [1], [0, 0, 1, 1], [], []>} : vector<64x64xbf16>, vector<64x128xbf16>, vector<64x128xf32> -> vector<64x128xf32>
    %c2_297 = arith.constant 2 : index
    %c7_298 = arith.constant 7 : index
    %c8_299 = arith.constant 8 : index
    %c0_300 = arith.constant 0 : index
    %308 = vector.load %arg12[%c2_297, %c7_298, %c8_299, %c0_300] : memref<4x16x16x64xf32, #tpu.memory_space<vmem>>, vector<1x8x8x64xf32>
    %309 = vector.shape_cast %308 : vector<1x8x8x64xf32> to vector<8x8x64xf32>
    %310 = vector.shape_cast %309 : vector<8x8x64xf32> to vector<64x64xf32>
    %311 = arith.truncf %310 : vector<64x64xf32> to vector<64x64xbf16>
    %c64_301 = arith.constant 64 : index
    %c0_302 = arith.constant 0 : index
    %312 = vector.load %arg6[%c64_301, %c0_302] : memref<576x128xbf16, #tpu.memory_space<vmem>>, vector<64x128xbf16>
    %cst_303 = arith.constant dense<0.000000e+00> : vector<64x128xf32>
    %313 = tpu.matmul %311, %312, %cst_303 {dimension_numbers = #tpu.dot_dimension_numbers<[1], [0], [0], [1], [0, 0, 1, 1], [], []>} : vector<64x64xbf16>, vector<64x128xbf16>, vector<64x128xf32> -> vector<64x128xf32>
    %314 = arith.addf %307, %313 : vector<64x128xf32>
    %c3_304 = arith.constant 3 : index
    %c7_305 = arith.constant 7 : index
    %c8_306 = arith.constant 8 : index
    %c0_307 = arith.constant 0 : index
    %315 = vector.load %arg12[%c3_304, %c7_305, %c8_306, %c0_307] : memref<4x16x16x64xf32, #tpu.memory_space<vmem>>, vector<1x8x8x64xf32>
    %316 = vector.shape_cast %315 : vector<1x8x8x64xf32> to vector<8x8x64xf32>
    %317 = vector.shape_cast %316 : vector<8x8x64xf32> to vector<64x64xf32>
    %318 = arith.truncf %317 : vector<64x64xf32> to vector<64x64xbf16>
    %c128_308 = arith.constant 128 : index
    %c0_309 = arith.constant 0 : index
    %319 = vector.load %arg6[%c128_308, %c0_309] : memref<576x128xbf16, #tpu.memory_space<vmem>>, vector<64x128xbf16>
    %cst_310 = arith.constant dense<0.000000e+00> : vector<64x128xf32>
    %320 = tpu.matmul %318, %319, %cst_310 {dimension_numbers = #tpu.dot_dimension_numbers<[1], [0], [0], [1], [0, 0, 1, 1], [], []>} : vector<64x64xbf16>, vector<64x128xbf16>, vector<64x128xf32> -> vector<64x128xf32>
    %321 = arith.addf %314, %320 : vector<64x128xf32>
    %c1_311 = arith.constant 1 : index
    %c8_312 = arith.constant 8 : index
    %c7_313 = arith.constant 7 : index
    %c0_314 = arith.constant 0 : index
    %322 = vector.load %arg12[%c1_311, %c8_312, %c7_313, %c0_314] : memref<4x16x16x64xf32, #tpu.memory_space<vmem>>, vector<1x8x8x64xf32>
    %323 = vector.shape_cast %322 : vector<1x8x8x64xf32> to vector<8x8x64xf32>
    %324 = vector.shape_cast %323 : vector<8x8x64xf32> to vector<64x64xf32>
    %325 = arith.truncf %324 : vector<64x64xf32> to vector<64x64xbf16>
    %c192_315 = arith.constant 192 : index
    %c0_316 = arith.constant 0 : index
    %326 = vector.load %arg6[%c192_315, %c0_316] : memref<576x128xbf16, #tpu.memory_space<vmem>>, vector<64x128xbf16>
    %cst_317 = arith.constant dense<0.000000e+00> : vector<64x128xf32>
    %327 = tpu.matmul %325, %326, %cst_317 {dimension_numbers = #tpu.dot_dimension_numbers<[1], [0], [0], [1], [0, 0, 1, 1], [], []>} : vector<64x64xbf16>, vector<64x128xbf16>, vector<64x128xf32> -> vector<64x128xf32>
    %328 = arith.addf %321, %327 : vector<64x128xf32>
    %c0_318 = arith.constant 0 : index
    %c8_319 = arith.constant 8 : index
    %c8_320 = arith.constant 8 : index
    %c0_321 = arith.constant 0 : index
    %329 = vector.load %arg12[%c0_318, %c8_319, %c8_320, %c0_321] : memref<4x16x16x64xf32, #tpu.memory_space<vmem>>, vector<1x8x8x64xf32>
    %330 = vector.shape_cast %329 : vector<1x8x8x64xf32> to vector<8x8x64xf32>
    %331 = vector.shape_cast %330 : vector<8x8x64xf32> to vector<64x64xf32>
    %332 = arith.truncf %331 : vector<64x64xf32> to vector<64x64xbf16>
    %c256_322 = arith.constant 256 : index
    %c0_323 = arith.constant 0 : index
    %333 = vector.load %arg6[%c256_322, %c0_323] : memref<576x128xbf16, #tpu.memory_space<vmem>>, vector<64x128xbf16>
    %cst_324 = arith.constant dense<0.000000e+00> : vector<64x128xf32>
    %334 = tpu.matmul %332, %333, %cst_324 {dimension_numbers = #tpu.dot_dimension_numbers<[1], [0], [0], [1], [0, 0, 1, 1], [], []>} : vector<64x64xbf16>, vector<64x128xbf16>, vector<64x128xf32> -> vector<64x128xf32>
    %335 = arith.addf %328, %334 : vector<64x128xf32>
    %c1_325 = arith.constant 1 : index
    %c8_326 = arith.constant 8 : index
    %c8_327 = arith.constant 8 : index
    %c0_328 = arith.constant 0 : index
    %336 = vector.load %arg12[%c1_325, %c8_326, %c8_327, %c0_328] : memref<4x16x16x64xf32, #tpu.memory_space<vmem>>, vector<1x8x8x64xf32>
    %337 = vector.shape_cast %336 : vector<1x8x8x64xf32> to vector<8x8x64xf32>
    %338 = vector.shape_cast %337 : vector<8x8x64xf32> to vector<64x64xf32>
    %339 = arith.truncf %338 : vector<64x64xf32> to vector<64x64xbf16>
    %c320_329 = arith.constant 320 : index
    %c0_330 = arith.constant 0 : index
    %340 = vector.load %arg6[%c320_329, %c0_330] : memref<576x128xbf16, #tpu.memory_space<vmem>>, vector<64x128xbf16>
    %cst_331 = arith.constant dense<0.000000e+00> : vector<64x128xf32>
    %341 = tpu.matmul %339, %340, %cst_331 {dimension_numbers = #tpu.dot_dimension_numbers<[1], [0], [0], [1], [0, 0, 1, 1], [], []>} : vector<64x64xbf16>, vector<64x128xbf16>, vector<64x128xf32> -> vector<64x128xf32>
    %342 = arith.addf %335, %341 : vector<64x128xf32>
    %c3_332 = arith.constant 3 : index
    %c8_333 = arith.constant 8 : index
    %c7_334 = arith.constant 7 : index
    %c0_335 = arith.constant 0 : index
    %343 = vector.load %arg12[%c3_332, %c8_333, %c7_334, %c0_335] : memref<4x16x16x64xf32, #tpu.memory_space<vmem>>, vector<1x8x8x64xf32>
    %344 = vector.shape_cast %343 : vector<1x8x8x64xf32> to vector<8x8x64xf32>
    %345 = vector.shape_cast %344 : vector<8x8x64xf32> to vector<64x64xf32>
    %346 = arith.truncf %345 : vector<64x64xf32> to vector<64x64xbf16>
    %c384_336 = arith.constant 384 : index
    %c0_337 = arith.constant 0 : index
    %347 = vector.load %arg6[%c384_336, %c0_337] : memref<576x128xbf16, #tpu.memory_space<vmem>>, vector<64x128xbf16>
    %cst_338 = arith.constant dense<0.000000e+00> : vector<64x128xf32>
    %348 = tpu.matmul %346, %347, %cst_338 {dimension_numbers = #tpu.dot_dimension_numbers<[1], [0], [0], [1], [0, 0, 1, 1], [], []>} : vector<64x64xbf16>, vector<64x128xbf16>, vector<64x128xf32> -> vector<64x128xf32>
    %349 = arith.addf %342, %348 : vector<64x128xf32>
    %c2_339 = arith.constant 2 : index
    %c8_340 = arith.constant 8 : index
    %c8_341 = arith.constant 8 : index
    %c0_342 = arith.constant 0 : index
    %350 = vector.load %arg12[%c2_339, %c8_340, %c8_341, %c0_342] : memref<4x16x16x64xf32, #tpu.memory_space<vmem>>, vector<1x8x8x64xf32>
    %351 = vector.shape_cast %350 : vector<1x8x8x64xf32> to vector<8x8x64xf32>
    %352 = vector.shape_cast %351 : vector<8x8x64xf32> to vector<64x64xf32>
    %353 = arith.truncf %352 : vector<64x64xf32> to vector<64x64xbf16>
    %c448_343 = arith.constant 448 : index
    %c0_344 = arith.constant 0 : index
    %354 = vector.load %arg6[%c448_343, %c0_344] : memref<576x128xbf16, #tpu.memory_space<vmem>>, vector<64x128xbf16>
    %cst_345 = arith.constant dense<0.000000e+00> : vector<64x128xf32>
    %355 = tpu.matmul %353, %354, %cst_345 {dimension_numbers = #tpu.dot_dimension_numbers<[1], [0], [0], [1], [0, 0, 1, 1], [], []>} : vector<64x64xbf16>, vector<64x128xbf16>, vector<64x128xf32> -> vector<64x128xf32>
    %356 = arith.addf %349, %355 : vector<64x128xf32>
    %c3_346 = arith.constant 3 : index
    %c8_347 = arith.constant 8 : index
    %c8_348 = arith.constant 8 : index
    %c0_349 = arith.constant 0 : index
    %357 = vector.load %arg12[%c3_346, %c8_347, %c8_348, %c0_349] : memref<4x16x16x64xf32, #tpu.memory_space<vmem>>, vector<1x8x8x64xf32>
    %358 = vector.shape_cast %357 : vector<1x8x8x64xf32> to vector<8x8x64xf32>
    %359 = vector.shape_cast %358 : vector<8x8x64xf32> to vector<64x64xf32>
    %360 = arith.truncf %359 : vector<64x64xf32> to vector<64x64xbf16>
    %c512_350 = arith.constant 512 : index
    %c0_351 = arith.constant 0 : index
    %361 = vector.load %arg6[%c512_350, %c0_351] : memref<576x128xbf16, #tpu.memory_space<vmem>>, vector<64x128xbf16>
    %cst_352 = arith.constant dense<0.000000e+00> : vector<64x128xf32>
    %362 = tpu.matmul %360, %361, %cst_352 {dimension_numbers = #tpu.dot_dimension_numbers<[1], [0], [0], [1], [0, 0, 1, 1], [], []>} : vector<64x64xbf16>, vector<64x128xbf16>, vector<64x128xf32> -> vector<64x128xf32>
    %363 = arith.addf %356, %362 : vector<64x128xf32>
    %c0_353 = arith.constant 0 : index
    %c0_354 = arith.constant 0 : index
    %364 = vector.load %arg7[%c0_353, %c0_354] : memref<1x128xf32, #tpu.memory_space<vmem>>, vector<1x128xf32>
    %365 = vector.broadcast %364 : vector<1x128xf32> to vector<64x128xf32>
    %366 = arith.addf %363, %365 : vector<64x128xf32>
    %367 = tpu.transpose %366, [1, 0] : vector<64x128xf32> -> vector<128x64xf32>
    %c0_355 = arith.constant 0 : index
    %c0_356 = arith.constant 0 : index
    %368 = vector.load %arg10[%c0_355, %c0_356] : memref<128x64xf32, #tpu.memory_space<vmem>>, vector<128x64xf32>
    tpu.vector_store %arg10[%c0_355, %c0_356], %367 {strides = array<i32>} : memref<128x64xf32, #tpu.memory_space<vmem>>, vector<128x64xf32>,
    return
  }
  func.func @transform_0(%arg0: i32) -> (i32, i32) {
    %c0_i32 = arith.constant 0 : i32
    %c0_i32_0 = arith.constant 0 : i32
    %c0_i32_1 = arith.constant 0 : i32
    return %c0_i32, %c0_i32_0 : i32, i32
  }
  func.func @transform_1(%arg0: i32) -> (i32, i32) {
    %c0_i32 = arith.constant 0 : i32
    %c0_i32_0 = arith.constant 0 : i32
    %c0_i32_1 = arith.constant 0 : i32
    return %c0_i32, %c0_i32_0 : i32, i32
  }
  func.func @transform_2(%arg0: i32) -> (i32, i32) {
    %c0_i32 = arith.constant 0 : i32
    %c0_i32_0 = arith.constant 0 : i32
    %c0_i32_1 = arith.constant 0 : i32
    return %c0_i32, %c0_i32_0 : i32, i32
  }
  func.func @transform_3(%arg0: i32) -> (i32, i32) {
    %c0_i32 = arith.constant 0 : i32
    %c0_i32_0 = arith.constant 0 : i32
    %c0_i32_1 = arith.constant 0 : i32
    return %c0_i32, %c0_i32_0 : i32, i32
  }
  func.func @transform_4(%arg0: i32) -> (i32, i32) {
    %c0_i32 = arith.constant 0 : i32
    %c0_i32_0 = arith.constant 0 : i32
    %c0_i32_1 = arith.constant 0 : i32
    return %c0_i32, %c0_i32_0 : i32, i32
  }
  func.func @transform_5(%arg0: i32) -> (i32, i32) {
    %c0_i32 = arith.constant 0 : i32
    %c0_i32_0 = arith.constant 0 : i32
    %c0_i32_1 = arith.constant 0 : i32
    return %c0_i32, %c0_i32_0 : i32, i32
  }
  func.func @transform_6(%arg0: i32) -> (i32, i32) {
    %c0_i32 = arith.constant 0 : i32
    %c0_i32_0 = arith.constant 0 : i32
    %c0_i32_1 = arith.constant 0 : i32
    return %c0_i32, %c0_i32_0 : i32, i32
  }
  func.func @transform_7(%arg0: i32) -> (i32, i32) {
    %c0_i32 = arith.constant 0 : i32
    %c0_i32_0 = arith.constant 0 : i32
    %c0_i32_1 = arith.constant 0 : i32
    return %c0_i32, %c0_i32_0 : i32, i32
  }
  func.func @transform_8(%arg0: i32) -> (i32, i32, i32, i32) {
    %c0_i32 = arith.constant 0 : i32
    %c0_i32_0 = arith.constant 0 : i32
    %c0_i32_1 = arith.constant 0 : i32
    %c0_i32_2 = arith.constant 0 : i32
    %c0_i32_3 = arith.constant 0 : i32
    return %c0_i32, %c0_i32_0, %c0_i32_1, %c0_i32_2 : i32, i32, i32, i32
  }
  func.func @transform_9(%arg0: i32) -> (i32, i32) {
    %c0_i32 = arith.constant 0 : i32
    %c0_i32_0 = arith.constant 0 : i32
    %c0_i32_1 = arith.constant 0 : i32
    return %c0_i32, %c0_i32_0 : i32, i32
  }
}

</mosaic_0001>

<bundles_post_ra>
// kernel: model_forward.1
= control target key start
LH: loop header
LB: loop body
LE: loop exit
PB: predicated region body
PF: predicated region fallthrough
CT: control target
= control target key end

     0   :  { %vm690_vm0 = vcmask 1044480   ;;  %vm691_vm1 = vcmask 1045504   ;;  %v7943_v2 = vmov 65535   ;;  %vm497_vm2 = vcmask 220160   ;;  %s11030_s1 = inlined_call_operand.vmem [shape: bf16[27,64], index: 1, kind: input, shape index: {}]   ;;  %s11031_s2 = inlined_call_operand.vmem [shape: f32[1,64], index: 2, kind: input, shape index: {}]   ;;  %s11032_s0 = inlined_call_operand.vmem [shape: bf16[1024,27], index: 0, kind: input, shape index: {}]   ;;  %s11033_s3 = inlined_call_operand.vmem [shape: bf16[576,64], index: 3, kind: input, shape index: {}]   ;;  %s11034_s4 = inlined_call_operand.vmem [shape: f32[1,64], index: 4, kind: input, shape index: {}]   ;;  %s11035_s8 = inlined_call_operand.vmem [shape: f32[2,2,64,64], index: 8, kind: output, shape index: {1}]   ;;  %s11036_s5 = inlined_call_operand.vmem [shape: bf16[576,128], index: 5, kind: input, shape index: {}]   ;;  %s11037_s6 = inlined_call_operand.vmem [shape: f32[1,128], index: 6, kind: input, shape index: {}]   ;;  %s11038_s7 = inlined_call_operand.vmem [shape: f32[64,1024], index: 7, kind: output, shape index: {0}]   ;;  %s11039_s9 = inlined_call_operand.vmem [shape: f32[128,64], index: 9, kind: output, shape index: {2}]  }
   0x1   :  { %v6695_v0 = vld [vmem:[%s11030_s1 + $0x8] sm:$0xf]  ;;  %v7750_v1 = vld [vmem:[%s11030_s1 + $0x8] sm:$0x30]  ;;  %v692_v3 = vsel %vm690_vm0, 4294967295, %v7943_v2  ;;  %v7749_v7 = vld [vmem:[%s11030_s1] sm:$0xff] }
   0x2   :  { %v6696_v4 = vor.u32 %v7750_v1, %v6695_v0  ;;  %v693_v5 = vsel %vm691_vm1, %v692_v3, 0  ;;  %v7685_v8 = vld [vmem:[%s11032_s0] sm:$0xff]  ;;  %v7686_v9 = vld [vmem:[%s11032_s0 + $0x8] sm:$0xff]  ;;  %v7687_v10 = vld [vmem:[%s11032_s0 + $0x10] sm:$0xff]  ;;  %vm1346_vm3 = vcmask 523264   ;;  %v7944_v15 = vmov 0.0  }
   0x3   :  { %v7688_v11 = vld [vmem:[%s11032_s0 + $0x18] sm:$0xff]  ;;  %v7689_v12 = vld [vmem:[%s11032_s0 + $0x20] sm:$0xff]  ;;  %v7690_v13 = vld [vmem:[%s11032_s0 + $0x28] sm:$0xff]  ;;  %1364 = vst.msk [vmem:[#allocation2 + $0x88] sm:$0xff] %vm1346_vm3, %v7944_v15 }
   0x4   :  { %v695_v6 = vand.u32 %v6696_v4, %v693_v5  ;;  %v7691_v14 = vld [vmem:[%s11032_s0 + $0x30] sm:$0xff]  ;;  %v7692_v16 = vld [vmem:[%s11032_s0 + $0x38] sm:$0xff]  ;;  %1366 = vst.msk [vmem:[#allocation2 + $0x98] sm:$0xff] %vm1346_vm3, %v7944_v15  ;;  %v7935_v17 = vld [vmem:[%s11031_s2] ss:$0 sm:$0xff] }
   0x5   :  { %1368 = vst.msk [vmem:[#allocation2 + $0xa8] sm:$0xff] %vm1346_vm3, %v7944_v15  ;;  %v7693_v18 = vld [vmem:[%s11032_s0 + $0x40] sm:$0xff]  ;;  %v7694_v26 = vld [vmem:[%s11032_s0 + $0x48] sm:$0xff]  ;;  %v7695_v29 = vld [vmem:[%s11032_s0 + $0x50] sm:$0xff] }
   0x6   :  { %703 = vmatpush.bf16.msra.mxu0 %v695_v6  ;;  %7931 = vmatpush.bf16.msra.mxu1 %v695_v6  ;;  %1370 = vst.msk [vmem:[#allocation2 + $0xb8] sm:$0xff] %vm1346_vm3, %v7944_v15  ;;  %v8446_v24 = vld [vmem:[%s11031_s2] ss:$0 sm:$0xff]  ;;  %v7696_v34 = vld [vmem:[%s11032_s0 + $0x58] sm:$0xff]  ;;  %v7698_v44 = vld [vmem:[%s11032_s0 + $0x68] sm:$0xff] }
   0x7   :  { %1372 = vst.msk [vmem:[#allocation2 + $0xc8] sm:$0xff] %vm1346_vm3, %v7944_v15  ;;  %v7697_v39 = vld [vmem:[%s11032_s0 + $0x60] sm:$0xff]  ;;  %v7699_v49 = vld [vmem:[%s11032_s0 + $0x70] sm:$0xff]  ;;  %v7700_v54 = vld [vmem:[%s11032_s0 + $0x78] sm:$0xff] }
   0x8   :  { %1374 = vst.msk [vmem:[#allocation2 + $0xd8] sm:$0xff] %vm1346_vm3, %v7944_v15  ;;  %v7701_v59 = vld [vmem:[%s11032_s0 + $0x80] sm:$0xff]  ;;  %v7702_v0 = vld [vmem:[%s11032_s0 + $0x88] sm:$0xff]  ;;  %v7703_v5 = vld [vmem:[%s11032_s0 + $0x90] sm:$0xff] }
   0x9   :  { %1376 = vst.msk [vmem:[#allocation2 + $0xe8] sm:$0xff] %vm1346_vm3, %v7944_v15 }
   0xa   :  { %704 = vmatpush.bf16.msra.mxu0 %v7749_v7  ;;  %7932 = vmatpush.bf16.msra.mxu1 %v7749_v7  ;;  %1378 = vst.msk [vmem:[#allocation2 + $0xf8] sm:$0xff] %vm1346_vm3, %v7944_v15 }
   0xb   :  { %1396 = vst.msk [vmem:[#allocation2 + $0x188] sm:$0xff] %vm1346_vm3, %v7944_v15 }
   0xc   :  { %1398 = vst.msk [vmem:[#allocation2 + $0x198] sm:$0xff] %vm1346_vm3, %v7944_v15 }
   0xd   :  { %6697 = vmatmul.msk.bf16.vlgmr.msra.gmra.mxu0 %vm497_vm2, %v7685_v8  ;;  %1400 = vst.msk [vmem:[#allocation2 + $0x1a8] sm:$0xff] %vm1346_vm3, %v7944_v15 }
   0xe   :  { %1402 = vst.msk [vmem:[#allocation2 + $0x1b8] sm:$0xff] %vm1346_vm3, %v7944_v15 }
   0xf   :  { %1404 = vst.msk [vmem:[#allocation2 + $0x1c8] sm:$0xff] %vm1346_vm3, %v7944_v15 }
  0x10   :  { %1406 = vst.msk [vmem:[#allocation2 + $0x1d8] sm:$0xff] %vm1346_vm3, %v7944_v15 }
  0x11   :  { %1408 = vst.msk [vmem:[#allocation2 + $0x1e8] sm:$0xff] %vm1346_vm3, %v7944_v15 }
  0x12   :  { %1410 = vst.msk [vmem:[#allocation2 + $0x1f8] sm:$0xff] %vm1346_vm3, %v7944_v15 }
  0x13   :  { %1428 = vst.msk [vmem:[#allocation2 + $0x288] sm:$0xff] %vm1346_vm3, %v7944_v15 }
  0x14   :  { %1430 = vst.msk [vmem:[#allocation2 + $0x298] sm:$0xff] %vm1346_vm3, %v7944_v15 }
  0x15   :  { %1432 = vst.msk [vmem:[#allocation2 + $0x2a8] sm:$0xff] %vm1346_vm3, %v7944_v15 }
  0x16   :  { %1434 = vst.msk [vmem:[#allocation2 + $0x2b8] sm:$0xff] %vm1346_vm3, %v7944_v15 }
  0x17   :  { %1436 = vst.msk [vmem:[#allocation2 + $0x2c8] sm:$0xff] %vm1346_vm3, %v7944_v15 }
  0x18   :  { %1438 = vst.msk [vmem:[#allocation2 + $0x2d8] sm:$0xff] %vm1346_vm3, %v7944_v15 }
  0x19   :  { %1440 = vst.msk [vmem:[#allocation2 + $0x2e8] sm:$0xff] %vm1346_vm3, %v7944_v15 }
  0x1a   :  { %1442 = vst.msk [vmem:[#allocation2 + $0x2f8] sm:$0xff] %vm1346_vm3, %v7944_v15 }
  0x1b   :  { %1460 = vst.msk [vmem:[#allocation2 + $0x388] sm:$0xff] %vm1346_vm3, %v7944_v15 }
  0x1c   :  { %1462 = vst.msk [vmem:[#allocation2 + $0x398] sm:$0xff] %vm1346_vm3, %v7944_v15 }
  0x1d   :  { %6698 = vmatmul.msk.bf16.gmra.mxu0 %vm497_vm2, %v7686_v9  ;;  %1464 = vst.msk [vmem:[#allocation2 + $0x3a8] sm:$0xff] %vm1346_vm3, %v7944_v15 }
  0x1e   :  { %1466 = vst.msk [vmem:[#allocation2 + $0x3b8] sm:$0xff] %vm1346_vm3, %v7944_v15 }
  0x1f   :  { %1468 = vst.msk [vmem:[#allocation2 + $0x3c8] sm:$0xff] %vm1346_vm3, %v7944_v15 }
  0x20   :  { %1470 = vst.msk [vmem:[#allocation2 + $0x3d8] sm:$0xff] %vm1346_vm3, %v7944_v15 }
  0x21   :  { %1472 = vst.msk [vmem:[#allocation2 + $0x3e8] sm:$0xff] %vm1346_vm3, %v7944_v15 }
  0x22   :  { %1474 = vst.msk [vmem:[#allocation2 + $0x3f8] sm:$0xff] %vm1346_vm3, %v7944_v15 }
  0x23   :  { %1492 = vst.msk [vmem:[#allocation2 + $0x488] sm:$0xff] %vm1346_vm3, %v7944_v15 }
  0x24   :  { %1494 = vst.msk [vmem:[#allocation2 + $0x498] sm:$0xff] %vm1346_vm3, %v7944_v15 }
  0x25   :  { %1496 = vst.msk [vmem:[#allocation2 + $0x4a8] sm:$0xff] %vm1346_vm3, %v7944_v15 }
  0x26   :  { %1498 = vst.msk [vmem:[#allocation2 + $0x4b8] sm:$0xff] %vm1346_vm3, %v7944_v15 }
  0x27   :  { %1500 = vst.msk [vmem:[#allocation2 + $0x4c8] sm:$0xff] %vm1346_vm3, %v7944_v15 }
  0x28   :  { %1502 = vst.msk [vmem:[#allocation2 + $0x4d8] sm:$0xff] %vm1346_vm3, %v7944_v15 }
  0x29   :  { %1504 = vst.msk [vmem:[#allocation2 + $0x4e8] sm:$0xff] %vm1346_vm3, %v7944_v15 }
  0x2a   :  { %1506 = vst.msk [vmem:[#allocation2 + $0x4f8] sm:$0xff] %vm1346_vm3, %v7944_v15 }
  0x2b   :  { %1523 = vst.msk [vmem:[#allocation2 + $0x580] sm:$0xff] %vm1346_vm3, %v7944_v15 }
  0x2c   :  { %1524 = vst.msk [vmem:[#allocation2 + $0x588] sm:$0xff] %vm1346_vm3, %v7944_v15 }
  0x2d   :  { %6699 = vmatmul.msk.bf16.gmra.mxu0 %vm497_vm2, %v7687_v10  ;;  %1525 = vst.msk [vmem:[#allocation2 + $0x590] sm:$0xff] %vm1346_vm3, %v7944_v15  ;;  %v7704_v10 = vld [vmem:[%s11032_s0 + $0x98] sm:$0xff] }
  0x2e   :  { %1526 = vst.msk [vmem:[#allocation2 + $0x598] sm:$0xff] %vm1346_vm3, %v7944_v15 }
  0x2f   :  { %1527 = vst.msk [vmem:[#allocation2 + $0x5a0] sm:$0xff] %vm1346_vm3, %v7944_v15 }
  0x30   :  { %1528 = vst.msk [vmem:[#allocation2 + $0x5a8] sm:$0xff] %vm1346_vm3, %v7944_v15 }
  0x31   :  { %1529 = vst.msk [vmem:[#allocation2 + $0x5b0] sm:$0xff] %vm1346_vm3, %v7944_v15 }
  0x32   :  { %1530 = vst.msk [vmem:[#allocation2 + $0x5b8] sm:$0xff] %vm1346_vm3, %v7944_v15 }
  0x33   :  { %1531 = vst.msk [vmem:[#allocation2 + $0x5c0] sm:$0xff] %vm1346_vm3, %v7944_v15 }
  0x34   :  { %1532 = vst.msk [vmem:[#allocation2 + $0x5c8] sm:$0xff] %vm1346_vm3, %v7944_v15 }
  0x35   :  { %1533 = vst.msk [vmem:[#allocation2 + $0x5d0] sm:$0xff] %vm1346_vm3, %v7944_v15 }
  0x36   :  { %1534 = vst.msk [vmem:[#allocation2 + $0x5d8] sm:$0xff] %vm1346_vm3, %v7944_v15 }
  0x37   :  { %1535 = vst.msk [vmem:[#allocation2 + $0x5e0] sm:$0xff] %vm1346_vm3, %v7944_v15 }
  0x38   :  { %1536 = vst.msk [vmem:[#allocation2 + $0x5e8] sm:$0xff] %vm1346_vm3, %v7944_v15 }
  0x39   :  { %1537 = vst.msk [vmem:[#allocation2 + $0x5f0] sm:$0xff] %vm1346_vm3, %v7944_v15 }
  0x3a   :  { %1538 = vst.msk [vmem:[#allocation2 + $0x5f8] sm:$0xff] %vm1346_vm3, %v7944_v15 }
  0x3b   :  { %1556 = vst.msk [vmem:[#allocation2 + $0x688] sm:$0xff] %vm1346_vm3, %v7944_v15 }
  0x3c   :  { %1558 = vst.msk [vmem:[#allocation2 + $0x698] sm:$0xff] %vm1346_vm3, %v7944_v15 }
  0x3d   :  { %6700 = vmatmul.msk.bf16.gmra.mxu0 %vm497_vm2, %v7688_v11  ;;  %1560 = vst.msk [vmem:[#allocation2 + $0x6a8] sm:$0xff] %vm1346_vm3, %v7944_v15 }
  0x3e   :  { %1562 = vst.msk [vmem:[#allocation2 + $0x6b8] sm:$0xff] %vm1346_vm3, %v7944_v15 }
  0x3f   :  { %1564 = vst.msk [vmem:[#allocation2 + $0x6c8] sm:$0xff] %vm1346_vm3, %v7944_v15 }
  0x40   :  { %1566 = vst.msk [vmem:[#allocation2 + $0x6d8] sm:$0xff] %vm1346_vm3, %v7944_v15 }
  0x41   :  { %1568 = vst.msk [vmem:[#allocation2 + $0x6e8] sm:$0xff] %vm1346_vm3, %v7944_v15 }
  0x42   :  { %1570 = vst.msk [vmem:[#allocation2 + $0x6f8] sm:$0xff] %vm1346_vm3, %v7944_v15 }
  0x43   :  { %1587 = vst.msk [vmem:[#allocation2 + $0x780] sm:$0xff] %vm1346_vm3, %v7944_v15 }
  0x44   :  { %1588 = vst.msk [vmem:[#allocation2 + $0x788] sm:$0xff] %vm1346_vm3, %v7944_v15 }
  0x45   :  { %1589 = vst.msk [vmem:[#allocation2 + $0x790] sm:$0xff] %vm1346_vm3, %v7944_v15 }
  0x46   :  { %1590 = vst.msk [vmem:[#allocation2 + $0x798] sm:$0xff] %vm1346_vm3, %v7944_v15 }
  0x47   :  { %1591 = vst.msk [vmem:[#allocation2 + $0x7a0] sm:$0xff] %vm1346_vm3, %v7944_v15 }
  0x48   :  { %1592 = vst.msk [vmem:[#allocation2 + $0x7a8] sm:$0xff] %vm1346_vm3, %v7944_v15 }
  0x49   :  { %1593 = vst.msk [vmem:[#allocation2 + $0x7b0] sm:$0xff] %vm1346_vm3, %v7944_v15 }
  0x4a   :  { %1594 = vst.msk [vmem:[#allocation2 + $0x7b8] sm:$0xff] %vm1346_vm3, %v7944_v15 }
  0x4b   :  { %1595 = vst.msk [vmem:[#allocation2 + $0x7c0] sm:$0xff] %vm1346_vm3, %v7944_v15 }
  0x4c   :  { %1596 = vst.msk [vmem:[#allocation2 + $0x7c8] sm:$0xff] %vm1346_vm3, %v7944_v15 }
  0x4d   :  { %6701 = vmatmul.msk.bf16.gmra.mxu0 %vm497_vm2, %v7689_v12  ;;  %1597 = vst.msk [vmem:[#allocation2 + $0x7d0] sm:$0xff] %vm1346_vm3, %v7944_v15 }
  0x4e   :  { %1598 = vst.msk [vmem:[#allocation2 + $0x7d8] sm:$0xff] %vm1346_vm3, %v7944_v15 }
  0x4f   :  { %1599 = vst.msk [vmem:[#allocation2 + $0x7e0] sm:$0xff] %vm1346_vm3, %v7944_v15 }
  0x50   :  { %1600 = vst.msk [vmem:[#allocation2 + $0x7e8] sm:$0xff] %vm1346_vm3, %v7944_v15 }
  0x51   :  { %1601 = vst.msk [vmem:[#allocation2 + $0x7f0] sm:$0xff] %vm1346_vm3, %v7944_v15 }
  0x52   :  { %1602 = vst.msk [vmem:[#allocation2 + $0x7f8] sm:$0xff] %vm1346_vm3, %v7944_v15 }
  0x53   :  { %1620 = vst.msk [vmem:[#allocation2 + $0x888] sm:$0xff] %vm1346_vm3, %v7944_v15 }
  0x54   :  { %1622 = vst.msk [vmem:[#allocation2 + $0x898] sm:$0xff] %vm1346_vm3, %v7944_v15 }
  0x55   :  { %1624 = vst.msk [vmem:[#allocation2 + $0x8a8] sm:$0xff] %vm1346_vm3, %v7944_v15 }
  0x56   :  { %1626 = vst.msk [vmem:[#allocation2 + $0x8b8] sm:$0xff] %vm1346_vm3, %v7944_v15 }
  0x57   :  { %1628 = vst.msk [vmem:[#allocation2 + $0x8c8] sm:$0xff] %vm1346_vm3, %v7944_v15 }
  0x58   :  { %1630 = vst.msk [vmem:[#allocation2 + $0x8d8] sm:$0xff] %vm1346_vm3, %v7944_v15 }
  0x59   :  { %1632 = vst.msk [vmem:[#allocation2 + $0x8e8] sm:$0xff] %vm1346_vm3, %v7944_v15 }
  0x5a   :  { %1634 = vst.msk [vmem:[#allocation2 + $0x8f8] sm:$0xff] %vm1346_vm3, %v7944_v15 }
  0x5b   :  { %1652 = vst.msk [vmem:[#allocation2 + $0x988] sm:$0xff] %vm1346_vm3, %v7944_v15 }
  0x5c   :  { %1654 = vst.msk [vmem:[#allocation2 + $0x998] sm:$0xff] %vm1346_vm3, %v7944_v15 }
  0x5d   :  { %6702 = vmatmul.msk.bf16.gmra.mxu0 %vm497_vm2, %v7690_v13  ;;  %1656 = vst.msk [vmem:[#allocation2 + $0x9a8] sm:$0xff] %vm1346_vm3, %v7944_v15 }
  0x5e   :  { %1658 = vst.msk [vmem:[#allocation2 + $0x9b8] sm:$0xff] %vm1346_vm3, %v7944_v15 }
  0x5f   :  { %1660 = vst.msk [vmem:[#allocation2 + $0x9c8] sm:$0xff] %vm1346_vm3, %v7944_v15 }
  0x60   :  { %1662 = vst.msk [vmem:[#allocation2 + $0x9d8] sm:$0xff] %vm1346_vm3, %v7944_v15 }
  0x61   :  { %1664 = vst.msk [vmem:[#allocation2 + $0x9e8] sm:$0xff] %vm1346_vm3, %v7944_v15 }
  0x62   :  { %1666 = vst.msk [vmem:[#allocation2 + $0x9f8] sm:$0xff] %vm1346_vm3, %v7944_v15 }
  0x63   :  { %1682 = vst.msk [vmem:[#allocation2 + $0xa78] sm:$0xff] %vm1346_vm3, %v7944_v15 }
  0x64   :  { %1684 = vst.msk [vmem:[#allocation2 + $0xa88] sm:$0xff] %vm1346_vm3, %v7944_v15 }
  0x65   :  { %1686 = vst.msk [vmem:[#allocation2 + $0xa98] sm:$0xff] %vm1346_vm3, %v7944_v15 }
  0x66   :  { %1688 = vst.msk [vmem:[#allocation2 + $0xaa8] sm:$0xff] %vm1346_vm3, %v7944_v15 }
  0x67   :  { %1690 = vst.msk [vmem:[#allocation2 + $0xab8] sm:$0xff] %vm1346_vm3, %v7944_v15 }
  0x68   :  { %1692 = vst.msk [vmem:[#allocation2 + $0xac8] sm:$0xff] %vm1346_vm3, %v7944_v15 }
  0x69   :  { %1694 = vst.msk [vmem:[#allocation2 + $0xad8] sm:$0xff] %vm1346_vm3, %v7944_v15 }
  0x6a   :  { %1696 = vst.msk [vmem:[#allocation2 + $0xae8] sm:$0xff] %vm1346_vm3, %v7944_v15 }
  0x6b   :  { %1698 = vst.msk [vmem:[#allocation2 + $0xaf8] sm:$0xff] %vm1346_vm3, %v7944_v15 }
  0x6c   :  { %1714 = vst.msk [vmem:[#allocation2 + $0xb78] sm:$0xff] %vm1346_vm3, %v7944_v15 }
  0x6d   :  { %6703 = vmatmul.msk.bf16.gmra.mxu0 %vm497_vm2, %v7691_v14  ;;  %1716 = vst.msk [vmem:[#allocation2 + $0xb88] sm:$0xff] %vm1346_vm3, %v7944_v15 }
  0x6e   :  { %1718 = vst.msk [vmem:[#allocation2 + $0xb98] sm:$0xff] %vm1346_vm3, %v7944_v15 }
  0x6f   :  { %1720 = vst.msk [vmem:[#allocation2 + $0xba8] sm:$0xff] %vm1346_vm3, %v7944_v15 }
  0x70   :  { %1722 = vst.msk [vmem:[#allocation2 + $0xbb8] sm:$0xff] %vm1346_vm3, %v7944_v15 }
  0x71   :  { %1724 = vst.msk [vmem:[#allocation2 + $0xbc8] sm:$0xff] %vm1346_vm3, %v7944_v15 }
  0x72   :  { %1726 = vst.msk [vmem:[#allocation2 + $0xbd8] sm:$0xff] %vm1346_vm3, %v7944_v15 }
  0x73   :  { %1728 = vst.msk [vmem:[#allocation2 + $0xbe8] sm:$0xff] %vm1346_vm3, %v7944_v15 }
  0x74   :  { %1730 = vst.msk [vmem:[#allocation2 + $0xbf8] sm:$0xff] %vm1346_vm3, %v7944_v15 }
  0x75   :  { %1748 = vst.msk [vmem:[#allocation2 + $0xc88] sm:$0xff] %vm1346_vm3, %v7944_v15 }
  0x76   :  { %1750 = vst.msk [vmem:[#allocation2 + $0xc98] sm:$0xff] %vm1346_vm3, %v7944_v15 }
  0x77   :  { %1752 = vst.msk [vmem:[#allocation2 + $0xca8] sm:$0xff] %vm1346_vm3, %v7944_v15 }
  0x78   :  { %1754 = vst.msk [vmem:[#allocation2 + $0xcb8] sm:$0xff] %vm1346_vm3, %v7944_v15 }
  0x79   :  { %1756 = vst.msk [vmem:[#allocation2 + $0xcc8] sm:$0xff] %vm1346_vm3, %v7944_v15 }
  0x7a   :  { %1758 = vst.msk [vmem:[#allocation2 + $0xcd8] sm:$0xff] %vm1346_vm3, %v7944_v15 }
  0x7b   :  { %1760 = vst.msk [vmem:[#allocation2 + $0xce8] sm:$0xff] %vm1346_vm3, %v7944_v15 }
  0x7c   :  { %1762 = vst.msk [vmem:[#allocation2 + $0xcf8] sm:$0xff] %vm1346_vm3, %v7944_v15 }
  0x7d   :  { %6704 = vmatmul.msk.bf16.gmra.mxu0 %vm497_vm2, %v7692_v16  ;;  %1779 = vst.msk [vmem:[#allocation2 + $0xd80] sm:$0xff] %vm1346_vm3, %v7944_v15 }
  0x7e   :  { %1780 = vst.msk [vmem:[#allocation2 + $0xd88] sm:$0xff] %vm1346_vm3, %v7944_v15 }
  0x7f   :  { %1781 = vst.msk [vmem:[#allocation2 + $0xd90] sm:$0xff] %vm1346_vm3, %v7944_v15 }
  0x80   :  { %1782 = vst.msk [vmem:[#allocation2 + $0xd98] sm:$0xff] %vm1346_vm3, %v7944_v15 }
  0x81   :  { %1783 = vst.msk [vmem:[#allocation2 + $0xda0] sm:$0xff] %vm1346_vm3, %v7944_v15 }
  0x82   :  { %1784 = vst.msk [vmem:[#allocation2 + $0xda8] sm:$0xff] %vm1346_vm3, %v7944_v15 }
  0x83   :  { %1785 = vst.msk [vmem:[#allocation2 + $0xdb0] sm:$0xff] %vm1346_vm3, %v7944_v15 }
  0x84   :  { %1786 = vst.msk [vmem:[#allocation2 + $0xdb8] sm:$0xff] %vm1346_vm3, %v7944_v15 }
  0x85   :  { %1787 = vst.msk [vmem:[#allocation2 + $0xdc0] sm:$0xff] %vm1346_vm3, %v7944_v15 }
  0x86   :  { %1788 = vst.msk [vmem:[#allocation2 + $0xdc8] sm:$0xff] %vm1346_vm3, %v7944_v15 }
  0x87   :  { %1789 = vst.msk [vmem:[#allocation2 + $0xdd0] sm:$0xff] %vm1346_vm3, %v7944_v15 }
  0x88   :  { %1790 = vst.msk [vmem:[#allocation2 + $0xdd8] sm:$0xff] %vm1346_vm3, %v7944_v15 }
  0x89   :  { %1791 = vst.msk [vmem:[#allocation2 + $0xde0] sm:$0xff] %vm1346_vm3, %v7944_v15 }
  0x8a   :  { %v706_v19 = vpop.f32.mrf.mxu0  ;;  %1792 = vst.msk [vmem:[#allocation2 + $0xde8] sm:$0xff] %vm1346_vm3, %v7944_v15 }
  0x8b   :  { %v707_v20 = vadd.f32 %v7935_v17, %v706_v19  ;;  %1793 = vst.msk [vmem:[#allocation2 + $0xdf0] sm:$0xff] %vm1346_vm3, %v7944_v15 }
  0x8c   :  { %1794 = vst.msk [vmem:[#allocation2 + $0xdf8] sm:$0xff] %vm1346_vm3, %v7944_v15 }
  0x8d   :  { %1860 = vst.msk [vmem:[#allocation2 + $0x88] sm:$0xff] %vm1346_vm3, %v707_v20  ;;  %6705 = vmatmul.msk.bf16.gmra.mxu0 %vm497_vm2, %v7693_v18  ;;  %1026 = vxpose.xlu0.b32.start [1/16] (narrow) %v707_v20, 64  ;;  %v7706_v20 = vld [vmem:[%s11032_s0 + $0xa8] sm:$0xff] }
  0x8e   :  { %1810 = vst.msk [vmem:[#allocation2 + $0xe78] sm:$0xff] %vm1346_vm3, %v7944_v15 }
  0x8f   :  { %1812 = vst.msk [vmem:[#allocation2 + $0xe88] sm:$0xff] %vm1346_vm3, %v7944_v15 }
  0x90   :  { %1814 = vst.msk [vmem:[#allocation2 + $0xe98] sm:$0xff] %vm1346_vm3, %v7944_v15 }
  0x91   :  { %1816 = vst.msk [vmem:[#allocation2 + $0xea8] sm:$0xff] %vm1346_vm3, %v7944_v15 }
  0x92   :  { %v708_v21 = vpop.f32.mrf.mxu0  ;;  %1818 = vst.msk [vmem:[#allocation2 + $0xeb8] sm:$0xff] %vm1346_vm3, %v7944_v15 }
  0x93   :  { %v8060_v22 = vadd.f32 %v7935_v17, %v708_v21  ;;  %1820 = vst.msk [vmem:[#allocation2 + $0xec8] sm:$0xff] %vm1346_vm3, %v7944_v15 }
  0x94   :  { %1822 = vst.msk [vmem:[#allocation2 + $0xed8] sm:$0xff] %vm1346_vm3, %v7944_v15 }
  0x95   :  { %1027 = vxpose.xlu0.b32.cont [2/16] (narrow) %v8060_v22, 64  ;;  %1824 = vst.msk [vmem:[#allocation2 + $0xee8] sm:$0xff] %vm1346_vm3, %v7944_v15 }
  0x96   :  { %1826 = vst.msk [vmem:[#allocation2 + $0xef8] sm:$0xff] %vm1346_vm3, %v7944_v15 }
  0x97   :  { %1841 = vst.msk [vmem:[#allocation2 + $0xf70] sm:$0xff] %vm1346_vm3, %v7944_v15 }
  0x98   :  { %1842 = vst.msk [vmem:[#allocation2 + $0xf78] sm:$0xff] %vm1346_vm3, %v7944_v15 }
  0x99   :  { %1843 = vst.msk [vmem:[#allocation2 + $0xf80] sm:$0xff] %vm1346_vm3, %v7944_v15 }
  0x9a   :  { %1844 = vst.msk [vmem:[#allocation2 + $0xf88] sm:$0xff] %vm1346_vm3, %v7944_v15  ;;  %v711_v23 = vpop.f32.mrf.mxu0 }
  0x9b   :  { %1845 = vst.msk [vmem:[#allocation2 + $0xf90] sm:$0xff] %vm1346_vm3, %v7944_v15  ;;  %v712_v25 = vadd.f32 %v8446_v24, %v711_v23 }
  0x9c   :  { %1846 = vst.msk [vmem:[#allocation2 + $0xf98] sm:$0xff] %vm1346_vm3, %v7944_v15 }
  0x9d   :  { %1847 = vst.msk [vmem:[#allocation2 + $0xfa0] sm:$0xff] %vm1346_vm3, %v7944_v15  ;;  %6706 = vmatmul.msk.bf16.gmra.mxu0 %vm497_vm2, %v7694_v26  ;;  %1028 = vxpose.xlu0.b32.cont [3/16] (narrow) %v712_v25, 64  ;;  %v7707_v26 = vld [vmem:[%s11032_s0 + $0xb0] sm:$0xff] }
  0x9e   :  { %1848 = vst.msk [vmem:[#allocation2 + $0xfa8] sm:$0xff] %vm1346_vm3, %v7944_v15 }
  0x9f   :  { %1849 = vst.msk [vmem:[#allocation2 + $0xfb0] sm:$0xff] %vm1346_vm3, %v7944_v15 }
  0xa0   :  { %1850 = vst.msk [vmem:[#allocation2 + $0xfb8] sm:$0xff] %vm1346_vm3, %v7944_v15 }
  0xa1   :  { %1851 = vst.msk [vmem:[#allocation2 + $0xfc0] sm:$0xff] %vm1346_vm3, %v7944_v15 }
  0xa2   :  { %1852 = vst.msk [vmem:[#allocation2 + $0xfc8] sm:$0xff] %vm1346_vm3, %v7944_v15  ;;  %v713_v27 = vpop.f32.mrf.mxu0 }
  0xa3   :  { %1853 = vst.msk [vmem:[#allocation2 + $0xfd0] sm:$0xff] %vm1346_vm3, %v7944_v15  ;;  %v714_v28 = vadd.f32 %v8446_v24, %v713_v27 }
  0xa4   :  { %1854 = vst.msk [vmem:[#allocation2 + $0xfd8] sm:$0xff] %vm1346_vm3, %v7944_v15 }
  0xa5   :  { %1855 = vst.msk [vmem:[#allocation2 + $0xfe0] sm:$0xff] %vm1346_vm3, %v7944_v15  ;;  %1029 = vxpose.xlu0.b32.cont [4/16] (narrow) %v714_v28, 64 }
  0xa6   :  { %1856 = vst.msk [vmem:[#allocation2 + $0xfe8] sm:$0xff] %vm1346_vm3, %v7944_v15 }
  0xa7   :  { %1857 = vst.msk [vmem:[#allocation2 + $0xff0] sm:$0xff] %vm1346_vm3, %v7944_v15 }
  0xa8   :  { %1858 = vst.msk [vmem:[#allocation2 + $0xff8] sm:$0xff] %vm1346_vm3, %v7944_v15 }
  0xa9   :  { %2005 = vst.msk [vmem:[#allocation3 + $0x88] sm:$0xff] %vm1346_vm3, %v7944_v15 }
  0xaa   :  { %2007 = vst.msk [vmem:[#allocation3 + $0x98] sm:$0xff] %vm1346_vm3, %v7944_v15  ;;  %v716_v30 = vpop.f32.mrf.mxu0 }
  0xab   :  { %2009 = vst.msk [vmem:[#allocation3 + $0xa8] sm:$0xff] %vm1346_vm3, %v7944_v15  ;;  %v717_v31 = vadd.f32 %v8446_v24, %v716_v30 }
  0xac   :  { %2011 = vst.msk [vmem:[#allocation3 + $0xb8] sm:$0xff] %vm1346_vm3, %v7944_v15 }
  0xad   :  { %2013 = vst.msk [vmem:[#allocation3 + $0xc8] sm:$0xff] %vm1346_vm3, %v7944_v15  ;;  %6707 = vmatmul.msk.bf16.gmra.mxu0 %vm497_vm2, %v7695_v29  ;;  %1030 = vxpose.xlu0.b32.cont [5/16] (narrow) %v717_v31, 64 }
  0xae   :  { %2015 = vst.msk [vmem:[#allocation3 + $0xd8] sm:$0xff] %vm1346_vm3, %v7944_v15 }
  0xaf   :  { %2017 = vst.msk [vmem:[#allocation3 + $0xe8] sm:$0xff] %vm1346_vm3, %v7944_v15 }
  0xb0   :  { %2019 = vst.msk [vmem:[#allocation3 + $0xf8] sm:$0xff] %vm1346_vm3, %v7944_v15 }
  0xb1   :  { %2036 = vst.msk [vmem:[#allocation3 + $0x180] sm:$0xff] %vm1346_vm3, %v7944_v15 }
  0xb2   :  { %2037 = vst.msk [vmem:[#allocation3 + $0x188] sm:$0xff] %vm1346_vm3, %v7944_v15  ;;  %v718_v32 = vpop.f32.mrf.mxu0 }
  0xb3   :  { %2038 = vst.msk [vmem:[#allocation3 + $0x190] sm:$0xff] %vm1346_vm3, %v7944_v15  ;;  %v719_v33 = vadd.f32 %v8446_v24, %v718_v32 }
  0xb4   :  { %2039 = vst.msk [vmem:[#allocation3 + $0x198] sm:$0xff] %vm1346_vm3, %v7944_v15 }
  0xb5   :  { %2040 = vst.msk [vmem:[#allocation3 + $0x1a0] sm:$0xff] %vm1346_vm3, %v7944_v15  ;;  %1031 = vxpose.xlu0.b32.cont [6/16] (narrow) %v719_v33, 64 }
  0xb6   :  { %2041 = vst.msk [vmem:[#allocation3 + $0x1a8] sm:$0xff] %vm1346_vm3, %v7944_v15 }
  0xb7   :  { %2042 = vst.msk [vmem:[#allocation3 + $0x1b0] sm:$0xff] %vm1346_vm3, %v7944_v15 }
  0xb8   :  { %2043 = vst.msk [vmem:[#allocation3 + $0x1b8] sm:$0xff] %vm1346_vm3, %v7944_v15 }
  0xb9   :  { %2044 = vst.msk [vmem:[#allocation3 + $0x1c0] sm:$0xff] %vm1346_vm3, %v7944_v15 }
  0xba   :  { %2045 = vst.msk [vmem:[#allocation3 + $0x1c8] sm:$0xff] %vm1346_vm3, %v7944_v15  ;;  %v721_v35 = vpop.f32.mrf.mxu0 }
  0xbb   :  { %2046 = vst.msk [vmem:[#allocation3 + $0x1d0] sm:$0xff] %vm1346_vm3, %v7944_v15  ;;  %v722_v36 = vadd.f32 %v8446_v24, %v721_v35 }
  0xbc   :  { %2047 = vst.msk [vmem:[#allocation3 + $0x1d8] sm:$0xff] %vm1346_vm3, %v7944_v15 }
  0xbd   :  { %2048 = vst.msk [vmem:[#allocation3 + $0x1e0] sm:$0xff] %vm1346_vm3, %v7944_v15  ;;  %6708 = vmatmul.msk.bf16.gmra.mxu0 %vm497_vm2, %v7696_v34  ;;  %1032 = vxpose.xlu0.b32.cont [7/16] (narrow) %v722_v36, 64 }
  0xbe   :  { %2049 = vst.msk [vmem:[#allocation3 + $0x1e8] sm:$0xff] %vm1346_vm3, %v7944_v15 }
  0xbf   :  { %2050 = vst.msk [vmem:[#allocation3 + $0x1f0] sm:$0xff] %vm1346_vm3, %v7944_v15 }
  0xc0   :  { %2051 = vst.msk [vmem:[#allocation3 + $0x1f8] sm:$0xff] %vm1346_vm3, %v7944_v15 }
  0xc1   :  { %2067 = vst.msk [vmem:[#allocation3 + $0x278] sm:$0xff] %vm1346_vm3, %v7944_v15 }
  0xc2   :  { %2069 = vst.msk [vmem:[#allocation3 + $0x288] sm:$0xff] %vm1346_vm3, %v7944_v15  ;;  %v723_v37 = vpop.f32.mrf.mxu0 }
  0xc3   :  { %2071 = vst.msk [vmem:[#allocation3 + $0x298] sm:$0xff] %vm1346_vm3, %v7944_v15  ;;  %v724_v38 = vadd.f32 %v8446_v24, %v723_v37 }
  0xc4   :  { %2073 = vst.msk [vmem:[#allocation3 + $0x2a8] sm:$0xff] %vm1346_vm3, %v7944_v15 }
  0xc5   :  { %2075 = vst.msk [vmem:[#allocation3 + $0x2b8] sm:$0xff] %vm1346_vm3, %v7944_v15  ;;  %1033 = vxpose.xlu0.b32.cont [8/16] (narrow) %v724_v38, 64 }
  0xc6   :  { %2077 = vst.msk [vmem:[#allocation3 + $0x2c8] sm:$0xff] %vm1346_vm3, %v7944_v15 }
  0xc7   :  { %2079 = vst.msk [vmem:[#allocation3 + $0x2d8] sm:$0xff] %vm1346_vm3, %v7944_v15 }
  0xc8   :  { %2081 = vst.msk [vmem:[#allocation3 + $0x2e8] sm:$0xff] %vm1346_vm3, %v7944_v15 }
  0xc9   :  { %2083 = vst.msk [vmem:[#allocation3 + $0x2f8] sm:$0xff] %vm1346_vm3, %v7944_v15 }
  0xca   :  { %2098 = vst.msk [vmem:[#allocation3 + $0x370] sm:$0xff] %vm1346_vm3, %v7944_v15  ;;  %v726_v40 = vpop.f32.mrf.mxu0 }
  0xcb   :  { %2099 = vst.msk [vmem:[#allocation3 + $0x378] sm:$0xff] %vm1346_vm3, %v7944_v15  ;;  %v727_v41 = vadd.f32 %v8446_v24, %v726_v40 }
  0xcc   :  { %2100 = vst.msk [vmem:[#allocation3 + $0x380] sm:$0xff] %vm1346_vm3, %v7944_v15 }
  0xcd   :  { %2101 = vst.msk [vmem:[#allocation3 + $0x388] sm:$0xff] %vm1346_vm3, %v7944_v15  ;;  %6709 = vmatmul.msk.bf16.gmra.mxu0 %vm497_vm2, %v7697_v39  ;;  %1034 = vxpose.xlu0.b32.cont [9/16] (narrow) %v727_v41, 64 }
  0xce   :  { %2102 = vst.msk [vmem:[#allocation3 + $0x390] sm:$0xff] %vm1346_vm3, %v7944_v15 }
  0xcf   :  { %2103 = vst.msk [vmem:[#allocation3 + $0x398] sm:$0xff] %vm1346_vm3, %v7944_v15 }
  0xd0   :  { %2104 = vst.msk [vmem:[#allocation3 + $0x3a0] sm:$0xff] %vm1346_vm3, %v7944_v15 }
  0xd1   :  { %2105 = vst.msk [vmem:[#allocation3 + $0x3a8] sm:$0xff] %vm1346_vm3, %v7944_v15 }
  0xd2   :  { %2106 = vst.msk [vmem:[#allocation3 + $0x3b0] sm:$0xff] %vm1346_vm3, %v7944_v15  ;;  %v728_v42 = vpop.f32.mrf.mxu0 }
  0xd3   :  { %2107 = vst.msk [vmem:[#allocation3 + $0x3b8] sm:$0xff] %vm1346_vm3, %v7944_v15  ;;  %v729_v43 = vadd.f32 %v8446_v24, %v728_v42 }
  0xd4   :  { %2108 = vst.msk [vmem:[#allocation3 + $0x3c0] sm:$0xff] %vm1346_vm3, %v7944_v15 }
  0xd5   :  { %2109 = vst.msk [vmem:[#allocation3 + $0x3c8] sm:$0xff] %vm1346_vm3, %v7944_v15  ;;  %1035 = vxpose.xlu0.b32.cont [10/16] (narrow) %v729_v43, 64 }
  0xd6   :  { %2110 = vst.msk [vmem:[#allocation3 + $0x3d0] sm:$0xff] %vm1346_vm3, %v7944_v15 }
  0xd7   :  { %2111 = vst.msk [vmem:[#allocation3 + $0x3d8] sm:$0xff] %vm1346_vm3, %v7944_v15 }
  0xd8   :  { %2112 = vst.msk [vmem:[#allocation3 + $0x3e0] sm:$0xff] %vm1346_vm3, %v7944_v15 }
  0xd9   :  { %2113 = vst.msk [vmem:[#allocation3 + $0x3e8] sm:$0xff] %vm1346_vm3, %v7944_v15 }
  0xda   :  { %2114 = vst.msk [vmem:[#allocation3 + $0x3f0] sm:$0xff] %vm1346_vm3, %v7944_v15  ;;  %v731_v45 = vpop.f32.mrf.mxu0 }
  0xdb   :  { %2115 = vst.msk [vmem:[#allocation3 + $0x3f8] sm:$0xff] %vm1346_vm3, %v7944_v15  ;;  %v732_v46 = vadd.f32 %v8446_v24, %v731_v45  ;;  %v7705_v15 = vld [vmem:[%s11032_s0 + $0xa0] sm:$0xff] }
  0xdc   :  { %1861 = vst.msk [vmem:[#allocation2 + $0x98] sm:$0xff] %vm1346_vm3, %v8060_v22 }
  0xdd   :  { %1862 = vst.msk [vmem:[#allocation2 + $0xa8] sm:$0xff] %vm1346_vm3, %v712_v25  ;;  %6710 = vmatmul.msk.bf16.gmra.mxu0 %vm497_vm2, %v7698_v44  ;;  %1036 = vxpose.xlu0.b32.cont [11/16] (narrow) %v732_v46, 64 }
  0xde   :  { %1863 = vst.msk [vmem:[#allocation2 + $0xb8] sm:$0xff] %vm1346_vm3, %v714_v28 }
  0xdf   :  { %1864 = vst.msk [vmem:[#allocation2 + $0xc8] sm:$0xff] %vm1346_vm3, %v717_v31  ;;  %v7708_v31 = vld [vmem:[%s11032_s0 + $0xb8] sm:$0xff] }
  0xe0   :  { %1865 = vst.msk [vmem:[#allocation2 + $0xd8] sm:$0xff] %vm1346_vm3, %v719_v33 }
  0xe1   :  { %1866 = vst.msk [vmem:[#allocation2 + $0xe8] sm:$0xff] %vm1346_vm3, %v722_v36  ;;  %v7709_v36 = vld [vmem:[%s11032_s0 + $0xc0] sm:$0xff] }
  0xe2   :  { %1867 = vst.msk [vmem:[#allocation2 + $0xf8] sm:$0xff] %vm1346_vm3, %v724_v38  ;;  %v733_v47 = vpop.f32.mrf.mxu0 }
  0xe3   :  { %1868 = vst.msk [vmem:[#allocation2 + $0x188] sm:$0xff] %vm1346_vm3, %v727_v41  ;;  %v734_v48 = vadd.f32 %v8446_v24, %v733_v47  ;;  %v7710_v41 = vld [vmem:[%s11032_s0 + $0xc8] sm:$0xff] }
  0xe4   :  { %1869 = vst.msk [vmem:[#allocation2 + $0x198] sm:$0xff] %vm1346_vm3, %v729_v43 }
  0xe5   :  { %1870 = vst.msk [vmem:[#allocation2 + $0x1a8] sm:$0xff] %vm1346_vm3, %v732_v46  ;;  %1037 = vxpose.xlu0.b32.cont [12/16] (narrow) %v734_v48, 64  ;;  %v7711_v46 = vld [vmem:[%s11032_s0 + $0xd0] sm:$0xff] }
  0xe6   :  { %1871 = vst.msk [vmem:[#allocation2 + $0x1b8] sm:$0xff] %vm1346_vm3, %v734_v48 }
  0xea   :  { %v736_v50 = vpop.f32.mrf.mxu0 }
  0xeb   :  { %v737_v51 = vadd.f32 %v8446_v24, %v736_v50 }
  0xed   :  { %1872 = vst.msk [vmem:[#allocation2 + $0x1c8] sm:$0xff] %vm1346_vm3, %v737_v51  ;;  %6711 = vmatmul.msk.bf16.gmra.mxu0 %vm497_vm2, %v7699_v49  ;;  %1038 = vxpose.xlu0.b32.cont [13/16] (narrow) %v737_v51, 64  ;;  %v7712_v51 = vld [vmem:[%s11032_s0 + $0xd8] sm:$0xff] }
  0xf2   :  { %v738_v52 = vpop.f32.mrf.mxu0 }
  0xf3   :  { %v739_v53 = vadd.f32 %v8446_v24, %v738_v52 }
  0xf5   :  { %1873 = vst.msk [vmem:[#allocation2 + $0x1d8] sm:$0xff] %vm1346_vm3, %v739_v53  ;;  %1039 = vxpose.xlu0.b32.cont [14/16] (narrow) %v739_v53, 64 }
  0xfa   :  { %v741_v55 = vpop.f32.mrf.mxu0 }
  0xfb   :  { %v742_v56 = vadd.f32 %v8446_v24, %v741_v55 }
  0xfd   :  { %1874 = vst.msk [vmem:[#allocation2 + $0x1e8] sm:$0xff] %vm1346_vm3, %v742_v56  ;;  %6712 = vmatmul.msk.bf16.gmra.mxu0 %vm497_vm2, %v7700_v54  ;;  %1040 = vxpose.xlu0.b32.cont [15/16] (narrow) %v742_v56, 64  ;;  %v7713_v56 = vld [vmem:[%s11032_s0 + $0xe0] sm:$0xff] }
 0x102   :  { %v743_v57 = vpop.f32.mrf.mxu0 }
 0x103   :  { %v744_v58 = vadd.f32 %v8446_v24, %v743_v57 }
 0x105   :  { %1875 = vst.msk [vmem:[#allocation2 + $0x1f8] sm:$0xff] %vm1346_vm3, %v744_v58  ;;  %1041 = vxpose.xlu0.b32.end [16/16] (narrow) %v744_v58, 64 }
 0x10a   :  { %v746_v60 = vpop.f32.mrf.mxu0 }
 0x10b   :  { %v747_v61 = vadd.f32 %v8446_v24, %v746_v60 }
 0x10d   :  { %1876 = vst.msk [vmem:[#allocation2 + $0x288] sm:$0xff] %vm1346_vm3, %v747_v61  ;;  %6713 = vmatmul.msk.bf16.gmra.mxu0 %vm497_vm2, %v7701_v59  ;;  %1058 = vxpose.xlu1.b32.start [1/16] (narrow) %v747_v61, 64  ;;  %v7714_v61 = vld [vmem:[%s11032_s0 + $0xe8] sm:$0xff] }
 0x112   :  { %v748_v62 = vpop.f32.mrf.mxu0 }
 0x113   :  { %v749_v63 = vadd.f32 %v8446_v24, %v748_v62 }
 0x115   :  { %1877 = vst.msk [vmem:[#allocation2 + $0x298] sm:$0xff] %vm1346_vm3, %v749_v63  ;;  %1059 = vxpose.xlu1.b32.cont [2/16] (narrow) %v749_v63, 64 }
 0x11a   :  { %v751_v1 = vpop.f32.mrf.mxu0 }
 0x11b   :  { %v752_v2 = vadd.f32 %v8446_v24, %v751_v1 }
 0x11d   :  { %1878 = vst.msk [vmem:[#allocation2 + $0x2a8] sm:$0xff] %vm1346_vm3, %v752_v2  ;;  %6714 = vmatmul.msk.bf16.gmra.mxu0 %vm497_vm2, %v7702_v0  ;;  %1060 = vxpose.xlu1.b32.cont [3/16] (narrow) %v752_v2, 64  ;;  %v7715_v2 = vld [vmem:[%s11032_s0 + $0xf0] sm:$0xff] }
 0x122   :  { %v753_v3 = vpop.f32.mrf.mxu0 }
 0x123   :  { %v754_v4 = vadd.f32 %v8446_v24, %v753_v3 }
 0x125   :  { %1879 = vst.msk [vmem:[#allocation2 + $0x2b8] sm:$0xff] %vm1346_vm3, %v754_v4  ;;  %1061 = vxpose.xlu1.b32.cont [4/16] (narrow) %v754_v4, 64 }
 0x12a   :  { %v756_v6 = vpop.f32.mrf.mxu0 }
 0x12b   :  { %v757_v7 = vadd.f32 %v8446_v24, %v756_v6 }
 0x12d   :  { %1880 = vst.msk [vmem:[#allocation2 + $0x2c8] sm:$0xff] %vm1346_vm3, %v757_v7  ;;  %6715 = vmatmul.msk.bf16.gmra.mxu0 %vm497_vm2, %v7703_v5  ;;  %1062 = vxpose.xlu1.b32.cont [5/16] (narrow) %v757_v7, 64  ;;  %v7716_v7 = vld [vmem:[%s11032_s0 + $0xf8] sm:$0xff] }
 0x132   :  { %v758_v8 = vpop.f32.mrf.mxu0 }
 0x133   :  { %v759_v9 = vadd.f32 %v8446_v24, %v758_v8 }
 0x135   :  { %1881 = vst.msk [vmem:[#allocation2 + $0x2d8] sm:$0xff] %vm1346_vm3, %v759_v9  ;;  %1063 = vxpose.xlu1.b32.cont [6/16] (narrow) %v759_v9, 64 }
 0x13a   :  { %v761_v11 = vpop.f32.mrf.mxu0 }
 0x13b   :  { %v762_v12 = vadd.f32 %v8446_v24, %v761_v11 }
 0x13d   :  { %1882 = vst.msk [vmem:[#allocation2 + $0x2e8] sm:$0xff] %vm1346_vm3, %v762_v12  ;;  %6716 = vmatmul.msk.bf16.gmra.mxu0 %vm497_vm2, %v7704_v10  ;;  %1064 = vxpose.xlu1.b32.cont [7/16] (narrow) %v762_v12, 64  ;;  %v7717_v12 = vld [vmem:[%s11032_s0 + $0x100] sm:$0xff] }
 0x142   :  { %v763_v13 = vpop.f32.mrf.mxu0 }
 0x143   :  { %v764_v14 = vadd.f32 %v8446_v24, %v763_v13 }
 0x145   :  { %1883 = vst.msk [vmem:[#allocation2 + $0x2f8] sm:$0xff] %vm1346_vm3, %v764_v14  ;;  %1065 = vxpose.xlu1.b32.cont [8/16] (narrow) %v764_v14, 64 }
 0x14a   :  { %v766_v16 = vpop.f32.mrf.mxu0 }
 0x14b   :  { %v767_v17 = vadd.f32 %v8446_v24, %v766_v16 }
 0x14d   :  { %1884 = vst.msk [vmem:[#allocation2 + $0x388] sm:$0xff] %vm1346_vm3, %v767_v17  ;;  %6717 = vmatmul.msk.bf16.gmra.mxu0 %vm497_vm2, %v7705_v15  ;;  %1066 = vxpose.xlu1.b32.cont [9/16] (narrow) %v767_v17, 64  ;;  %v7718_v17 = vld [vmem:[%s11032_s0 + $0x108] sm:$0xff] }
 0x152   :  { %v768_v18 = vpop.f32.mrf.mxu0 }
 0x153   :  { %v769_v19 = vadd.f32 %v8446_v24, %v768_v18 }
 0x155   :  { %1885 = vst.msk [vmem:[#allocation2 + $0x398] sm:$0xff] %vm1346_vm3, %v769_v19  ;;  %1067 = vxpose.xlu1.b32.cont [10/16] (narrow) %v769_v19, 64 }
 0x15a   :  { %v771_v21 = vpop.f32.mrf.mxu0 }
 0x15b   :  { %v772_v22 = vadd.f32 %v8446_v24, %v771_v21 }
 0x15d   :  { %1886 = vst.msk [vmem:[#allocation2 + $0x3a8] sm:$0xff] %vm1346_vm3, %v772_v22  ;;  %6718 = vmatmul.msk.bf16.gmra.mxu0 %vm497_vm2, %v7706_v20  ;;  %1068 = vxpose.xlu1.b32.cont [11/16] (narrow) %v772_v22, 64  ;;  %v7719_v22 = vld [vmem:[%s11032_s0 + $0x110] sm:$0xff] }
 0x162   :  { %v773_v23 = vpop.f32.mrf.mxu0 }
 0x163   :  { %v774_v25 = vadd.f32 %v8446_v24, %v773_v23 }
 0x165   :  { %1887 = vst.msk [vmem:[#allocation2 + $0x3b8] sm:$0xff] %vm1346_vm3, %v774_v25  ;;  %1069 = vxpose.xlu1.b32.cont [12/16] (narrow) %v774_v25, 64 }
 0x16a   :  { %v776_v27 = vpop.f32.mrf.mxu0 }
 0x16b   :  { %v777_v28 = vadd.f32 %v8446_v24, %v776_v27 }
 0x16d   :  { %1888 = vst.msk [vmem:[#allocation2 + $0x3c8] sm:$0xff] %vm1346_vm3, %v777_v28  ;;  %6719 = vmatmul.msk.bf16.gmra.mxu0 %vm497_vm2, %v7707_v26  ;;  %1070 = vxpose.xlu1.b32.cont [13/16] (narrow) %v777_v28, 64  ;;  %v7720_v28 = vld [vmem:[%s11032_s0 + $0x118] sm:$0xff] }
 0x172   :  { %v778_v29 = vpop.f32.mrf.mxu0 }
 0x173   :  { %v779_v30 = vadd.f32 %v8446_v24, %v778_v29 }
 0x175   :  { %1889 = vst.msk [vmem:[#allocation2 + $0x3d8] sm:$0xff] %vm1346_vm3, %v779_v30  ;;  %1071 = vxpose.xlu1.b32.cont [14/16] (narrow) %v779_v30, 64 }
 0x17a   :  { %v781_v32 = vpop.f32.mrf.mxu0 }
 0x17b   :  { %v782_v33 = vadd.f32 %v8446_v24, %v781_v32 }
 0x17d   :  { %1890 = vst.msk [vmem:[#allocation2 + $0x3e8] sm:$0xff] %vm1346_vm3, %v782_v33  ;;  %6720 = vmatmul.msk.bf16.gmra.mxu0 %vm497_vm2, %v7708_v31  ;;  %1072 = vxpose.xlu1.b32.cont [15/16] (narrow) %v782_v33, 64  ;;  %v7721_v33 = vld [vmem:[%s11032_s0 + $0x120] sm:$0xff] }
 0x182   :  { %v783_v34 = vpop.f32.mrf.mxu0 }
 0x183   :  { %v784_v35 = vadd.f32 %v8446_v24, %v783_v34 }
 0x185   :  { %1891 = vst.msk [vmem:[#allocation2 + $0x3f8] sm:$0xff] %vm1346_vm3, %v784_v35  ;;  %1073 = vxpose.xlu1.b32.end [16/16] (narrow) %v784_v35, 64 }
 0x18a   :  { %v786_v37 = vpop.f32.mrf.mxu0 }
 0x18b   :  { %v787_v38 = vadd.f32 %v8446_v24, %v786_v37 }
 0x18d   :  { %1892 = vst.msk [vmem:[#allocation2 + $0x488] sm:$0xff] %vm1346_vm3, %v787_v38  ;;  %6721 = vmatmul.msk.bf16.gmra.mxu0 %vm497_vm2, %v7709_v36  ;;  %1090 = vxpose.xlu2.b32.start [1/16] (narrow) %v787_v38, 64  ;;  %v7722_v38 = vld [vmem:[%s11032_s0 + $0x128] sm:$0xff] }
 0x192   :  { %v788_v39 = vpop.f32.mrf.mxu0 }
 0x193   :  { %v789_v40 = vadd.f32 %v8446_v24, %v788_v39 }
 0x195   :  { %1893 = vst.msk [vmem:[#allocation2 + $0x498] sm:$0xff] %vm1346_vm3, %v789_v40  ;;  %1091 = vxpose.xlu2.b32.cont [2/16] (narrow) %v789_v40, 64 }
 0x19a   :  { %v791_v42 = vpop.f32.mrf.mxu0 }
 0x19b   :  { %v792_v43 = vadd.f32 %v8446_v24, %v791_v42 }
 0x19d   :  { %1894 = vst.msk [vmem:[#allocation2 + $0x4a8] sm:$0xff] %vm1346_vm3, %v792_v43  ;;  %6722 = vmatmul.msk.bf16.gmra.mxu0 %vm497_vm2, %v7710_v41  ;;  %1092 = vxpose.xlu2.b32.cont [3/16] (narrow) %v792_v43, 64  ;;  %v7723_v43 = vld [vmem:[%s11032_s0 + $0x130] sm:$0xff] }
 0x1a2   :  { %v793_v44 = vpop.f32.mrf.mxu0 }
 0x1a3   :  { %v794_v45 = vadd.f32 %v8446_v24, %v793_v44 }
 0x1a5   :  { %1895 = vst.msk [vmem:[#allocation2 + $0x4b8] sm:$0xff] %vm1346_vm3, %v794_v45  ;;  %1093 = vxpose.xlu2.b32.cont [4/16] (narrow) %v794_v45, 64 }
 0x1aa   :  { %v796_v47 = vpop.f32.mrf.mxu0 }
 0x1ab   :  { %v797_v48 = vadd.f32 %v8446_v24, %v796_v47 }
 0x1ad   :  { %1896 = vst.msk [vmem:[#allocation2 + $0x4c8] sm:$0xff] %vm1346_vm3, %v797_v48  ;;  %6723 = vmatmul.msk.bf16.gmra.mxu0 %vm497_vm2, %v7711_v46  ;;  %1094 = vxpose.xlu2.b32.cont [5/16] (narrow) %v797_v48, 64  ;;  %v7724_v48 = vld [vmem:[%s11032_s0 + $0x138] sm:$0xff] }
 0x1b2   :  { %v798_v49 = vpop.f32.mrf.mxu0 }
 0x1b3   :  { %v799_v50 = vadd.f32 %v8446_v24, %v798_v49 }
 0x1b5   :  { %1897 = vst.msk [vmem:[#allocation2 + $0x4d8] sm:$0xff] %vm1346_vm3, %v799_v50  ;;  %1095 = vxpose.xlu2.b32.cont [6/16] (narrow) %v799_v50, 64 }
 0x1ba   :  { %v801_v52 = vpop.f32.mrf.mxu0 }
 0x1bb   :  { %v802_v53 = vadd.f32 %v8446_v24, %v801_v52 }
 0x1bd   :  { %1898 = vst.msk [vmem:[#allocation2 + $0x4e8] sm:$0xff] %vm1346_vm3, %v802_v53  ;;  %6724 = vmatmul.msk.bf16.gmra.mxu0 %vm497_vm2, %v7712_v51  ;;  %1096 = vxpose.xlu2.b32.cont [7/16] (narrow) %v802_v53, 64  ;;  %v7725_v53 = vld [vmem:[%s11032_s0 + $0x140] sm:$0xff] }
 0x1c2   :  { %v803_v54 = vpop.f32.mrf.mxu0 }
 0x1c3   :  { %v804_v55 = vadd.f32 %v8446_v24, %v803_v54 }
 0x1c5   :  { %1899 = vst.msk [vmem:[#allocation2 + $0x4f8] sm:$0xff] %vm1346_vm3, %v804_v55  ;;  %1097 = vxpose.xlu2.b32.cont [8/16] (narrow) %v804_v55, 64 }
 0x1ca   :  { %v806_v57 = vpop.f32.mrf.mxu0 }
 0x1cb   :  { %v807_v58 = vadd.f32 %v8446_v24, %v806_v57 }
 0x1cd   :  { %1900 = vst.msk [vmem:[#allocation2 + $0x588] sm:$0xff] %vm1346_vm3, %v807_v58  ;;  %6725 = vmatmul.msk.bf16.gmra.mxu0 %vm497_vm2, %v7713_v56  ;;  %1098 = vxpose.xlu2.b32.cont [9/16] (narrow) %v807_v58, 64  ;;  %v7726_v58 = vld [vmem:[%s11032_s0 + $0x148] sm:$0xff] }
 0x1d2   :  { %v808_v59 = vpop.f32.mrf.mxu0 }
 0x1d3   :  { %v809_v60 = vadd.f32 %v8446_v24, %v808_v59 }
 0x1d5   :  { %1901 = vst.msk [vmem:[#allocation2 + $0x598] sm:$0xff] %vm1346_vm3, %v809_v60  ;;  %1099 = vxpose.xlu2.b32.cont [10/16] (narrow) %v809_v60, 64 }
 0x1da   :  { %v811_v62 = vpop.f32.mrf.mxu0 }
 0x1db   :  { %v812_v63 = vadd.f32 %v8446_v24, %v811_v62 }
 0x1dd   :  { %1902 = vst.msk [vmem:[#allocation2 + $0x5a8] sm:$0xff] %vm1346_vm3, %v812_v63  ;;  %6726 = vmatmul.msk.bf16.gmra.mxu0 %vm497_vm2, %v7714_v61  ;;  %1100 = vxpose.xlu2.b32.cont [11/16] (narrow) %v812_v63, 64  ;;  %v7727_v63 = vld [vmem:[%s11032_s0 + $0x150] sm:$0xff] }
 0x1e2   :  { %v813_v0 = vpop.f32.mrf.mxu0 }
 0x1e3   :  { %v814_v1 = vadd.f32 %v8446_v24, %v813_v0 }
 0x1e5   :  { %1903 = vst.msk [vmem:[#allocation2 + $0x5b8] sm:$0xff] %vm1346_vm3, %v814_v1  ;;  %1101 = vxpose.xlu2.b32.cont [12/16] (narrow) %v814_v1, 64 }
 0x1ea   :  { %v816_v3 = vpop.f32.mrf.mxu0 }
 0x1eb   :  { %v817_v4 = vadd.f32 %v8446_v24, %v816_v3 }
 0x1ed   :  { %1904 = vst.msk [vmem:[#allocation2 + $0x5c8] sm:$0xff] %vm1346_vm3, %v817_v4  ;;  %6727 = vmatmul.msk.bf16.gmra.mxu0 %vm497_vm2, %v7715_v2  ;;  %1102 = vxpose.xlu2.b32.cont [13/16] (narrow) %v817_v4, 64  ;;  %v7728_v4 = vld [vmem:[%s11032_s0 + $0x158] sm:$0xff] }
 0x1f2   :  { %v818_v5 = vpop.f32.mrf.mxu0 }
 0x1f3   :  { %v819_v6 = vadd.f32 %v8446_v24, %v818_v5 }
 0x1f5   :  { %1905 = vst.msk [vmem:[#allocation2 + $0x5d8] sm:$0xff] %vm1346_vm3, %v819_v6  ;;  %1103 = vxpose.xlu2.b32.cont [14/16] (narrow) %v819_v6, 64 }
 0x1fa   :  { %v821_v8 = vpop.f32.mrf.mxu0 }
 0x1fb   :  { %v822_v9 = vadd.f32 %v8446_v24, %v821_v8 }
 0x1fd   :  { %1906 = vst.msk [vmem:[#allocation2 + $0x5e8] sm:$0xff] %vm1346_vm3, %v822_v9  ;;  %6728 = vmatmul.msk.bf16.gmra.mxu0 %vm497_vm2, %v7716_v7  ;;  %1104 = vxpose.xlu2.b32.cont [15/16] (narrow) %v822_v9, 64  ;;  %v7729_v9 = vld [vmem:[%s11032_s0 + $0x160] sm:$0xff] }
 0x202   :  { %v823_v10 = vpop.f32.mrf.mxu0 }
 0x203   :  { %v824_v11 = vadd.f32 %v8446_v24, %v823_v10 }
 0x205   :  { %1907 = vst.msk [vmem:[#allocation2 + $0x5f8] sm:$0xff] %vm1346_vm3, %v824_v11  ;;  %1105 = vxpose.xlu2.b32.end [16/16] (narrow) %v824_v11, 64 }
 0x20a   :  { %v826_v13 = vpop.f32.mrf.mxu0 }
 0x20b   :  { %v827_v14 = vadd.f32 %v8446_v24, %v826_v13 }
 0x20d   :  { %1908 = vst.msk [vmem:[#allocation2 + $0x688] sm:$0xff] %vm1346_vm3, %v827_v14  ;;  %6729 = vmatmul.msk.bf16.gmra.mxu0 %vm497_vm2, %v7717_v12  ;;  %1122 = vxpose.xlu0.b32.start [1/16] (narrow) %v827_v14, 64  ;;  %v7747_v14 = vld [vmem:[%s11032_s0 + $0x1f0] sm:$0xff] }
 0x20e   :  { %6759 = vmatmul.msk.bf16.vlgmr.msra.gmra.mxu1 %vm497_vm2, %v7747_v14  ;;  %v2383_v14 = vld [vmem:[#allocation2 + $0x587] sm:$0xff] }
 0x212   :  { %v828_v15 = vpop.f32.mrf.mxu0 }
 0x213   :  { %v829_v16 = vadd.f32 %v8446_v24, %v828_v15  ;;  %v7730_v15 = vld [vmem:[%s11032_s0 + $0x168] sm:$0xff] }
 0x215   :  { %1909 = vst.msk [vmem:[#allocation2 + $0x698] sm:$0xff] %vm1346_vm3, %v829_v16  ;;  %1123 = vxpose.xlu0.b32.cont [2/16] (narrow) %v829_v16, 64 }
 0x21a   :  { %v831_v18 = vpop.f32.mrf.mxu0 }
 0x21b   :  { %v832_v19 = vadd.f32 %v8446_v24, %v831_v18 }
 0x21d   :  { %1910 = vst.msk [vmem:[#allocation2 + $0x6a8] sm:$0xff] %vm1346_vm3, %v832_v19  ;;  %6730 = vmatmul.msk.bf16.gmra.mxu0 %vm497_vm2, %v7718_v17  ;;  %1124 = vxpose.xlu0.b32.cont [3/16] (narrow) %v832_v19, 64 }
 0x222   :  { %v833_v20 = vpop.f32.mrf.mxu0 }
 0x223   :  { %v834_v21 = vadd.f32 %v8446_v24, %v833_v20  ;;  %v7748_v20 = vld [vmem:[%s11032_s0 + $0x1f8] sm:$0xff] }
 0x224   :  { %6760 = vmatmul.msk.bf16.gmra.mxu1 %vm497_vm2, %v7748_v20  ;;  %v8886_v20 = vld [vmem:[%s11031_s2] ss:$0 sm:$0xff] }
 0x225   :  { %1911 = vst.msk [vmem:[#allocation2 + $0x6b8] sm:$0xff] %vm1346_vm3, %v834_v21  ;;  %1125 = vxpose.xlu0.b32.cont [4/16] (narrow) %v834_v21, 64  ;;  %v7758_v21 = vld [vmem:[%s11033_s3 + $0x38] sm:$0xff] }
 0x226   :  { %2198 = vmatpush.bf16.msrb.mxu1 %v7758_v21 }
 0x22a   :  { %v836_v23 = vpop.f32.mrf.mxu0 }
 0x22b   :  { %v837_v25 = vadd.f32 %v8446_v24, %v836_v23 }
 0x22d   :  { %1912 = vst.msk [vmem:[#allocation2 + $0x6c8] sm:$0xff] %vm1346_vm3, %v837_v25  ;;  %6731 = vmatmul.msk.bf16.gmra.mxu0 %vm497_vm2, %v7719_v22  ;;  %1126 = vxpose.xlu0.b32.cont [5/16] (narrow) %v837_v25, 64  ;;  %v7731_v22 = vld [vmem:[%s11032_s0 + $0x170] sm:$0xff] }
 0x232   :  { %v838_v26 = vpop.f32.mrf.mxu0 }
 0x233   :  { %v839_v27 = vadd.f32 %v8446_v24, %v838_v26  ;;  %v7757_v26 = vld [vmem:[%s11033_s3 + $0x30] sm:$0xff] }
 0x234   :  { %2199 = vmatpush.bf16.msrb.mxu1 %v7757_v26 }
 0x235   :  { %1913 = vst.msk [vmem:[#allocation2 + $0x6d8] sm:$0xff] %vm1346_vm3, %v839_v27  ;;  %1127 = vxpose.xlu0.b32.cont [6/16] (narrow) %v839_v27, 64  ;;  %v7756_v27 = vld [vmem:[%s11033_s3 + $0x28] sm:$0xff] }
 0x238   :  { %2200 = vmatpush.bf16.msrb.mxu1 %v7756_v27  ;;  %v2385_v27 = vld [vmem:[#allocation2 + $0x5a7] sm:$0xff] }
 0x23a   :  { %v841_v29 = vpop.f32.mrf.mxu0 }
 0x23b   :  { %v842_v30 = vadd.f32 %v8446_v24, %v841_v29 }
 0x23d   :  { %1914 = vst.msk [vmem:[#allocation2 + $0x6e8] sm:$0xff] %vm1346_vm3, %v842_v30  ;;  %6732 = vmatmul.msk.bf16.gmra.mxu0 %vm497_vm2, %v7720_v28  ;;  %1128 = vxpose.xlu0.b32.cont [7/16] (narrow) %v842_v30, 64  ;;  %v7755_v30 = vld [vmem:[%s11033_s3 + $0x20] sm:$0xff] }
 0x23e   :  { %2201 = vmatpush.bf16.msrb.mxu1 %v7755_v30 }
 0x242   :  { %v843_v31 = vpop.f32.mrf.mxu0 }
 0x243   :  { %v844_v32 = vadd.f32 %v8446_v24, %v843_v31  ;;  %v7732_v31 = vld [vmem:[%s11032_s0 + $0x178] sm:$0xff] }
 0x245   :  { %1915 = vst.msk [vmem:[#allocation2 + $0x6f8] sm:$0xff] %vm1346_vm3, %v844_v32  ;;  %1129 = vxpose.xlu0.b32.cont [8/16] (narrow) %v844_v32, 64 }
 0x24a   :  { %v846_v34 = vpop.f32.mrf.mxu0 }
 0x24b   :  { %v847_v35 = vadd.f32 %v8446_v24, %v846_v34 }
 0x24d   :  { %1916 = vst.msk [vmem:[#allocation2 + $0x788] sm:$0xff] %vm1346_vm3, %v847_v35  ;;  %6733 = vmatmul.msk.bf16.gmra.mxu0 %vm497_vm2, %v7721_v33  ;;  %1130 = vxpose.xlu0.b32.cont [9/16] (narrow) %v847_v35, 64 }
 0x252   :  { %v848_v36 = vpop.f32.mrf.mxu0 }
 0x253   :  { %v849_v37 = vadd.f32 %v8446_v24, %v848_v36  ;;  %v7733_v36 = vld [vmem:[%s11032_s0 + $0x180] sm:$0xff] }
 0x255   :  { %1917 = vst.msk [vmem:[#allocation2 + $0x798] sm:$0xff] %vm1346_vm3, %v849_v37  ;;  %1131 = vxpose.xlu0.b32.cont [10/16] (narrow) %v849_v37, 64 }
 0x25a   :  { %v851_v39 = vpop.f32.mrf.mxu0 }
 0x25b   :  { %v852_v40 = vadd.f32 %v8446_v24, %v851_v39 }
 0x25d   :  { %1918 = vst.msk [vmem:[#allocation2 + $0x7a8] sm:$0xff] %vm1346_vm3, %v852_v40  ;;  %6734 = vmatmul.msk.bf16.gmra.mxu0 %vm497_vm2, %v7722_v38  ;;  %1132 = vxpose.xlu0.b32.cont [11/16] (narrow) %v852_v40, 64  ;;  %v2138_v40 = vld [vmem:[#allocation2 + $0xa78] sm:$0xff] }
 0x262   :  { %v853_v41 = vpop.f32.mrf.mxu0 }
 0x263   :  { %v854_v42 = vadd.f32 %v8446_v24, %v853_v41 }
 0x265   :  { %1919 = vst.msk [vmem:[#allocation2 + $0x7b8] sm:$0xff] %vm1346_vm3, %v854_v42  ;;  %1133 = vxpose.xlu0.b32.cont [12/16] (narrow) %v854_v42, 64 }
 0x26a   :  { %v856_v44 = vpop.f32.mrf.mxu0 }
 0x26b   :  { %v857_v45 = vadd.f32 %v8446_v24, %v856_v44  ;;  %v7734_v44 = vld [vmem:[%s11032_s0 + $0x188] sm:$0xff] }
 0x26d   :  { %1920 = vst.msk [vmem:[#allocation2 + $0x7c8] sm:$0xff] %vm1346_vm3, %v857_v45  ;;  %6735 = vmatmul.msk.bf16.gmra.mxu0 %vm497_vm2, %v7723_v43  ;;  %1134 = vxpose.xlu0.b32.cont [13/16] (narrow) %v857_v45, 64 }
 0x272   :  { %v858_v46 = vpop.f32.mrf.mxu0 }
 0x273   :  { %v859_v47 = vadd.f32 %v8446_v24, %v858_v46 }
 0x275   :  { %1921 = vst.msk [vmem:[#allocation2 + $0x7d8] sm:$0xff] %vm1346_vm3, %v859_v47  ;;  %1135 = vxpose.xlu0.b32.cont [14/16] (narrow) %v859_v47, 64 }
 0x27a   :  { %v861_v49 = vpop.f32.mrf.mxu0 }
 0x27b   :  { %v862_v50 = vadd.f32 %v8446_v24, %v861_v49 }
 0x27d   :  { %1922 = vst.msk [vmem:[#allocation2 + $0x7e8] sm:$0xff] %vm1346_vm3, %v862_v50  ;;  %6736 = vmatmul.msk.bf16.gmra.mxu0 %vm497_vm2, %v7724_v48  ;;  %1136 = vxpose.xlu0.b32.cont [15/16] (narrow) %v862_v50, 64 }
 0x282   :  { %v863_v51 = vpop.f32.mrf.mxu0 }
 0x283   :  { %v864_v52 = vadd.f32 %v8446_v24, %v863_v51 }
 0x285   :  { %1923 = vst.msk [vmem:[#allocation2 + $0x7f8] sm:$0xff] %vm1346_vm3, %v864_v52  ;;  %1137 = vxpose.xlu0.b32.end [16/16] (narrow) %v864_v52, 64  ;;  %v7766_v52 = vld [vmem:[%s11033_s3 + $0x78] sm:$0xff] }
 0x286   :  { %2443 = vmatpush.bf16.msra.mxu1 %v7766_v52 }
 0x28a   :  { %v866_v54 = vpop.f32.mrf.mxu0 }
 0x28b   :  { %v867_v55 = vadd.f32 %v8446_v24, %v866_v54 }
 0x28d   :  { %1924 = vst.msk [vmem:[#allocation2 + $0x888] sm:$0xff] %vm1346_vm3, %v867_v55  ;;  %6737 = vmatmul.msk.bf16.gmra.mxu0 %vm497_vm2, %v7725_v53  ;;  %1154 = vxpose.xlu1.b32.start [1/16] (narrow) %v867_v55, 64  ;;  %v7735_v53 = vld [vmem:[%s11032_s0 + $0x190] sm:$0xff] }
 0x292   :  { %v868_v56 = vpop.f32.mrf.mxu0 }
 0x293   :  { %v869_v57 = vadd.f32 %v8446_v24, %v868_v56  ;;  %v7765_v56 = vld [vmem:[%s11033_s3 + $0x70] sm:$0xff] }
 0x294   :  { %2444 = vmatpush.bf16.msra.mxu1 %v7765_v56 }
 0x295   :  { %1925 = vst.msk [vmem:[#allocation2 + $0x898] sm:$0xff] %vm1346_vm3, %v869_v57  ;;  %1155 = vxpose.xlu1.b32.cont [2/16] (narrow) %v869_v57, 64  ;;  %v7764_v57 = vld [vmem:[%s11033_s3 + $0x68] sm:$0xff] }
 0x298   :  { %2445 = vmatpush.bf16.msra.mxu1 %v7764_v57 }
 0x29a   :  { %v871_v59 = vpop.f32.mrf.mxu0 }
 0x29b   :  { %v872_v60 = vadd.f32 %v8446_v24, %v871_v59 }
 0x29d   :  { %1926 = vst.msk [vmem:[#allocation2 + $0x8a8] sm:$0xff] %vm1346_vm3, %v872_v60  ;;  %6738 = vmatmul.msk.bf16.gmra.mxu0 %vm497_vm2, %v7726_v58  ;;  %1156 = vxpose.xlu1.b32.cont [3/16] (narrow) %v872_v60, 64 }
 0x2a2   :  { %v873_v61 = vpop.f32.mrf.mxu0 }
 0x2a3   :  { %v874_v62 = vadd.f32 %v8446_v24, %v873_v61 }
 0x2a5   :  { %1927 = vst.msk [vmem:[#allocation2 + $0x8b8] sm:$0xff] %vm1346_vm3, %v874_v62  ;;  %1157 = vxpose.xlu1.b32.cont [4/16] (narrow) %v874_v62, 64 }
 0x2aa   :  { %v876_v0 = vpop.f32.mrf.mxu0 }
 0x2ab   :  { %v877_v1 = vadd.f32 %v8446_v24, %v876_v0  ;;  %v7736_v0 = vld [vmem:[%s11032_s0 + $0x198] sm:$0xff] }
 0x2ad   :  { %1928 = vst.msk [vmem:[#allocation2 + $0x8c8] sm:$0xff] %vm1346_vm3, %v877_v1  ;;  %6739 = vmatmul.msk.bf16.gmra.mxu0 %vm497_vm2, %v7727_v63  ;;  %1158 = vxpose.xlu1.b32.cont [5/16] (narrow) %v877_v1, 64  ;;  %v7763_v63 = vld [vmem:[%s11033_s3 + $0x60] sm:$0xff] }
 0x2ae   :  { %2446 = vmatpush.bf16.msra.mxu1 %v7763_v63 }
 0x2b2   :  { %v878_v2 = vpop.f32.mrf.mxu0 }
 0x2b3   :  { %v879_v3 = vadd.f32 %v8446_v24, %v878_v2 }
 0x2b5   :  { %1929 = vst.msk [vmem:[#allocation2 + $0x8d8] sm:$0xff] %vm1346_vm3, %v879_v3  ;;  %1159 = vxpose.xlu1.b32.cont [6/16] (narrow) %v879_v3, 64 }
 0x2ba   :  { %v881_v5 = vpop.f32.mrf.mxu0 }
 0x2bb   :  { %v882_v6 = vadd.f32 %v8446_v24, %v881_v5 }
 0x2bd   :  { %1930 = vst.msk [vmem:[#allocation2 + $0x8e8] sm:$0xff] %vm1346_vm3, %v882_v6  ;;  %6740 = vmatmul.msk.bf16.gmra.mxu0 %vm497_vm2, %v7728_v4  ;;  %1160 = vxpose.xlu1.b32.cont [7/16] (narrow) %v882_v6, 64 }
 0x2c2   :  { %v883_v7 = vpop.f32.mrf.mxu0 }
 0x2c3   :  { %v884_v8 = vadd.f32 %v8446_v24, %v883_v7 }
 0x2c5   :  { %1931 = vst.msk [vmem:[#allocation2 + $0x8f8] sm:$0xff] %vm1346_vm3, %v884_v8  ;;  %1161 = vxpose.xlu1.b32.cont [8/16] (narrow) %v884_v8, 64  ;;  %v7737_v8 = vld [vmem:[%s11032_s0 + $0x1a0] sm:$0xff] }
 0x2ca   :  { %v886_v10 = vpop.f32.mrf.mxu0 }
 0x2cb   :  { %v887_v11 = vadd.f32 %v8446_v24, %v886_v10 }
 0x2cd   :  { %1932 = vst.msk [vmem:[#allocation2 + $0x988] sm:$0xff] %vm1346_vm3, %v887_v11  ;;  %6741 = vmatmul.msk.bf16.gmra.mxu0 %vm497_vm2, %v7729_v9  ;;  %1162 = vxpose.xlu1.b32.cont [9/16] (narrow) %v887_v11, 64 }
 0x2d2   :  { %v888_v12 = vpop.f32.mrf.mxu0 }
 0x2d3   :  { %v889_v13 = vadd.f32 %v8446_v24, %v888_v12  ;;  %v2384_v12 = vld [vmem:[#allocation2 + $0x597] sm:$0xff] }
 0x2d5   :  { %1933 = vst.msk [vmem:[#allocation2 + $0x998] sm:$0xff] %vm1346_vm3, %v889_v13  ;;  %1163 = vxpose.xlu1.b32.cont [10/16] (narrow) %v889_v13, 64 }
 0x2da   :  { %v891_v16 = vpop.f32.mrf.mxu0 }
 0x2db   :  { %v892_v17 = vadd.f32 %v8446_v24, %v891_v16  ;;  %v1016_v16 = vpop.f32.mrf.mxu1 }
 0x2dd   :  { %1934 = vst.msk [vmem:[#allocation2 + $0x9a8] sm:$0xff] %vm1346_vm3, %v892_v17  ;;  %6742 = vmatmul.msk.bf16.gmra.mxu0 %vm497_vm2, %v7730_v15  ;;  %1164 = vxpose.xlu1.b32.cont [11/16] (narrow) %v892_v17, 64  ;;  %v2391_v15 = vpack.c.bf16 %v2384_v12, %v2383_v14  ;;  %v8875_v17 = vadd.f32 %v8446_v24, %v1016_v16 }
 0x2df   :  { %1984 = vst.msk [vmem:[#allocation2 + $0xfc8] sm:$0xff] %vm1346_vm3, %v8875_v17 }
 0x2e2   :  { %v893_v18 = vpop.f32.mrf.mxu0 }
 0x2e3   :  { %v894_v19 = vadd.f32 %v8446_v24, %v893_v18  ;;  %v7738_v18 = vld [vmem:[%s11032_s0 + $0x1a8] sm:$0xff] }
 0x2e5   :  { %1935 = vst.msk [vmem:[#allocation2 + $0x9b8] sm:$0xff] %vm1346_vm3, %v894_v19  ;;  %1165 = vxpose.xlu1.b32.cont [12/16] (narrow) %v894_v19, 64 }
 0x2ea   :  { %v896_v23 = vpop.f32.mrf.mxu0 }
 0x2eb   :  { %v897_v25 = vadd.f32 %v8446_v24, %v896_v23 }
 0x2ed   :  { %1936 = vst.msk [vmem:[#allocation2 + $0x9c8] sm:$0xff] %vm1346_vm3, %v897_v25  ;;  %6743 = vmatmul.msk.bf16.gmra.mxu0 %vm497_vm2, %v7731_v22  ;;  %1166 = vxpose.xlu1.b32.cont [13/16] (narrow) %v897_v25, 64  ;;  %v2386_v25 = vld [vmem:[#allocation2 + $0x5b7] sm:$0xff] }
 0x2f2   :  { %v898_v28 = vpop.f32.mrf.mxu0 }
 0x2f3   :  { %v899_v29 = vadd.f32 %v8446_v24, %v898_v28  ;;  %v2392_v28 = vpack.c.bf16 %v2386_v25, %v2385_v27 }
 0x2f5   :  { %1937 = vst.msk [vmem:[#allocation2 + $0x9d8] sm:$0xff] %vm1346_vm3, %v899_v29  ;;  %1167 = vxpose.xlu1.b32.cont [14/16] (narrow) %v899_v29, 64 }
 0x2fa   :  { %v901_v32 = vpop.f32.mrf.mxu0 }
 0x2fb   :  { %v902_v33 = vadd.f32 %v8446_v24, %v901_v32 }
 0x2fd   :  { %1938 = vst.msk [vmem:[#allocation2 + $0x9e8] sm:$0xff] %vm1346_vm3, %v902_v33  ;;  %6744 = vmatmul.msk.bf16.gmra.mxu0 %vm497_vm2, %v7732_v31  ;;  %1168 = vxpose.xlu1.b32.cont [15/16] (narrow) %v902_v33, 64  ;;  %v7739_v31 = vld [vmem:[%s11032_s0 + $0x1b0] sm:$0xff] }
 0x302   :  { %v903_v34 = vpop.f32.mrf.mxu0 }
 0x303   :  { %v904_v35 = vadd.f32 %v8446_v24, %v903_v34 }
 0x305   :  { %1939 = vst.msk [vmem:[#allocation2 + $0x9f8] sm:$0xff] %vm1346_vm3, %v904_v35  ;;  %1169 = vxpose.xlu1.b32.end [16/16] (narrow) %v904_v35, 64 }
 0x30a   :  { %v906_v37 = vpop.f32.mrf.mxu0 }
 0x30b   :  { %v907_v38 = vadd.f32 %v8446_v24, %v906_v37  ;;  %v2388_v37 = vld [vmem:[#allocation2 + $0x5d7] sm:$0xff] }
 0x30d   :  { %1940 = vst.msk [vmem:[#allocation2 + $0xa88] sm:$0xff] %vm1346_vm3, %v907_v38  ;;  %6745 = vmatmul.msk.bf16.gmra.mxu0 %vm497_vm2, %v7733_v36  ;;  %1186 = vxpose.xlu2.b32.start [1/16] (narrow) %v907_v38, 64 }
 0x312   :  { %v908_v39 = vpop.f32.mrf.mxu0 }
 0x313   :  { %v909_v41 = vadd.f32 %v8446_v24, %v908_v39  ;;  %v2387_v39 = vld [vmem:[#allocation2 + $0x5c7] sm:$0xff] }
 0x314   :  { %v2139_v42 = vld [vmem:[#allocation2 + $0xa88] sm:$0xff] }
 0x315   :  { %1941 = vst.msk [vmem:[#allocation2 + $0xa98] sm:$0xff] %vm1346_vm3, %v909_v41  ;;  %1187 = vxpose.xlu2.b32.cont [2/16] (narrow) %v909_v41, 64  ;;  %v2146_v43 = vpack.c.bf16 %v2139_v42, %v2138_v40  ;;  %v2393_v40 = vpack.c.bf16 %v2388_v37, %v2387_v39  ;;  %v7740_v41 = vld [vmem:[%s11032_s0 + $0x1b8] sm:$0xff]  ;;  %v7760_v39 = vld [vmem:[%s11033_s3 + $0x48] sm:$0xff] }
 0x317   :  { %6777 = vmatmul.msk.bf16.vlgmr.msrb.gmra.mxu1 %vm1346_vm3, %v2146_v43 }
 0x31a   :  { %v911_v45 = vpop.f32.mrf.mxu0 }
 0x31b   :  { %v912_v46 = vadd.f32 %v8446_v24, %v911_v45  ;;  %v2390_v45 = vld [vmem:[#allocation2 + $0x5f7] sm:$0xff] }
 0x31c   :  { %v2140_v49 = vld [vmem:[#allocation2 + $0xa98] sm:$0xff] }
 0x31d   :  { %1942 = vst.msk [vmem:[#allocation2 + $0xaa8] sm:$0xff] %vm1346_vm3, %v912_v46  ;;  %6746 = vmatmul.msk.bf16.gmra.mxu0 %vm497_vm2, %v7734_v44  ;;  %1188 = vxpose.xlu2.b32.cont [3/16] (narrow) %v912_v46, 64 }
 0x322   :  { %v913_v47 = vpop.f32.mrf.mxu0 }
 0x323   :  { %v914_v48 = vadd.f32 %v8446_v24, %v913_v47  ;;  %v2389_v47 = vld [vmem:[#allocation2 + $0x5e7] sm:$0xff] }
 0x324   :  { %v2141_v50 = vld [vmem:[#allocation2 + $0xaa8] sm:$0xff] }
 0x325   :  { %1943 = vst.msk [vmem:[#allocation2 + $0xab8] sm:$0xff] %vm1346_vm3, %v914_v48  ;;  %1189 = vxpose.xlu2.b32.cont [4/16] (narrow) %v914_v48, 64  ;;  %v2147_v51 = vpack.c.bf16 %v2141_v50, %v2140_v49  ;;  %v2394_v48 = vpack.c.bf16 %v2390_v45, %v2389_v47  ;;  %v7741_v49 = vld [vmem:[%s11032_s0 + $0x1c0] sm:$0xff]  ;;  %v7793_v45 = vld [vmem:[%s11033_s3 + $0x30] sm:$0xff] }
 0x327   :  { %6778 = vmatmul.msk.bf16.gmra.mxu1 %vm1346_vm3, %v2147_v51 }
 0x32a   :  { %v916_v54 = vpop.f32.mrf.mxu0 }
 0x32b   :  { %v917_v55 = vadd.f32 %v8446_v24, %v916_v54  ;;  %v7742_v54 = vld [vmem:[%s11032_s0 + $0x1c8] sm:$0xff] }
 0x32c   :  { %v2142_v60 = vld [vmem:[#allocation2 + $0xab8] sm:$0xff] }
 0x32d   :  { %1944 = vst.msk [vmem:[#allocation2 + $0xac8] sm:$0xff] %vm1346_vm3, %v917_v55  ;;  %6747 = vmatmul.msk.bf16.gmra.mxu0 %vm497_vm2, %v7735_v53  ;;  %1190 = vxpose.xlu2.b32.cont [5/16] (narrow) %v917_v55, 64 }
 0x332   :  { %v918_v58 = vpop.f32.mrf.mxu0 }
 0x333   :  { %v919_v59 = vadd.f32 %v8446_v24, %v918_v58 }
 0x334   :  { %v2143_v61 = vld [vmem:[#allocation2 + $0xac8] sm:$0xff] }
 0x335   :  { %1945 = vst.msk [vmem:[#allocation2 + $0xad8] sm:$0xff] %vm1346_vm3, %v919_v59  ;;  %1191 = vxpose.xlu2.b32.cont [6/16] (narrow) %v919_v59, 64  ;;  %v2148_v62 = vpack.c.bf16 %v2143_v61, %v2142_v60  ;;  %v7743_v59 = vld [vmem:[%s11032_s0 + $0x1d0] sm:$0xff] }
 0x337   :  { %6779 = vmatmul.msk.bf16.gmra.mxu1 %vm1346_vm3, %v2148_v62  ;;  %v7778_v62 = vld [vmem:[%s11033_s3 + $0xd8] sm:$0xff] }
 0x338   :  { %2724 = vmatpush.bf16.msrb.mxu1 %v7778_v62 }
 0x33a   :  { %v921_v1 = vpop.f32.mrf.mxu0 }
 0x33b   :  { %v922_v2 = vadd.f32 %v8446_v24, %v921_v1  ;;  %v7777_v1 = vld [vmem:[%s11033_s3 + $0xd0] sm:$0xff] }
 0x33c   :  { %v2144_v5 = vld [vmem:[#allocation2 + $0xad8] sm:$0xff]  ;;  %2725 = vmatpush.bf16.msrb.mxu1 %v7777_v1 }
 0x33d   :  { %1946 = vst.msk [vmem:[#allocation2 + $0xae8] sm:$0xff] %vm1346_vm3, %v922_v2  ;;  %6748 = vmatmul.msk.bf16.gmra.mxu0 %vm497_vm2, %v7736_v0  ;;  %1192 = vxpose.xlu2.b32.cont [7/16] (narrow) %v922_v2, 64  ;;  %v7776_v2 = vld [vmem:[%s11033_s3 + $0xc8] sm:$0xff] }
 0x340   :  { %2726 = vmatpush.bf16.msrb.mxu1 %v7776_v2 }
 0x342   :  { %v923_v3 = vpop.f32.mrf.mxu0 }
 0x343   :  { %v924_v4 = vadd.f32 %v8446_v24, %v923_v3  ;;  %v7744_v3 = vld [vmem:[%s11032_s0 + $0x1d8] sm:$0xff] }
 0x344   :  { %v2145_v6 = vld [vmem:[#allocation2 + $0xae8] sm:$0xff] }
 0x345   :  { %1947 = vst.msk [vmem:[#allocation2 + $0xaf8] sm:$0xff] %vm1346_vm3, %v924_v4  ;;  %1193 = vxpose.xlu2.b32.cont [8/16] (narrow) %v924_v4, 64  ;;  %v2149_v7 = vpack.c.bf16 %v2145_v6, %v2144_v5  ;;  %v7775_v6 = vld [vmem:[%s11033_s3 + $0xc0] sm:$0xff] }
 0x346   :  { %2727 = vmatpush.bf16.msrb.mxu1 %v7775_v6  ;;  %v2995_v6 = vld [vmem:[#allocation2 + $0xb78] sm:$0xff] }
 0x347   :  { %6780 = vmatmul.msk.bf16.gmra.mxu1 %vm1346_vm3, %v2149_v7 }
 0x34a   :  { %v926_v9 = vpop.f32.mrf.mxu0 }
 0x34b   :  { %v927_v10 = vadd.f32 %v8446_v24, %v926_v9 }
 0x34d   :  { %1948 = vst.msk [vmem:[#allocation2 + $0xb88] sm:$0xff] %vm1346_vm3, %v927_v10  ;;  %6749 = vmatmul.msk.bf16.gmra.mxu0 %vm497_vm2, %v7737_v8  ;;  %1194 = vxpose.xlu2.b32.cont [9/16] (narrow) %v927_v10, 64 }
 0x352   :  { %v928_v11 = vpop.f32.mrf.mxu0 }
 0x353   :  { %v929_v13 = vadd.f32 %v8446_v24, %v928_v11  ;;  %v1018_v24 = vpop.f32.mrf.mxu1  ;;  %v7745_v11 = vld [vmem:[%s11032_s0 + $0x1e0] sm:$0xff] }
 0x354   :  { %v8892_v22 = vadd.f32 %v8886_v20, %v1018_v24 }
 0x355   :  { %1949 = vst.msk [vmem:[#allocation2 + $0xb98] sm:$0xff] %vm1346_vm3, %v929_v13  ;;  %1195 = vxpose.xlu2.b32.cont [10/16] (narrow) %v929_v13, 64 }
 0x356   :  { %1985 = vst.msk [vmem:[#allocation2 + $0xfd8] sm:$0xff] %vm1346_vm3, %v8892_v22 }
 0x357   :  { %6837 = vmatmul.msk.bf16.vlgmr.msra.gmra.mxu1 %vm1346_vm3, %v2391_v15 }
 0x35a   :  { %v931_v19 = vpop.f32.mrf.mxu0 }
 0x35b   :  { %v932_v21 = vadd.f32 %v8886_v20, %v931_v19  ;;  %v1021_v29 = vpop.f32.mrf.mxu1 }
 0x35c   :  { %v8899_v30 = vadd.f32 %v8886_v20, %v1021_v29  ;;  %v7762_v29 = vld [vmem:[%s11033_s3 + $0x58] sm:$0xff] }
 0x35d   :  { %1950 = vst.msk [vmem:[#allocation2 + $0xba8] sm:$0xff] %vm1346_vm3, %v932_v21  ;;  %6750 = vmatmul.msk.bf16.gmra.mxu0 %vm497_vm2, %v7738_v18  ;;  %1196 = vxpose.xlu2.b32.cont [11/16] (narrow) %v932_v21, 64  ;;  %v7746_v18 = vld [vmem:[%s11032_s0 + $0x1e8] sm:$0xff] }
 0x35e   :  { %1986 = vst.msk [vmem:[#allocation2 + $0xfe8] sm:$0xff] %vm1346_vm3, %v8899_v30  ;;  %2349 = vmatpush.bf16.msra.mxu3 %v7762_v29  ;;  %v2997_v29 = vld [vmem:[#allocation2 + $0xb98] sm:$0xff] }
 0x362   :  { %v933_v23 = vpop.f32.mrf.mxu0 }
 0x363   :  { %v934_v26 = vadd.f32 %v8886_v20, %v933_v23  ;;  %v1023_v34 = vpop.f32.mrf.mxu1 }
 0x364   :  { %v8911_v35 = vadd.f32 %v8886_v20, %v1023_v34 }
 0x365   :  { %1951 = vst.msk [vmem:[#allocation2 + $0xbb8] sm:$0xff] %vm1346_vm3, %v934_v26  ;;  %1197 = vxpose.xlu2.b32.cont [12/16] (narrow) %v934_v26, 64 }
 0x366   :  { %1987 = vst.msk [vmem:[#allocation2 + $0xff8] sm:$0xff] %vm1346_vm3, %v8911_v35 }
 0x367   :  { %6838 = vmatmul.msk.bf16.gmra.mxu1 %vm1346_vm3, %v2392_v28 }
 0x36a   :  { %v936_v32 = vpop.f32.mrf.mxu0 }
 0x36b   :  { %v937_v33 = vadd.f32 %v8886_v20, %v936_v32 }
 0x36d   :  { %1952 = vst.msk [vmem:[#allocation2 + $0xbc8] sm:$0xff] %vm1346_vm3, %v937_v33  ;;  %6751 = vmatmul.msk.bf16.gmra.mxu0 %vm497_vm2, %v7739_v31  ;;  %1198 = vxpose.xlu2.b32.cont [13/16] (narrow) %v937_v33, 64 }
 0x372   :  { %v938_v36 = vpop.f32.mrf.mxu0 }
 0x373   :  { %v939_v38 = vadd.f32 %v8886_v20, %v938_v36 }
 0x375   :  { %1953 = vst.msk [vmem:[#allocation2 + $0xbd8] sm:$0xff] %vm1346_vm3, %v939_v38  ;;  %1199 = vxpose.xlu2.b32.cont [14/16] (narrow) %v939_v38, 64  ;;  %v7761_v38 = vld [vmem:[%s11033_s3 + $0x50] sm:$0xff] }
 0x376   :  { %2350 = vmatpush.bf16.msra.mxu3 %v7761_v38  ;;  %v7772_v38 = vld [vmem:[%s11033_s3 + $0xa8] sm:$0xff] }
 0x377   :  { %6839 = vmatmul.msk.bf16.gmra.mxu1 %vm1346_vm3, %v2393_v40  ;;  %v7794_v40 = vld [vmem:[%s11033_s3 + $0x38] sm:$0xff] }
 0x378   :  { %3055 = vmatpush.bf16.msra.mxu1 %v7794_v40 }
 0x37a   :  { %v941_v42 = vpop.f32.mrf.mxu0  ;;  %2351 = vmatpush.bf16.msra.mxu3 %v7760_v39 }
 0x37b   :  { %v942_v43 = vadd.f32 %v8886_v20, %v941_v42 }
 0x37c   :  { %3056 = vmatpush.bf16.msra.mxu1 %v7793_v45  ;;  %v7751_v45 = vld [vmem:[%s11033_s3] sm:$0xff] }
 0x37d   :  { %1954 = vst.msk [vmem:[#allocation2 + $0xbe8] sm:$0xff] %vm1346_vm3, %v942_v43  ;;  %6752 = vmatmul.msk.bf16.gmra.mxu0 %vm497_vm2, %v7740_v41  ;;  %1200 = vxpose.xlu2.b32.cont [15/16] (narrow) %v942_v43, 64 }
 0x382   :  { %v943_v44 = vpop.f32.mrf.mxu0 }
 0x383   :  { %v944_v46 = vadd.f32 %v8886_v20, %v943_v44  ;;  %v7759_v44 = vld [vmem:[%s11033_s3 + $0x40] sm:$0xff] }
 0x384   :  { %2352 = vmatpush.bf16.msra.mxu3 %v7759_v44 }
 0x385   :  { %1955 = vst.msk [vmem:[#allocation2 + $0xbf8] sm:$0xff] %vm1346_vm3, %v944_v46  ;;  %1201 = vxpose.xlu2.b32.end [16/16] (narrow) %v944_v46, 64  ;;  %v7792_v46 = vld [vmem:[%s11033_s3 + $0x28] sm:$0xff] }
 0x386   :  { %3057 = vmatpush.bf16.msra.mxu1 %v7792_v46  ;;  %v7771_v46 = vld [vmem:[%s11033_s3 + $0xa0] sm:$0xff] }
 0x387   :  { %6840 = vmatmul.msk.bf16.gmra.mxu1 %vm1346_vm3, %v2394_v48 }
 0x38a   :  { %v946_v50 = vpop.f32.mrf.mxu0 }
 0x38b   :  { %v947_v51 = vadd.f32 %v8886_v20, %v946_v50 }
 0x38d   :  { %1956 = vst.msk [vmem:[#allocation2 + $0xc88] sm:$0xff] %vm1346_vm3, %v947_v51  ;;  %6753 = vmatmul.msk.bf16.gmra.mxu0 %vm497_vm2, %v7741_v49  ;;  %1218 = vxpose.xlu0.b32.start [1/16] (narrow) %v947_v51, 64 }
 0x392   :  { %v948_v52 = vpop.f32.mrf.mxu0 }
 0x393   :  { %v949_v53 = vadd.f32 %v8886_v20, %v948_v52 }
 0x394   :  { %v8969_v7 = vpop.f32.mrf.mxu1 }
 0x395   :  { %1957 = vst.msk [vmem:[#allocation2 + $0xc98] sm:$0xff] %vm1346_vm3, %v949_v53  ;;  %1219 = vxpose.xlu0.b32.cont [2/16] (narrow) %v949_v53, 64  ;;  %v7791_v53 = vld [vmem:[%s11033_s3 + $0x20] sm:$0xff] }
 0x396   :  { %3058 = vmatpush.bf16.msra.mxu1 %v7791_v53  ;;  %v3000_v53 = vld [vmem:[#allocation2 + $0xbc8] sm:$0xff] }
 0x39a   :  { %v951_v55 = vpop.f32.mrf.mxu0 }
 0x39b   :  { %v952_v56 = vadd.f32 %v8886_v20, %v951_v55 }
 0x39c   :  { %v8973_v10 = vpop.f32.mrf.mxu1 }
 0x39d   :  { %1958 = vst.msk [vmem:[#allocation2 + $0xca8] sm:$0xff] %vm1346_vm3, %v952_v56  ;;  %6754 = vmatmul.msk.bf16.gmra.mxu0 %vm497_vm2, %v7742_v54  ;;  %1220 = vxpose.xlu0.b32.cont [3/16] (narrow) %v952_v56, 64 }
 0x3a2   :  { %v953_v57 = vpop.f32.mrf.mxu0 }
 0x3a3   :  { %v954_v58 = vadd.f32 %v8886_v20, %v953_v57 }
 0x3a4   :  { %v8981_v14 = vpop.f32.mrf.mxu1 }
 0x3a5   :  { %1959 = vst.msk [vmem:[#allocation2 + $0xcb8] sm:$0xff] %vm1346_vm3, %v954_v58  ;;  %1221 = vxpose.xlu0.b32.cont [4/16] (narrow) %v954_v58, 64 }
 0x3aa   :  { %v956_v60 = vpop.f32.mrf.mxu0 }
 0x3ab   :  { %v957_v61 = vadd.f32 %v8886_v20, %v956_v60 }
 0x3ac   :  { %v8989_v24 = vpop.f32.mrf.mxu1 }
 0x3ad   :  { %1960 = vst.msk [vmem:[#allocation2 + $0xcc8] sm:$0xff] %vm1346_vm3, %v957_v61  ;;  %6755 = vmatmul.msk.bf16.gmra.mxu0 %vm497_vm2, %v7743_v59  ;;  %1222 = vxpose.xlu0.b32.cont [5/16] (narrow) %v957_v61, 64 }
 0x3b2   :  { %v958_v63 = vpop.f32.mrf.mxu0 }
 0x3b3   :  { %v959_v0 = vadd.f32 %v8886_v20, %v958_v63 }
 0x3b4   :  { %v8999_v31 = vpop.f32.mrf.mxu1 }
 0x3b5   :  { %1961 = vst.msk [vmem:[#allocation2 + $0xcd8] sm:$0xff] %vm1346_vm3, %v959_v0  ;;  %1223 = vxpose.xlu0.b32.cont [6/16] (narrow) %v959_v0, 64  ;;  %v2289_v0 = vld [vmem:[#allocation2 + $0xe78] sm:$0xff] }
 0x3ba   :  { %v961_v4 = vpop.f32.mrf.mxu0 }
 0x3bb   :  { %v962_v5 = vadd.f32 %v8886_v20, %v961_v4 }
 0x3bc   :  { %v9013_v41 = vpop.f32.mrf.mxu1 }
 0x3bd   :  { %1962 = vst.msk [vmem:[#allocation2 + $0xce8] sm:$0xff] %vm1346_vm3, %v962_v5  ;;  %6756 = vmatmul.msk.bf16.gmra.mxu0 %vm497_vm2, %v7744_v3  ;;  %1224 = vxpose.xlu0.b32.cont [7/16] (narrow) %v962_v5, 64 }
 0x3c2   :  { %v963_v8 = vpop.f32.mrf.mxu0 }
 0x3c3   :  { %v964_v9 = vadd.f32 %v8886_v20, %v963_v8  ;;  %v2996_v8 = vld [vmem:[#allocation2 + $0xb88] sm:$0xff] }
 0x3c4   :  { %v9026_v47 = vpop.f32.mrf.mxu1 }
 0x3c5   :  { %1963 = vst.msk [vmem:[#allocation2 + $0xcf8] sm:$0xff] %vm1346_vm3, %v964_v9  ;;  %1225 = vxpose.xlu0.b32.cont [8/16] (narrow) %v964_v9, 64 }
 0x3ca   :  { %v966_v12 = vpop.f32.mrf.mxu0 }
 0x3cb   :  { %v967_v13 = vadd.f32 %v8886_v20, %v966_v12 }
 0x3cc   :  { %v9035_v56 = vpop.f32.mrf.mxu1 }
 0x3cd   :  { %1964 = vst.msk [vmem:[#allocation2 + $0xd88] sm:$0xff] %vm1346_vm3, %v967_v13  ;;  %6757 = vmatmul.msk.bf16.gmra.mxu0 %vm497_vm2, %v7745_v11  ;;  %1226 = vxpose.xlu0.b32.cont [9/16] (narrow) %v967_v13, 64  ;;  %v3003_v11 = vpack.c.bf16 %v2996_v8, %v2995_v6  ;;  %v3002_v8 = vld [vmem:[#allocation2 + $0xbe8] sm:$0xff] }
 0x3d2   :  { %v968_v15 = vpop.f32.mrf.mxu0 }
 0x3d3   :  { %v969_v16 = vadd.f32 %v8886_v20, %v968_v15 }
 0x3d4   :  { %v2664_v23 = vld [vmem:[#allocation2 + $0xd87] sm:$0xff]  ;;  %v9040_v62 = vpop.f32.mrf.mxu1 }
 0x3d5   :  { %1965 = vst.msk [vmem:[#allocation2 + $0xd98] sm:$0xff] %vm1346_vm3, %v969_v16  ;;  %1227 = vxpose.xlu0.b32.cont [10/16] (narrow) %v969_v16, 64 }
 0x3da   :  { %v971_v19 = vpop.f32.mrf.mxu0 }
 0x3db   :  { %v972_v21 = vadd.f32 %v8886_v20, %v971_v19 }
 0x3dc   :  { %v2665_v25 = vld [vmem:[#allocation2 + $0xd97] sm:$0xff]  ;;  %v9049_v4 = vpop.f32.mrf.mxu1 }
 0x3dd   :  { %1966 = vst.msk [vmem:[#allocation2 + $0xda8] sm:$0xff] %vm1346_vm3, %v972_v21  ;;  %6758 = vmatmul.msk.bf16.gmra.mxu0 %vm497_vm2, %v7746_v18  ;;  %1228 = vxpose.xlu0.b32.cont [11/16] (narrow) %v972_v21, 64  ;;  %v2672_v26 = vpack.c.bf16 %v2665_v25, %v2664_v23  ;;  %v7754_v21 = vld [vmem:[%s11033_s3 + $0x18] sm:$0xff] }
 0x3de   :  { %v7774_v23 = vld [vmem:[%s11033_s3 + $0xb8] sm:$0xff]  ;;  %2263 = vmatpush.bf16.msra.mxu2 %v7754_v21 }
 0x3df   :  { %6897 = vmatmul.msk.bf16.vlgmr.msrb.gmra.mxu1 %vm1346_vm3, %v2672_v26  ;;  %2630 = vmatpush.bf16.msrb.mxu3 %v7774_v23  ;;  %v2998_v26 = vld [vmem:[#allocation2 + $0xba8] sm:$0xff] }
 0x3e2   :  { %v973_v27 = vpop.f32.mrf.mxu0 }
 0x3e3   :  { %v974_v28 = vadd.f32 %v8886_v20, %v973_v27 }
 0x3e4   :  { %v2666_v34 = vld [vmem:[#allocation2 + $0xda7] sm:$0xff]  ;;  %v9054_v12 = vpop.f32.mrf.mxu1 }
 0x3e5   :  { %1967 = vst.msk [vmem:[#allocation2 + $0xdb8] sm:$0xff] %vm1346_vm3, %v974_v28  ;;  %1229 = vxpose.xlu0.b32.cont [12/16] (narrow) %v974_v28, 64 }
 0x3ea   :  { %v976_v32 = vpop.f32.mrf.mxu0 }
 0x3eb   :  { %v977_v33 = vadd.f32 %v8886_v20, %v976_v32  ;;  %v3004_v32 = vpack.c.bf16 %v2998_v26, %v2997_v29  ;;  %v2570_v26 = vld [vmem:[#allocation2 + $0x488] sm:$0xff] }
 0x3ec   :  { %v2667_v36 = vld [vmem:[#allocation2 + $0xdb7] sm:$0xff]  ;;  %v9069_v28 = vpop.f32.mrf.mxu1 }
 0x3ed   :  { %1968 = vst.msk [vmem:[#allocation2 + $0xdc8] sm:$0xff] %vm1346_vm3, %v977_v33  ;;  %1230 = vxpose.xlu0.b32.cont [13/16] (narrow) %v977_v33, 64  ;;  %v2673_v37 = vpack.c.bf16 %v2667_v36, %v2666_v34  ;;  %v7753_v33 = vld [vmem:[%s11033_s3 + $0x10] sm:$0xff]  ;;  %v7752_v36 = vld [vmem:[%s11033_s3 + $0x8] sm:$0xff] }
 0x3ee   :  { %v7773_v34 = vld [vmem:[%s11033_s3 + $0xb0] sm:$0xff]  ;;  %2264 = vmatpush.bf16.msra.mxu2 %v7753_v33 }
 0x3ef   :  { %6898 = vmatmul.msk.bf16.gmra.mxu1 %vm1346_vm3, %v2673_v37  ;;  %v7802_v37 = vld [vmem:[%s11033_s3 + $0x78] sm:$0xff]  ;;  %2631 = vmatpush.bf16.msrb.mxu3 %v7773_v34 }
 0x3f0   :  { %3298 = vmatpush.bf16.msrb.mxu1 %v7802_v37 }
 0x3f2   :  { %v978_v42 = vpop.f32.mrf.mxu0  ;;  %2265 = vmatpush.bf16.msra.mxu2 %v7752_v36 }
 0x3f3   :  { %v979_v43 = vadd.f32 %v8886_v20, %v978_v42  ;;  %2632 = vmatpush.bf16.msrb.mxu3 %v7772_v38  ;;  %v2573_v38 = vld [vmem:[#allocation2 + $0x4b8] sm:$0xff] }
 0x3f4   :  { %v2668_v50 = vld [vmem:[#allocation2 + $0xdc7] sm:$0xff] }
 0x3f5   :  { %1969 = vst.msk [vmem:[#allocation2 + $0xdd8] sm:$0xff] %vm1346_vm3, %v979_v43  ;;  %1231 = vxpose.xlu0.b32.cont [14/16] (narrow) %v979_v43, 64 }
 0x3f6   :  { %2266 = vmatpush.bf16.msra.mxu2 %v7751_v45  ;;  %v2572_v45 = vld [vmem:[#allocation2 + $0x4a8] sm:$0xff] }
 0x3f7   :  { %2633 = vmatpush.bf16.msrb.mxu3 %v7771_v46 }
 0x3fa   :  { %v981_v48 = vpop.f32.mrf.mxu0 }
 0x3fb   :  { %v982_v49 = vadd.f32 %v8886_v20, %v981_v48  ;;  %v7801_v48 = vld [vmem:[%s11033_s3 + $0x70] sm:$0xff] }
 0x3fc   :  { %v2669_v51 = vld [vmem:[#allocation2 + $0xdd7] sm:$0xff]  ;;  %3299 = vmatpush.bf16.msrb.mxu1 %v7801_v48  ;;  %v2579_v48 = vpack.c.bf16 %v2573_v38, %v2572_v45  ;;  %v7780_v38 = vld [vmem:[%s11033_s3 + $0xe8] sm:$0xff] }
 0x3fd   :  { %1970 = vst.msk [vmem:[#allocation2 + $0xde8] sm:$0xff] %vm1346_vm3, %v982_v49  ;;  %1232 = vxpose.xlu0.b32.cont [15/16] (narrow) %v982_v49, 64  ;;  %v2674_v52 = vpack.c.bf16 %v2669_v51, %v2668_v50  ;;  %v9101_v49 = vpop.f32.mrf.mxu1  ;;  %v7770_v50 = vld [vmem:[%s11033_s3 + $0x98] sm:$0xff]  ;;  %v7800_v51 = vld [vmem:[%s11033_s3 + $0x68] sm:$0xff] }
 0x3fe   :  { %2536 = vmatpush.bf16.msrb.mxu2 %v7770_v50  ;;  %v7786_v50 = vld [vmem:[%s11033_s3 + $0x118] sm:$0xff] }
 0x3ff   :  { %6899 = vmatmul.msk.bf16.gmra.mxu1 %vm1346_vm3, %v2674_v52 }
 0x400   :  { %3300 = vmatpush.bf16.msrb.mxu1 %v7800_v51 }
 0x402   :  { %v983_v54 = vpop.f32.mrf.mxu0 }
 0x403   :  { %v984_v55 = vadd.f32 %v8886_v20, %v983_v54 }
 0x404   :  { %v2670_v59 = vld [vmem:[#allocation2 + $0xde7] sm:$0xff] }
 0x405   :  { %1971 = vst.msk [vmem:[#allocation2 + $0xdf8] sm:$0xff] %vm1346_vm3, %v984_v55  ;;  %1233 = vxpose.xlu0.b32.end [16/16] (narrow) %v984_v55, 64  ;;  %v2999_v55 = vld [vmem:[#allocation2 + $0xbb8] sm:$0xff] }
 0x40a   :  { %v986_v57 = vpop.f32.mrf.mxu0 }
 0x40b   :  { %v987_v58 = vadd.f32 %v8886_v20, %v986_v57  ;;  %v3005_v57 = vpack.c.bf16 %v3000_v53, %v2999_v55  ;;  %v7784_v53 = vld [vmem:[%s11033_s3 + $0x108] sm:$0xff] }
 0x40c   :  { %v2671_v60 = vld [vmem:[#allocation2 + $0xdf7] sm:$0xff] }
 0x40d   :  { %1972 = vst.msk [vmem:[#allocation2 + $0xe88] sm:$0xff] %vm1346_vm3, %v987_v58  ;;  %1250 = vxpose.xlu1.b32.start [1/16] (narrow) %v987_v58, 64  ;;  %v2675_v61 = vpack.c.bf16 %v2671_v60, %v2670_v59  ;;  %v7799_v58 = vld [vmem:[%s11033_s3 + $0x60] sm:$0xff]  ;;  %v9117_v59 = vpop.f32.mrf.mxu1 }
 0x40e   :  { %3301 = vmatpush.bf16.msrb.mxu1 %v7799_v58  ;;  %v2575_v58 = vld [vmem:[#allocation2 + $0x4d8] sm:$0xff] }
 0x40f   :  { %6900 = vmatmul.msk.bf16.gmra.mxu1 %vm1346_vm3, %v2675_v61 }
 0x412   :  { %v988_v63 = vpop.f32.mrf.mxu0 }
 0x413   :  { %v989_v1 = vadd.f32 %v8886_v20, %v988_v63 }
 0x414   :  { %v2290_v2 = vld [vmem:[#allocation2 + $0xe88] sm:$0xff] }
 0x415   :  { %1973 = vst.msk [vmem:[#allocation2 + $0xe98] sm:$0xff] %vm1346_vm3, %v989_v1  ;;  %1251 = vxpose.xlu1.b32.cont [2/16] (narrow) %v989_v1, 64  ;;  %v9045_v3 = vpack.c.bf16 %v2290_v2, %v2289_v0  ;;  %v7769_v2 = vld [vmem:[%s11033_s3 + $0x90] sm:$0xff] }
 0x416   :  { %2537 = vmatpush.bf16.msrb.mxu2 %v7769_v2 }
 0x417   :  { %6817 = vmatmul.msk.bf16.vlgmr.msra.gmra.mxu3 %vm1346_vm3, %v9045_v3 }
 0x418   :  { %2912 = vmatpush.bf16.msra.mxu3 %v7786_v50  ;;  %v2478_v50 = vld [vmem:[#allocation2 + $0xa8] sm:$0xff] }
 0x41a   :  { %v991_v5 = vpop.f32.mrf.mxu0 }
 0x41b   :  { %v992_v9 = vadd.f32 %v8886_v20, %v991_v5  ;;  %v9128_v5 = vpop.f32.mrf.mxu1 }
 0x41c   :  { %v2291_v16 = vld [vmem:[#allocation2 + $0xe98] sm:$0xff] }
 0x41d   :  { %1974 = vst.msk [vmem:[#allocation2 + $0xea8] sm:$0xff] %vm1346_vm3, %v992_v9  ;;  %1252 = vxpose.xlu1.b32.cont [3/16] (narrow) %v992_v9, 64 }
 0x41f   :  { %6957 = vmatmul.msk.bf16.vlgmr.msra.gmra.mxu1 %vm1346_vm3, %v3003_v11  ;;  %v3001_v11 = vld [vmem:[#allocation2 + $0xbd8] sm:$0xff] }
 0x422   :  { %v993_v13 = vpop.f32.mrf.mxu0 }
 0x423   :  { %v994_v15 = vadd.f32 %v8886_v20, %v993_v13  ;;  %v3006_v13 = vpack.c.bf16 %v3002_v8, %v3001_v11  ;;  %v9134_v23 = vpop.f32.mrf.mxu1  ;;  %v7812_v8 = vld [vmem:[%s11033_s3 + $0xc8] sm:$0xff]  ;;  %v2123_v11 = vld [vmem:[#allocation2 + $0xfd7] sm:$0xff] }
 0x424   :  { %v2292_v18 = vld [vmem:[#allocation2 + $0xea8] sm:$0xff] }
 0x425   :  { %1975 = vst.msk [vmem:[#allocation2 + $0xeb8] sm:$0xff] %vm1346_vm3, %v994_v15  ;;  %1253 = vxpose.xlu1.b32.cont [4/16] (narrow) %v994_v15, 64  ;;  %v9058_v19 = vpack.c.bf16 %v2292_v18, %v2291_v16  ;;  %v2117_v16 = vld [vmem:[#allocation2 + $0xf77] sm:$0xff] }
 0x426   :  { %v2571_v18 = vld [vmem:[#allocation2 + $0x498] sm:$0xff] }
 0x427   :  { %6818 = vmatmul.msk.bf16.gmra.mxu3 %vm1346_vm3, %v9058_v19  ;;  %v2578_v29 = vpack.c.bf16 %v2571_v18, %v2570_v26  ;;  %v2576_v18 = vld [vmem:[#allocation2 + $0x4e8] sm:$0xff] }
 0x42a   :  { %v996_v25 = vpop.f32.mrf.mxu0 }
 0x42b   :  { %v997_v27 = vadd.f32 %v8886_v20, %v996_v25 }
 0x42c   :  { %v2293_v42 = vld [vmem:[#allocation2 + $0xeb8] sm:$0xff] }
 0x42d   :  { %1976 = vst.msk [vmem:[#allocation2 + $0xec8] sm:$0xff] %vm1346_vm3, %v997_v27  ;;  %1254 = vxpose.xlu1.b32.cont [5/16] (narrow) %v997_v27, 64 }
 0x42f   :  { %6958 = vmatmul.msk.bf16.gmra.mxu1 %vm1346_vm3, %v3004_v32  ;;  %v7768_v32 = vld [vmem:[%s11033_s3 + $0x88] sm:$0xff] }
 0x430   :  { %2538 = vmatpush.bf16.msrb.mxu2 %v7768_v32 }
 0x432   :  { %v998_v39 = vpop.f32.mrf.mxu0 }
 0x433   :  { %v999_v40 = vadd.f32 %v8886_v20, %v998_v39 }
 0x434   :  { %v2294_v43 = vld [vmem:[#allocation2 + $0xec8] sm:$0xff] }
 0x435   :  { %1977 = vst.msk [vmem:[#allocation2 + $0xed8] sm:$0xff] %vm1346_vm3, %v999_v40  ;;  %1255 = vxpose.xlu1.b32.cont [6/16] (narrow) %v999_v40, 64  ;;  %v9090_v44 = vpack.c.bf16 %v2294_v43, %v2293_v42 }
 0x437   :  { %6819 = vmatmul.msk.bf16.gmra.mxu3 %vm1346_vm3, %v9090_v44 }
 0x43a   :  { %v1001_v52 = vpop.f32.mrf.mxu0 }
 0x43b   :  { %v1002_v54 = vadd.f32 %v8886_v20, %v1001_v52  ;;  %v7785_v52 = vld [vmem:[%s11033_s3 + $0x110] sm:$0xff] }
 0x43c   :  { %v2295_v63 = vld [vmem:[#allocation2 + $0xed8] sm:$0xff]  ;;  %2913 = vmatpush.bf16.msra.mxu3 %v7785_v52  ;;  %v2854_v52 = vld [vmem:[#allocation2 + $0xca8] sm:$0xff] }
 0x43d   :  { %1978 = vst.msk [vmem:[#allocation2 + $0xee8] sm:$0xff] %vm1346_vm3, %v1002_v54  ;;  %1256 = vxpose.xlu1.b32.cont [7/16] (narrow) %v1002_v54, 64  ;;  %v7814_v54 = vld [vmem:[%s11033_s3 + $0xd8] sm:$0xff] }
 0x43e   :  { %3578 = vmatpush.bf16.msra.mxu1 %v7814_v54 }
 0x43f   :  { %6959 = vmatmul.msk.bf16.gmra.mxu1 %vm1346_vm3, %v3005_v57  ;;  %v2122_v57 = vld [vmem:[#allocation2 + $0xfc7] sm:$0xff] }
 0x440   :  { %2914 = vmatpush.bf16.msra.mxu3 %v7784_v53 }
 0x442   :  { %v1003_v60 = vpop.f32.mrf.mxu0 }
 0x443   :  { %v1004_v61 = vadd.f32 %v8886_v20, %v1003_v60 }
 0x444   :  { %v2296_v0 = vld [vmem:[#allocation2 + $0xee8] sm:$0xff] }
 0x445   :  { %1979 = vst.msk [vmem:[#allocation2 + $0xef8] sm:$0xff] %vm1346_vm3, %v1004_v61  ;;  %1257 = vxpose.xlu1.b32.cont [8/16] (narrow) %v1004_v61, 64  ;;  %v9121_v1 = vpack.c.bf16 %v2296_v0, %v2295_v63  ;;  %v2574_v61 = vld [vmem:[#allocation2 + $0x4c8] sm:$0xff]  ;;  %v7813_v63 = vld [vmem:[%s11033_s3 + $0xd0] sm:$0xff] }
 0x446   :  { %v2580_v2 = vpack.c.bf16 %v2575_v58, %v2574_v61  ;;  %3579 = vmatpush.bf16.msra.mxu1 %v7813_v63  ;;  %v7796_v63 = vld [vmem:[%s11033_s3 + $0x48] sm:$0xff] }
 0x447   :  { %6820 = vmatmul.msk.bf16.gmra.mxu3 %vm1346_vm3, %v9121_v1 }
 0x44a   :  { %v1006_v6 = vpop.f32.mrf.mxu0  ;;  %3580 = vmatpush.bf16.msra.mxu1 %v7812_v8  ;;  %v2857_v8 = vld [vmem:[#allocation2 + $0xcd8] sm:$0xff] }
 0x44b   :  { %v1007_v9 = vadd.f32 %v8886_v20, %v1006_v6  ;;  %v7782_v6 = vld [vmem:[%s11033_s3 + $0xf8] sm:$0xff] }
 0x44d   :  { %1980 = vst.msk [vmem:[#allocation2 + $0xf88] sm:$0xff] %vm1346_vm3, %v1007_v9  ;;  %1258 = vxpose.xlu1.b32.cont [9/16] (narrow) %v1007_v9, 64 }
 0x44f   :  { %6960 = vmatmul.msk.bf16.gmra.mxu1 %vm1346_vm3, %v3006_v13  ;;  %v2124_v13 = vld [vmem:[#allocation2 + $0xfe7] sm:$0xff] }
 0x452   :  { %v1008_v15 = vpop.f32.mrf.mxu0 }
 0x453   :  { %v1009_v21 = vadd.f32 %v8886_v20, %v1008_v15  ;;  %v2577_v15 = vld [vmem:[#allocation2 + $0x4f8] sm:$0xff] }
 0x454   :  { %v2118_v25 = vld [vmem:[#allocation2 + $0xf87] sm:$0xff] }
 0x455   :  { %1981 = vst.msk [vmem:[#allocation2 + $0xf98] sm:$0xff] %vm1346_vm3, %v1009_v21  ;;  %1259 = vxpose.xlu1.b32.cont [10/16] (narrow) %v1009_v21, 64  ;;  %v2125_v27 = vpack.c.bf16 %v2118_v25, %v2117_v16  ;;  %v2128_v21 = vpack.c.bf16 %v2124_v13, %v2123_v11  ;;  %v2581_v25 = vpack.c.bf16 %v2577_v15, %v2576_v18  ;;  %v2856_v13 = vld [vmem:[#allocation2 + $0xcc8] sm:$0xff]  ;;  %v7795_v15 = vld [vmem:[%s11033_s3 + $0x40] sm:$0xff]  ;;  %v7829_v18 = vld [vmem:[%s11033_s3 + $0x30] sm:$0xff] }
 0x457   :  { %6797 = vmatmul.msk.bf16.vlgmr.msra.gmra.mxu2 %vm1346_vm3, %v2125_v27  ;;  %6877 = vmatmul.msk.bf16.vlgmr.msrb.gmra.mxu3 %vm1346_vm3, %v2578_v29  ;;  %v2477_v27 = vld [vmem:[#allocation2 + $0x98] sm:$0xff] }
 0x45a   :  { %v1011_v33 = vpop.f32.mrf.mxu0 }
 0x45b   :  { %v1012_v34 = vadd.f32 %v8886_v20, %v1011_v33  ;;  %v2852_v33 = vld [vmem:[#allocation2 + $0xc88] sm:$0xff] }
 0x45c   :  { %v9143_v36 = vpop.f32.mrf.mxu1  ;;  %v9150_v42 = vld [vmem:[#allocation2 + $0xf97] sm:$0xff] }
 0x45d   :  { %1982 = vst.msk [vmem:[#allocation2 + $0xfa8] sm:$0xff] %vm1346_vm3, %v1012_v34  ;;  %1260 = vxpose.xlu1.b32.cont [11/16] (narrow) %v1012_v34, 64 }
 0x45f   :  { %7017 = vmatmul.msk.bf16.vlgmr.msrb.gmra.mxu1 %vm1346_vm3, %v2578_v29  ;;  %v2853_v29 = vld [vmem:[#allocation2 + $0xc98] sm:$0xff] }
 0x462   :  { %v1013_v37 = vpop.f32.mrf.mxu0 }
 0x463   :  { %v1014_v39 = vadd.f32 %v8886_v20, %v1013_v37  ;;  %v7767_v20 = vld [vmem:[%s11033_s3 + $0x80] sm:$0xff]  ;;  %v2860_v37 = vpack.c.bf16 %v2853_v29, %v2852_v33 }
 0x464   :  { %v9148_v40 = vpop.f32.mrf.mxu1  ;;  %v2120_v43 = vld [vmem:[#allocation2 + $0xfa7] sm:$0xff]  ;;  %2539 = vmatpush.bf16.msrb.mxu2 %v7767_v20 }
 0x465   :  { %1983 = vst.msk [vmem:[#allocation2 + $0xfb8] sm:$0xff] %vm1346_vm3, %v1014_v39  ;;  %1261 = vxpose.xlu1.b32.cont [12/16] (narrow) %v1014_v39, 64  ;;  %v2126_v46 = vpack.c.bf16 %v2120_v43, %v9150_v42  ;;  %v7827_v33 = vld [vmem:[%s11033_s3 + $0x20] sm:$0xff] }
 0x467   :  { %6798 = vmatmul.msk.bf16.gmra.mxu2 %vm1346_vm3, %v2126_v46  ;;  %6878 = vmatmul.msk.bf16.gmra.mxu3 %vm1346_vm3, %v2579_v48  ;;  %v2479_v46 = vld [vmem:[#allocation2 + $0xb8] sm:$0xff] }
 0x468   :  { %2818 = vmatpush.bf16.msra.mxu2 %v7782_v6  ;;  %v2485_v53 = vpack.c.bf16 %v2479_v46, %v2478_v50  ;;  %v2481_v6 = vld [vmem:[#allocation2 + $0xd8] sm:$0xff]  ;;  %v2858_v50 = vld [vmem:[#allocation2 + $0xce8] sm:$0xff] }
 0x46c   :  { %v9162_v51 = vpop.f32.mrf.mxu1  ;;  %v2121_v55 = vld [vmem:[#allocation2 + $0xfb7] sm:$0xff] }
 0x46d   :  { %1262 = vxpose.xlu1.b32.cont [13/16] (narrow) %v8875_v17, 64  ;;  %v7783_v17 = vld [vmem:[%s11033_s3 + $0x100] sm:$0xff]  ;;  %v2127_v0 = vpack.c.bf16 %v2122_v57, %v2121_v55  ;;  %v7798_v57 = vld [vmem:[%s11033_s3 + $0x58] sm:$0xff] }
 0x46e   :  { %2915 = vmatpush.bf16.msra.mxu3 %v7783_v17  ;;  %v7779_v55 = vld [vmem:[%s11033_s3 + $0xe0] sm:$0xff]  ;;  %v7797_v17 = vld [vmem:[%s11033_s3 + $0x50] sm:$0xff] }
 0x46f   :  { %7018 = vmatmul.msk.bf16.gmra.mxu1 %vm1346_vm3, %v2579_v48  ;;  %v2855_v48 = vld [vmem:[#allocation2 + $0xcb8] sm:$0xff] }
 0x470   :  { %v2861_v54 = vpack.c.bf16 %v2855_v48, %v2854_v52  ;;  %v2482_v48 = vld [vmem:[#allocation2 + $0xe8] sm:$0xff] }
 0x472   :  { %3205 = vmatpush.bf16.msrb.mxu3 %v7798_v57 }
 0x474   :  { %v9175_v60 = vpop.f32.mrf.mxu1 }
 0x475   :  { %1263 = vxpose.xlu1.b32.cont [14/16] (narrow) %v8892_v22, 64  ;;  %v7811_v22 = vld [vmem:[%s11033_s3 + $0xc0] sm:$0xff] }
 0x476   :  { %3581 = vmatpush.bf16.msra.mxu1 %v7811_v22  ;;  %3206 = vmatpush.bf16.msrb.mxu3 %v7797_v17  ;;  %v2480_v22 = vld [vmem:[#allocation2 + $0xc8] sm:$0xff] }
 0x477   :  { %6799 = vmatmul.msk.bf16.gmra.mxu2 %vm1346_vm3, %v2127_v0  ;;  %6879 = vmatmul.msk.bf16.gmra.mxu3 %vm1346_vm3, %v2580_v2  ;;  %v7830_v0 = vld [vmem:[%s11033_s3 + $0x38] sm:$0xff] }
 0x47a   :  { %3908 = vmatpush.bf16.msrb.mxu1 %v7830_v0  ;;  %3207 = vmatpush.bf16.msrb.mxu3 %v7796_v63  ;;  %v2759_v63 = vld [vmem:[#allocation2 + $0x898] sm:$0xff] }
 0x47b   :  { %v3145_v0 = vld [vmem:[#allocation2 + $0xf78] sm:$0xff] }
 0x47c   :  { %v9192_v9 = vpop.f32.mrf.mxu1 }
 0x47d   :  { %1264 = vxpose.xlu1.b32.cont [15/16] (narrow) %v8899_v30, 64  ;;  %v7781_v30 = vld [vmem:[%s11033_s3 + $0xf0] sm:$0xff] }
 0x47e   :  { %2819 = vmatpush.bf16.msra.mxu2 %v7781_v30  ;;  %3208 = vmatpush.bf16.msrb.mxu3 %v7795_v15  ;;  %v7790_v30 = vld [vmem:[%s11033_s3 + $0x18] sm:$0xff] }
 0x47f   :  { %7019 = vmatmul.msk.bf16.gmra.mxu1 %vm1346_vm3, %v2580_v2 }
 0x480   :  { %3909 = vmatpush.bf16.msrb.mxu1 %v7829_v18  ;;  %v7788_v18 = vld [vmem:[%s11033_s3 + $0x8] sm:$0xff] }
 0x482   :  { %2820 = vmatpush.bf16.msra.mxu2 %v7780_v38  ;;  %v2859_v38 = vld [vmem:[#allocation2 + $0xcf8] sm:$0xff] }
 0x484   :  { %v9199_v16 = vpop.f32.mrf.mxu1 }
 0x485   :  { %1265 = vxpose.xlu1.b32.end [16/16] (narrow) %v8911_v35, 64  ;;  %v2476_v35 = vld [vmem:[#allocation2 + $0x88] sm:$0xff] }
 0x486   :  { %v2484_v34 = vpack.c.bf16 %v2477_v27, %v2476_v35  ;;  %2821 = vmatpush.bf16.msra.mxu2 %v7779_v55  ;;  %v7828_v27 = vld [vmem:[%s11033_s3 + $0x28] sm:$0xff] }
 0x487   :  { %6800 = vmatmul.msk.bf16.gmra.mxu2 %vm1346_vm3, %v2128_v21  ;;  %6880 = vmatmul.msk.bf16.gmra.mxu3 %vm1346_vm3, %v2581_v25  ;;  %v2486_v21 = vpack.c.bf16 %v2481_v6, %v2480_v22  ;;  %v3146_v6 = vld [vmem:[#allocation2 + $0xf88] sm:$0xff] }
 0x488   :  { %3910 = vmatpush.bf16.msrb.mxu1 %v7828_v27  ;;  %v2758_v22 = vld [vmem:[#allocation2 + $0x888] sm:$0xff]  ;;  %v3153_v15 = vpack.c.bf16 %v3146_v6, %v3145_v0 }
 0x48c   :  { %v9207_v26 = vpop.f32.mrf.mxu1  ;;  %3911 = vmatpush.bf16.msrb.mxu1 %v7827_v33 }
 0x48f   :  { %7020 = vmatmul.msk.bf16.gmra.mxu1 %vm1346_vm3, %v2581_v25  ;;  %v2862_v25 = vpack.c.bf16 %v2857_v8, %v2856_v13  ;;  %v2766_v13 = vpack.c.bf16 %v2759_v63, %v2758_v22  ;;  %v3147_v63 = vld [vmem:[#allocation2 + $0xf98] sm:$0xff] }
 0x494   :  { %v9210_v32 = vpop.f32.mrf.mxu1 }
 0x497   :  { %6857 = vmatmul.msk.bf16.vlgmr.msrb.gmra.mxu2 %vm1346_vm3, %v2484_v34  ;;  %6937 = vmatmul.msk.bf16.vlgmr.msra.gmra.mxu3 %vm1346_vm3, %v2860_v37 }
 0x498   :  { %3120 = vmatpush.bf16.msrb.mxu2 %v7790_v30 }
 0x49a   :  { %v9217_v39 = vpop.f32.mrf.mxu3 }
 0x49c   :  { %v9219_v43 = vpop.f32.mrf.mxu1 }
 0x49f   :  { %7077 = vmatmul.msk.bf16.vlgmr.msra.gmra.mxu1 %vm1346_vm3, %v2860_v37  ;;  %v2483_v37 = vld [vmem:[#allocation2 + $0xf8] sm:$0xff] }
 0x4a0   :  { %v2487_v52 = vpack.c.bf16 %v2483_v37, %v2482_v48  ;;  %v2761_v48 = vld [vmem:[#allocation2 + $0x8b8] sm:$0xff] }
 0x4a2   :  { %v9222_v45 = vpop.f32.mrf.mxu3 }
 0x4a4   :  { %v9224_v20 = vpop.f32.mrf.mxu1 }
 0x4a7   :  { %6858 = vmatmul.msk.bf16.gmra.mxu2 %vm1346_vm3, %v2485_v53  ;;  %6938 = vmatmul.msk.bf16.gmra.mxu3 %vm1346_vm3, %v2861_v54  ;;  %v2863_v53 = vpack.c.bf16 %v2859_v38, %v2858_v50  ;;  %v3148_v50 = vld [vmem:[#allocation2 + $0xfa8] sm:$0xff] }
 0x4a8   :  { %v3154_v6 = vpack.c.bf16 %v3148_v50, %v3147_v63  ;;  %v3149_v50 = vld [vmem:[#allocation2 + $0xfb8] sm:$0xff] }
 0x4aa   :  { %v9234_v58 = vpop.f32.mrf.mxu3 }
 0x4ac   :  { %v9236_v61 = vpop.f32.mrf.mxu1 }
 0x4af   :  { %7078 = vmatmul.msk.bf16.gmra.mxu1 %vm1346_vm3, %v2861_v54  ;;  %v7789_v54 = vld [vmem:[%s11033_s3 + $0x10] sm:$0xff] }
 0x4b0   :  { %3121 = vmatpush.bf16.msrb.mxu2 %v7789_v54  ;;  %v2760_v54 = vld [vmem:[#allocation2 + $0x8a8] sm:$0xff] }
 0x4b1   :  { %v2767_v0 = vpack.c.bf16 %v2761_v48, %v2760_v54 }
 0x4b2   :  { %v9248_v2 = vpop.f32.mrf.mxu3 }
 0x4b4   :  { %v9250_v11 = vpop.f32.mrf.mxu1  ;;  %3122 = vmatpush.bf16.msrb.mxu2 %v7788_v18 }
 0x4b7   :  { %6859 = vmatmul.msk.bf16.gmra.mxu2 %vm1346_vm3, %v2486_v21  ;;  %6939 = vmatmul.msk.bf16.gmra.mxu3 %vm1346_vm3, %v2862_v25 }
 0x4ba   :  { %v9266_v29 = vpop.f32.mrf.mxu3 }
 0x4bc   :  { %v9268_v35 = vpop.f32.mrf.mxu1 }
 0x4bf   :  { %7079 = vmatmul.msk.bf16.gmra.mxu1 %vm1346_vm3, %v2862_v25 }
 0x4c2   :  { %v9274_v34 = vpop.f32.mrf.mxu3 }
 0x4c4   :  { %v9276_v46 = vpop.f32.mrf.mxu1 }
 0x4c7   :  { %6860 = vmatmul.msk.bf16.gmra.mxu2 %vm1346_vm3, %v2487_v52  ;;  %6940 = vmatmul.msk.bf16.gmra.mxu3 %vm1346_vm3, %v2863_v53 }
 0x4ca   :  { %v9283_v55 = vpop.f32.mrf.mxu3 }
 0x4cc   :  { %v9285_v57 = vpop.f32.mrf.mxu1 }
 0x4cf   :  { %7080 = vmatmul.msk.bf16.gmra.mxu1 %vm1346_vm3, %v2863_v53 }
 0x4d2   :  { %v9288_v17 = vpop.f32.mrf.mxu3 }
 0x4d4   :  { %v9290_v8 = vpop.f32.mrf.mxu1 }
 0x4d7   :  { %6917 = vmatmul.msk.bf16.vlgmr.msra.gmra.mxu2 %vm1346_vm3, %v2766_v13  ;;  %6997 = vmatmul.msk.bf16.vlgmr.msrb.gmra.mxu3 %vm1346_vm3, %v3153_v15 }
 0x4da   :  { %v2268_v21 = vpop.f32.mrf.mxu2  ;;  %v9297_v25 = vpop.f32.mrf.mxu3 }
 0x4db   :  { %v2269_v30 = vadd.f32 %v2268_v21, %v8969_v7  ;;  %v7809_v21 = vld [vmem:[%s11033_s3 + $0xb0] sm:$0xff] }
 0x4dc   :  { %v9300_v27 = vpop.f32.mrf.mxu1 }
 0x4dd   :  { %v9303_v33 = vadd.f32 %v9217_v39, %v2269_v30  ;;  %v7787_v39 = vld [vmem:[%s11033_s3] sm:$0xff]  ;;  %v7808_v30 = vld [vmem:[%s11033_s3 + $0xa8] sm:$0xff] }
 0x4de   :  { %3123 = vmatpush.bf16.msrb.mxu2 %v7787_v39 }
 0x4df   :  { %7145 = vmatmul.msk.bf16.vlgmr.msrb.gmra.mxu1 %vm1346_vm3, %v2766_v13 }
 0x4e2   :  { %v2270_v37 = vpop.f32.mrf.mxu2  ;;  %v9306_v38 = vpop.f32.mrf.mxu3 }
 0x4e3   :  { %v2271_v52 = vadd.f32 %v2270_v37, %v8973_v10  ;;  %v7810_v10 = vld [vmem:[%s11033_s3 + $0xb8] sm:$0xff] }
 0x4e4   :  { %v9309_v53 = vpop.f32.mrf.mxu1  ;;  %3485 = vmatpush.bf16.msra.mxu3 %v7810_v10 }
 0x4e5   :  { %v9312_v7 = vadd.f32 %v9222_v45, %v2271_v52  ;;  %v3150_v52 = vld [vmem:[#allocation2 + $0xfc8] sm:$0xff] }
 0x4e6   :  { %v3155_v10 = vpack.c.bf16 %v3150_v52, %v3149_v50  ;;  %v7835_v50 = vld [vmem:[%s11033_s3 + $0x60] sm:$0xff] }
 0x4e7   :  { %6918 = vmatmul.msk.bf16.gmra.mxu2 %vm1346_vm3, %v2767_v0  ;;  %6998 = vmatmul.msk.bf16.gmra.mxu3 %vm1346_vm3, %v3154_v6 }
 0x4e8   :  { %3486 = vmatpush.bf16.msra.mxu3 %v7809_v21 }
 0x4ea   :  { %v2273_v22 = vpop.f32.mrf.mxu2  ;;  %v9322_v13 = vpop.f32.mrf.mxu3 }
 0x4eb   :  { %v2274_v45 = vadd.f32 %v2273_v22, %v8981_v14  ;;  %v7838_v14 = vld [vmem:[%s11033_s3 + $0x78] sm:$0xff]  ;;  %v7807_v22 = vld [vmem:[%s11033_s3 + $0xa0] sm:$0xff] }
 0x4ec   :  { %v9325_v15 = vpop.f32.mrf.mxu1  ;;  %4152 = vmatpush.bf16.msra.mxu1 %v7838_v14  ;;  %3487 = vmatpush.bf16.msra.mxu3 %v7808_v30 }
 0x4ed   :  { %v9328_v18 = vadd.f32 %v9234_v58, %v2274_v45  ;;  %v2763_v58 = vld [vmem:[#allocation2 + $0x8d8] sm:$0xff]  ;;  %v7837_v45 = vld [vmem:[%s11033_s3 + $0x70] sm:$0xff] }
 0x4ef   :  { %7146 = vmatmul.msk.bf16.gmra.mxu1 %vm1346_vm3, %v2767_v0  ;;  %v2762_v0 = vld [vmem:[#allocation2 + $0x8c8] sm:$0xff] }
 0x4f0   :  { %v2768_v39 = vpack.c.bf16 %v2763_v58, %v2762_v0  ;;  %3488 = vmatpush.bf16.msra.mxu3 %v7807_v22  ;;  %4153 = vmatpush.bf16.msra.mxu1 %v7837_v45  ;;  %v2765_v0 = vld [vmem:[#allocation2 + $0x8f8] sm:$0xff]  ;;  %v3152_v22 = vld [vmem:[#allocation2 + $0xfe8] sm:$0xff] }
 0x4f2   :  { %v2275_v37 = vpop.f32.mrf.mxu2  ;;  %v9340_v48 = vpop.f32.mrf.mxu3 }
 0x4f3   :  { %v2276_v54 = vadd.f32 %v2275_v37, %v8989_v24  ;;  %v7806_v24 = vld [vmem:[%s11033_s3 + $0x98] sm:$0xff] }
 0x4f4   :  { %v9343_v63 = vpop.f32.mrf.mxu1  ;;  %3392 = vmatpush.bf16.msra.mxu2 %v7806_v24  ;;  %v2764_v24 = vld [vmem:[#allocation2 + $0x8e8] sm:$0xff] }
 0x4f5   :  { %v9346_v6 = vadd.f32 %v9248_v2, %v2276_v54  ;;  %v7836_v2 = vld [vmem:[%s11033_s3 + $0x68] sm:$0xff] }
 0x4f6   :  { %4154 = vmatpush.bf16.msra.mxu1 %v7836_v2  ;;  %v2769_v2 = vpack.c.bf16 %v2765_v0, %v2764_v24 }
 0x4f7   :  { %6919 = vmatmul.msk.bf16.gmra.mxu2 %vm1346_vm3, %v2768_v39  ;;  %6999 = vmatmul.msk.bf16.gmra.mxu3 %vm1346_vm3, %v3155_v10  ;;  %v3151_v10 = vld [vmem:[#allocation2 + $0xfd8] sm:$0xff] }
 0x4fa   :  { %v2278_v21 = vpop.f32.mrf.mxu2  ;;  %v9362_v30 = vpop.f32.mrf.mxu3  ;;  %4155 = vmatpush.bf16.msra.mxu1 %v7835_v50 }
 0x4fb   :  { %v2279_v14 = vadd.f32 %v2278_v21, %v8999_v31  ;;  %v3156_v21 = vpack.c.bf16 %v3152_v22, %v3151_v10  ;;  %v3426_v22 = vld [vmem:[#allocation2 + $0x598] sm:$0xff] }
 0x4fc   :  { %v9365_v37 = vpop.f32.mrf.mxu1 }
 0x4fd   :  { %v9368_v58 = vadd.f32 %v9266_v29, %v2279_v14 }
 0x4ff   :  { %7147 = vmatmul.msk.bf16.gmra.mxu1 %vm1346_vm3, %v2768_v39  ;;  %v7805_v39 = vld [vmem:[%s11033_s3 + $0x90] sm:$0xff] }
 0x500   :  { %3393 = vmatpush.bf16.msra.mxu2 %v7805_v39 }
 0x502   :  { %v2280_v52 = vpop.f32.mrf.mxu2  ;;  %v9374_v54 = vpop.f32.mrf.mxu3 }
 0x503   :  { %v2281_v31 = vadd.f32 %v2280_v52, %v9013_v41 }
 0x504   :  { %v9377_v45 = vpop.f32.mrf.mxu1 }
 0x505   :  { %v9380_v29 = vadd.f32 %v9274_v34, %v2281_v31 }
 0x507   :  { %6920 = vmatmul.msk.bf16.gmra.mxu2 %vm1346_vm3, %v2769_v2  ;;  %7000 = vmatmul.msk.bf16.gmra.mxu3 %vm1346_vm3, %v3156_v21  ;;  %v3425_v21 = vld [vmem:[#allocation2 + $0x588] sm:$0xff] }
 0x50a   :  { %v2283_v14 = vpop.f32.mrf.mxu2  ;;  %v9387_v50 = vpop.f32.mrf.mxu3 }
 0x50b   :  { %v2284_v41 = vadd.f32 %v2283_v14, %v9026_v47  ;;  %v3433_v47 = vpack.c.bf16 %v3426_v22, %v3425_v21  ;;  %v4092_v22 = vld [vmem:[#allocation2 + $0x787] sm:$0xff]  ;;  %v2469_v21 = vadd.f32 %v9049_v4, %v9312_v7  ;;  %v2470_v7 = vadd.f32 %v9054_v12, %v9328_v18  ;;  %v7850_v18 = vld [vmem:[%s11033_s3 + $0xd8] sm:$0xff] }
 0x50c   :  { %v9390_v52 = vpop.f32.mrf.mxu1  ;;  %v7803_v4 = vld [vmem:[%s11033_s3 + $0x80] sm:$0xff]  ;;  %v7820_v12 = vld [vmem:[%s11033_s3 + $0x108] sm:$0xff]  ;;  %4434 = vmatpush.bf16.msrb.mxu1 %v7850_v18 }
 0x50d   :  { %v9393_v34 = vadd.f32 %v9283_v55, %v2284_v41  ;;  %v7804_v55 = vld [vmem:[%s11033_s3 + $0x88] sm:$0xff]  ;;  %v4093_v41 = vld [vmem:[#allocation2 + $0x797] sm:$0xff] }
 0x50e   :  { %3394 = vmatpush.bf16.msra.mxu2 %v7804_v55  ;;  %v4096_v18 = vld [vmem:[#allocation2 + $0x7c7] sm:$0xff] }
 0x50f   :  { %7148 = vmatmul.msk.bf16.gmra.mxu1 %vm1346_vm3, %v2769_v2  ;;  %v2468_v2 = vadd.f32 %v9040_v62, %v9303_v33  ;;  %v3428_v33 = vld [vmem:[#allocation2 + $0x5b8] sm:$0xff] }
 0x512   :  { %v2285_v0 = vpop.f32.mrf.mxu2  ;;  %v9396_v10 = vpop.f32.mrf.mxu3  ;;  %3395 = vmatpush.bf16.msra.mxu2 %v7803_v4 }
 0x513   :  { %v2286_v31 = vadd.f32 %v2285_v0, %v9035_v56 }
 0x514   :  { %v9399_v24 = vpop.f32.mrf.mxu1 }
 0x515   :  { %11040 = vst [vmem:[#allocation4_spill] sm:$0xff] %v9399_v24  ;;  %v9402_v39 = vadd.f32 %v9288_v17, %v2286_v31  ;;  %v4100_v31 = vpack.c.bf16 %v4093_v41, %v4092_v22  ;;  %v4094_v22 = vld [vmem:[#allocation2 + $0x7a7] sm:$0xff] }
 0x517   :  { %6977 = vmatmul.msk.bf16.vlgmr.msrb.gmra.mxu2 %vm1346_vm3, %v9045_v3  ;;  %7057 = vmatmul.msk.bf16.vlgmr.msra.gmra.mxu3 %vm1346_vm3, %v3433_v47 }
 0x51a   :  { %v2541_v56 = vpop.f32.mrf.mxu2  ;;  %v9412_v14 = vpop.f32.mrf.mxu3 }
 0x51b   :  { %v2561_v17 = vadd.f32 %v2541_v56, %v2468_v2  ;;  %v3427_v2 = vld [vmem:[#allocation2 + $0x5a8] sm:$0xff] }
 0x51c   :  { %v9414_v0 = vpop.f32.mrf.mxu1 }
 0x51d   :  { %11041 = vst [vmem:[#allocation5_spill] sm:$0xff] %v9414_v0  ;;  %v9417_v3 = vadd.f32 %v9297_v25, %v2561_v17  ;;  %v3434_v0 = vpack.c.bf16 %v3428_v33, %v3427_v2  ;;  %v7822_v25 = vld [vmem:[%s11033_s3 + $0x118] sm:$0xff] }
 0x51e   :  { %3765 = vmatpush.bf16.msrb.mxu3 %v7822_v25  ;;  %v4095_v17 = vld [vmem:[#allocation2 + $0x7b7] sm:$0xff]  ;;  %v3429_v25 = vld [vmem:[#allocation2 + $0x5c8] sm:$0xff] }
 0x51f   :  { %7205 = vmatmul.msk.bf16.vlgmr.msra.gmra.mxu1 %vm1346_vm3, %v4100_v31  ;;  %v3430_v2 = vld [vmem:[#allocation2 + $0x5d8] sm:$0xff] }
 0x522   :  { %v2543_v47 = vpop.f32.mrf.mxu2  ;;  %v9422_v62 = vpop.f32.mrf.mxu3 }
 0x523   :  { %v2562_v55 = vadd.f32 %v2543_v47, %v2469_v21  ;;  %v4101_v21 = vpack.c.bf16 %v4095_v17, %v4094_v22  ;;  %v7821_v47 = vld [vmem:[%s11033_s3 + $0x110] sm:$0xff]  ;;  %v7819_v17 = vld [vmem:[%s11033_s3 + $0x100] sm:$0xff]  ;;  %v2472_v22 = vadd.f32 %v9101_v49, %v9368_v58 }
 0x524   :  { %v9424_v24 = vpop.f32.mrf.mxu1  ;;  %3766 = vmatpush.bf16.msrb.mxu3 %v7821_v47 }
 0x525   :  { %v9427_v56 = vadd.f32 %v9306_v38, %v2562_v55 }
 0x527   :  { %6978 = vmatmul.msk.bf16.gmra.mxu2 %vm1346_vm3, %v9058_v19  ;;  %7058 = vmatmul.msk.bf16.gmra.mxu3 %vm1346_vm3, %v3434_v0 }
 0x528   :  { %3767 = vmatpush.bf16.msrb.mxu3 %v7820_v12 }
 0x52a   :  { %v2546_v38 = vpop.f32.mrf.mxu2  ;;  %v9440_v41 = vpop.f32.mrf.mxu3 }
 0x52b   :  { %v2563_v19 = vadd.f32 %v2546_v38, %v2470_v7  ;;  %v3435_v38 = vpack.c.bf16 %v3430_v2, %v3429_v25  ;;  %v3432_v25 = vld [vmem:[#allocation2 + $0x5f8] sm:$0xff] }
 0x52c   :  { %v9445_v31 = vpop.f32.mrf.mxu1  ;;  %3768 = vmatpush.bf16.msrb.mxu3 %v7819_v17 }
 0x52d   :  { %v9443_v0 = vadd.f32 %v9322_v13, %v2563_v19  ;;  %v2471_v13 = vadd.f32 %v9069_v28, %v9346_v6  ;;  %v7849_v28 = vld [vmem:[%s11033_s3 + $0xd0] sm:$0xff]  ;;  %v7848_v19 = vld [vmem:[%s11033_s3 + $0xc8] sm:$0xff] }
 0x52e   :  { %4435 = vmatpush.bf16.msrb.mxu1 %v7849_v28  ;;  %v3431_v28 = vld [vmem:[#allocation2 + $0x5e8] sm:$0xff] }
 0x52f   :  { %7206 = vmatmul.msk.bf16.gmra.mxu1 %vm1346_vm3, %v4101_v21 }
 0x532   :  { %v2548_v33 = vpop.f32.mrf.mxu2  ;;  %v9459_v55 = vpop.f32.mrf.mxu3  ;;  %4436 = vmatpush.bf16.msrb.mxu1 %v7848_v19 }
 0x533   :  { %v2564_v4 = vadd.f32 %v2548_v33, %v2471_v13 }
 0x534   :  { %v9470_v6 = vpop.f32.mrf.mxu1 }
 0x535   :  { %v9462_v7 = vadd.f32 %v9340_v48, %v2564_v4  ;;  %v7818_v48 = vld [vmem:[%s11033_s3 + $0xf8] sm:$0xff]  ;;  %v2473_v4 = vadd.f32 %v9117_v59, %v9380_v29  ;;  %v2474_v59 = vadd.f32 %v9128_v5, %v9393_v34  ;;  %v2475_v5 = vadd.f32 %v9134_v23, %v9402_v39 }
 0x536   :  { %3672 = vmatpush.bf16.msrb.mxu2 %v7818_v48  ;;  %v3436_v48 = vpack.c.bf16 %v3432_v25, %v3431_v28  ;;  %v2749_v23 = vadd.f32 %v9143_v36, %v9417_v3 }
 0x537   :  { %6979 = vmatmul.msk.bf16.gmra.mxu2 %vm1346_vm3, %v9090_v44  ;;  %7059 = vmatmul.msk.bf16.gmra.mxu3 %vm1346_vm3, %v3435_v38  ;;  %v4097_v44 = vld [vmem:[#allocation2 + $0x7d7] sm:$0xff]  ;;  %v7847_v38 = vld [vmem:[%s11033_s3 + $0xc0] sm:$0xff] }
 0x538   :  { %v4102_v33 = vpack.c.bf16 %v4097_v44, %v4096_v18  ;;  %4437 = vmatpush.bf16.msrb.mxu1 %v7847_v38  ;;  %v3332_v38 = vld [vmem:[#allocation2 + $0x188] sm:$0xff] }
 0x53a   :  { %v2551_v21 = vpop.f32.mrf.mxu2  ;;  %v9483_v47 = vpop.f32.mrf.mxu3 }
 0x53b   :  { %v2565_v12 = vadd.f32 %v2551_v21, %v2472_v22  ;;  %v4099_v22 = vld [vmem:[#allocation2 + $0x7f7] sm:$0xff] }
 0x53c   :  { %v9489_v2 = vpop.f32.mrf.mxu1  ;;  %v7817_v21 = vld [vmem:[%s11033_s3 + $0xf0] sm:$0xff] }
 0x53d   :  { %v9486_v13 = vadd.f32 %v9362_v30, %v2565_v12  ;;  %v4098_v12 = vld [vmem:[#allocation2 + $0x7e7] sm:$0xff]  ;;  %3673 = vmatpush.bf16.msrb.mxu2 %v7817_v21 }
 0x53e   :  { %v4103_v18 = vpack.c.bf16 %v4099_v22, %v4098_v12  ;;  %v7816_v22 = vld [vmem:[%s11033_s3 + $0xe8] sm:$0xff] }
 0x53f   :  { %7207 = vmatmul.msk.bf16.gmra.mxu1 %vm1346_vm3, %v4102_v33 }
 0x541   :  { %3674 = vmatpush.bf16.msrb.mxu2 %v7816_v22  ;;  %v4377_v22 = vld [vmem:[#allocation2 + $0xfb7] sm:$0xff] }
 0x542   :  { %v2553_v49 = vpop.f32.mrf.mxu2  ;;  %v9493_v58 = vpop.f32.mrf.mxu3 }
 0x543   :  { %v2566_v17 = vadd.f32 %v2553_v49, %v2473_v4  ;;  %v3333_v4 = vld [vmem:[#allocation2 + $0x198] sm:$0xff] }
 0x544   :  { %v9511_v44 = vpop.f32.mrf.mxu1  ;;  %v3706_v49 = vld [vmem:[#allocation2 + $0xd98] sm:$0xff] }
 0x545   :  { %v9499_v30 = vadd.f32 %v9374_v54, %v2566_v17  ;;  %v3705_v17 = vld [vmem:[#allocation2 + $0xd88] sm:$0xff] }
 0x547   :  { %6980 = vmatmul.msk.bf16.gmra.mxu2 %vm1346_vm3, %v9121_v1  ;;  %7060 = vmatmul.msk.bf16.gmra.mxu3 %vm1346_vm3, %v3436_v48 }
 0x54a   :  { %v2556_v29 = vpop.f32.mrf.mxu2  ;;  %v9506_v19 = vpop.f32.mrf.mxu3 }
 0x54b   :  { %v2567_v54 = vadd.f32 %v2556_v29, %v2474_v59  ;;  %v3713_v59 = vpack.c.bf16 %v3706_v49, %v3705_v17 }
 0x54c   :  { %v9521_v28 = vpop.f32.mrf.mxu1 }
 0x54d   :  { %v9514_v1 = vadd.f32 %v9387_v50, %v2567_v54  ;;  %v3340_v50 = vpack.c.bf16 %v3333_v4, %v3332_v38  ;;  %v4374_v54 = vld [vmem:[#allocation2 + $0xf87] sm:$0xff]  ;;  %v3708_v4 = vld [vmem:[#allocation2 + $0xdb8] sm:$0xff] }
 0x54e   :  { %v3707_v38 = vld [vmem:[#allocation2 + $0xda8] sm:$0xff] }
 0x54f   :  { %7208 = vmatmul.msk.bf16.gmra.mxu1 %vm1346_vm3, %v4103_v18  ;;  %v4382_v18 = vpack.c.bf16 %v9150_v42, %v4374_v54  ;;  %v3335_v42 = vld [vmem:[#allocation2 + $0x1b8] sm:$0xff] }
 0x550   :  { %v7834_v54 = vld [vmem:[%s11033_s3 + $0x58] sm:$0xff] }
 0x551   :  { %4058 = vmatpush.bf16.msra.mxu3 %v7834_v54  ;;  %v4379_v54 = vld [vmem:[#allocation2 + $0xfd7] sm:$0xff] }
 0x552   :  { %v2558_v34 = vpop.f32.mrf.mxu2  ;;  %v9519_v33 = vpop.f32.mrf.mxu3 }
 0x553   :  { %v2568_v25 = vadd.f32 %v2558_v34, %v2475_v5  ;;  %v2750_v5 = vadd.f32 %v9148_v40, %v9427_v56  ;;  %v2751_v56 = vadd.f32 %v9162_v51, %v9443_v0 }
 0x554   :  { %v9542_v36 = vpop.f32.mrf.mxu1 }
 0x555   :  { %v9524_v48 = vadd.f32 %v9396_v10, %v2568_v25  ;;  %v9538_v10 = vld [vmem:[%s11034_s4] ss:$0 sm:$0xff]  ;;  %v3334_v25 = vld [vmem:[#allocation2 + $0x1a8] sm:$0xff] }
 0x557   :  { %7037 = vmatmul.msk.bf16.vlgmr.msra.gmra.mxu2 %vm1346_vm3, %v3340_v50  ;;  %7117 = vmatmul.msk.bf16.vlgmr.msrb.gmra.mxu3 %vm1346_vm3, %v3713_v59  ;;  %v3341_v50 = vpack.c.bf16 %v3335_v42, %v3334_v25  ;;  %v3714_v59 = vpack.c.bf16 %v3708_v4, %v3707_v38  ;;  %v7866_v25 = vld [vmem:[%s11033_s3 + $0x38] sm:$0xff] }
 0x558   :  { %4765 = vmatpush.bf16.msra.mxu1 %v7866_v25 }
 0x55a   :  { %v2823_v39 = vpop.f32.mrf.mxu2  ;;  %v9530_v29 = vpop.f32.mrf.mxu3 }
 0x55b   :  { %v2843_v21 = vadd.f32 %v2823_v39, %v2749_v23 }
 0x55c   :  { %v9559_v40 = vpop.f32.mrf.mxu1 }
 0x55d   :  { %v2937_v12 = vadd.f32 %v9412_v14, %v2843_v21  ;;  %v7815_v21 = vld [vmem:[%s11033_s3 + $0xe0] sm:$0xff] }
 0x55e   :  { %3675 = vmatpush.bf16.msrb.mxu2 %v7815_v21  ;;  %v4378_v21 = vld [vmem:[#allocation2 + $0xfc7] sm:$0xff] }
 0x55f   :  { %v2949_v3 = vadd.f32 %v9538_v10, %v2937_v12  ;;  %7265 = vmatmul.msk.bf16.vlgmr.msrb.gmra.mxu1 %vm1346_vm3, %v4382_v18  ;;  %v4376_v18 = vld [vmem:[#allocation2 + $0xfa7] sm:$0xff] }
 0x560   :  { %v4383_v0 = vpack.c.bf16 %v4377_v22, %v4376_v18  ;;  %v2753_v22 = vadd.f32 %v9192_v9, %v9486_v13  ;;  %v7831_v18 = vld [vmem:[%s11033_s3 + $0x40] sm:$0xff]  ;;  %v7864_v13 = vld [vmem:[%s11033_s3 + $0x28] sm:$0xff] }
 0x561   :  { %2957 = vst.msk [vmem:[%s11035_s8] sm:$0xff] %vm1346_vm3, %v2949_v3 }
 0x562   :  { %2966 = vst.msk [vmem:[#allocation3 + $0x88] sm:$0xff] %vm1346_vm3, %v2949_v3  ;;  %v2825_v34 = vpop.f32.mrf.mxu2  ;;  %v9553_v14 = vpop.f32.mrf.mxu3 }
 0x563   :  { %v2844_v49 = vadd.f32 %v2825_v34, %v2750_v5  ;;  %v2752_v5 = vadd.f32 %v9175_v60, %v9462_v7  ;;  %v3337_v34 = vld [vmem:[#allocation2 + $0x1d8] sm:$0xff]  ;;  %v3709_v60 = vld [vmem:[#allocation2 + $0xdc8] sm:$0xff] }
 0x564   :  { %v9594_v38 = vpop.f32.mrf.mxu1  ;;  %v7832_v7 = vld [vmem:[%s11033_s3 + $0x48] sm:$0xff] }
 0x565   :  { %v2938_v17 = vadd.f32 %v9422_v62, %v2844_v49  ;;  %v7833_v49 = vld [vmem:[%s11033_s3 + $0x50] sm:$0xff] }
 0x566   :  { %4059 = vmatpush.bf16.msra.mxu3 %v7833_v49  ;;  %v2754_v49 = vadd.f32 %v9199_v16, %v9499_v30  ;;  %v7825_v16 = vld [vmem:[%s11033_s3 + $0x10] sm:$0xff] }
 0x567   :  { %v2950_v23 = vadd.f32 %v9538_v10, %v2938_v17  ;;  %7038 = vmatmul.msk.bf16.gmra.mxu2 %vm1346_vm3, %v3341_v50  ;;  %7118 = vmatmul.msk.bf16.gmra.mxu3 %vm1346_vm3, %v3714_v59  ;;  %v3336_v50 = vld [vmem:[#allocation2 + $0x1c8] sm:$0xff] }
 0x569   :  { %2958 = vst.msk [vmem:[%s11035_s8 + $0x8] sm:$0xff] %vm1346_vm3, %v2950_v23 }
 0x56a   :  { %2967 = vst.msk [vmem:[#allocation3 + $0x98] sm:$0xff] %vm1346_vm3, %v2950_v23  ;;  %v2828_v62 = vpop.f32.mrf.mxu2  ;;  %v9568_v39 = vpop.f32.mrf.mxu3  ;;  %v3342_v23 = vpack.c.bf16 %v3337_v34, %v3336_v50  ;;  %4060 = vmatpush.bf16.msra.mxu3 %v7832_v7  ;;  %v4384_v34 = vpack.c.bf16 %v4379_v54, %v4378_v21  ;;  %v3712_v50 = vld [vmem:[#allocation2 + $0xdf8] sm:$0xff]  ;;  %v3338_v7 = vld [vmem:[#allocation2 + $0x1e8] sm:$0xff] }
 0x56b   :  { %v2845_v12 = vadd.f32 %v2828_v62, %v2751_v56 }
 0x56d   :  { %v2939_v51 = vadd.f32 %v9440_v41, %v2845_v12  ;;  %v3710_v41 = vld [vmem:[#allocation2 + $0xdd8] sm:$0xff] }
 0x56e   :  { %v3715_v56 = vpack.c.bf16 %v3710_v41, %v3709_v60  ;;  %4061 = vmatpush.bf16.msra.mxu3 %v7831_v18  ;;  %v7863_v41 = vld [vmem:[%s11033_s3 + $0x20] sm:$0xff]  ;;  %v4381_v18 = vld [vmem:[#allocation2 + $0xff7] sm:$0xff] }
 0x56f   :  { %v2951_v3 = vadd.f32 %v9538_v10, %v2939_v51  ;;  %7266 = vmatmul.msk.bf16.gmra.mxu1 %vm1346_vm3, %v4383_v0  ;;  %v7865_v51 = vld [vmem:[%s11033_s3 + $0x30] sm:$0xff]  ;;  %v7826_v0 = vld [vmem:[%s11033_s3 + $0x18] sm:$0xff] }
 0x570   :  { %4766 = vmatpush.bf16.msra.mxu1 %v7865_v51  ;;  %3973 = vmatpush.bf16.msra.mxu2 %v7826_v0 }
 0x571   :  { %2959 = vst.msk [vmem:[%s11035_s8 + $0x10] sm:$0xff] %vm1346_vm3, %v2951_v3 }
 0x572   :  { %2968 = vst.msk [vmem:[#allocation3 + $0xa8] sm:$0xff] %vm1346_vm3, %v2951_v3  ;;  %v2830_v42 = vpop.f32.mrf.mxu2  ;;  %v9586_v4 = vpop.f32.mrf.mxu3 }
 0x573   :  { %v2846_v17 = vadd.f32 %v2830_v42, %v2752_v5  ;;  %v9624_v3 = vpop.f32.mrf.mxu1 }
 0x574   :  { %4767 = vmatpush.bf16.msra.mxu1 %v7864_v13  ;;  %3974 = vmatpush.bf16.msra.mxu2 %v7825_v16  ;;  %v4001_v16 = vld [vmem:[#allocation2 + $0xcb8] sm:$0xff] }
 0x575   :  { %v2940_v59 = vadd.f32 %v9459_v55, %v2846_v17  ;;  %v3339_v17 = vld [vmem:[#allocation2 + $0x1f8] sm:$0xff] }
 0x577   :  { %v2952_v62 = vadd.f32 %v9538_v10, %v2940_v59  ;;  %7039 = vmatmul.msk.bf16.gmra.mxu2 %vm1346_vm3, %v3342_v23  ;;  %7119 = vmatmul.msk.bf16.gmra.mxu3 %vm1346_vm3, %v3715_v56  ;;  %v3711_v59 = vld [vmem:[#allocation2 + $0xde8] sm:$0xff]  ;;  %v3343_v56 = vpack.c.bf16 %v3339_v17, %v3338_v7 }
 0x578   :  { %4768 = vmatpush.bf16.msra.mxu1 %v7863_v41 }
 0x579   :  { %2960 = vst.msk [vmem:[%s11035_s8 + $0x18] sm:$0xff] %vm1346_vm3, %v2952_v62 }
 0x57a   :  { %2969 = vst.msk [vmem:[#allocation3 + $0xb8] sm:$0xff] %vm1346_vm3, %v2952_v62  ;;  %v2833_v55 = vpop.f32.mrf.mxu2  ;;  %v9610_v12 = vpop.f32.mrf.mxu3  ;;  %v3716_v62 = vpack.c.bf16 %v3712_v50, %v3711_v59 }
 0x57b   :  { %v2847_v9 = vadd.f32 %v2833_v55, %v2753_v22  ;;  %v9642_v22 = vpop.f32.mrf.mxu1  ;;  %v4380_v55 = vld [vmem:[#allocation2 + $0xfe7] sm:$0xff] }
 0x57d   :  { %v2941_v5 = vadd.f32 %v9483_v47, %v2847_v9  ;;  %v4385_v9 = vpack.c.bf16 %v4381_v18, %v4380_v55  ;;  %v4000_v55 = vld [vmem:[#allocation2 + $0xca8] sm:$0xff] }
 0x57f   :  { %v2953_v42 = vadd.f32 %v9538_v10, %v2941_v5  ;;  %7267 = vmatmul.msk.bf16.gmra.mxu1 %vm1346_vm3, %v4384_v34 }
 0x581   :  { %2961 = vst.msk [vmem:[%s11035_s8 + $0x20] sm:$0xff] %vm1346_vm3, %v2953_v42 }
 0x582   :  { %2970 = vst.msk [vmem:[#allocation3 + $0xc8] sm:$0xff] %vm1346_vm3, %v2953_v42  ;;  %v2835_v47 = vpop.f32.mrf.mxu2  ;;  %v9639_v25 = vpop.f32.mrf.mxu3  ;;  %v3999_v42 = vld [vmem:[#allocation2 + $0xc98] sm:$0xff] }
 0x583   :  { %v2848_v60 = vadd.f32 %v2835_v47, %v2754_v49  ;;  %v9662_v5 = vpop.f32.mrf.mxu1  ;;  %v3612_v49 = vld [vmem:[#allocation2 + $0x988] sm:$0xff] }
 0x584   :  { %v3998_v47 = vld [vmem:[#allocation2 + $0xc88] sm:$0xff] }
 0x585   :  { %v2942_v23 = vadd.f32 %v9493_v58, %v2848_v60  ;;  %v2755_v58 = vadd.f32 %v9207_v26, %v9514_v1  ;;  %v2756_v26 = vadd.f32 %v9210_v32, %v9524_v48  ;;  %v4006_v60 = vpack.c.bf16 %v3999_v42, %v3998_v47  ;;  %v7824_v32 = vld [vmem:[%s11033_s3 + $0x8] sm:$0xff]  ;;  %v4003_v47 = vld [vmem:[#allocation2 + $0xcd8] sm:$0xff] }
 0x586   :  { %3975 = vmatpush.bf16.msra.mxu2 %v7824_v32  ;;  %v7844_v42 = vld [vmem:[%s11033_s3 + $0xa8] sm:$0xff] }
 0x587   :  { %v2954_v21 = vadd.f32 %v9538_v10, %v2942_v23  ;;  %7040 = vmatmul.msk.bf16.gmra.mxu2 %vm1346_vm3, %v3343_v56  ;;  %7120 = vmatmul.msk.bf16.gmra.mxu3 %vm1346_vm3, %v3716_v62 }
 0x589   :  { %2962 = vst.msk [vmem:[%s11035_s8 + $0x28] sm:$0xff] %vm1346_vm3, %v2954_v21 }
 0x58a   :  { %2971 = vst.msk [vmem:[#allocation3 + $0xd8] sm:$0xff] %vm1346_vm3, %v2954_v21  ;;  %v2838_v30 = vpop.f32.mrf.mxu2  ;;  %v9657_v54 = vpop.f32.mrf.mxu3  ;;  %v3615_v21 = vld [vmem:[#allocation2 + $0x9b8] sm:$0xff] }
 0x58b   :  { %v2849_v51 = vadd.f32 %v2838_v30, %v2755_v58  ;;  %v3614_v30 = vld [vmem:[#allocation2 + $0x9a8] sm:$0xff] }
 0x58d   :  { %v2943_v0 = vadd.f32 %v9506_v19, %v2849_v51  ;;  %v3613_v19 = vld [vmem:[#allocation2 + $0x998] sm:$0xff] }
 0x58e   :  { %v3620_v50 = vpack.c.bf16 %v3613_v19, %v3612_v49  ;;  %v3617_v49 = vld [vmem:[#allocation2 + $0x9d8] sm:$0xff] }
 0x58f   :  { %v2955_v13 = vadd.f32 %v9538_v10, %v2943_v0  ;;  %7268 = vmatmul.msk.bf16.gmra.mxu1 %vm1346_vm3, %v4385_v9  ;;  %v4007_v0 = vpack.c.bf16 %v4001_v16, %v4000_v55 }
 0x591   :  { %2963 = vst.msk [vmem:[%s11035_s8 + $0x30] sm:$0xff] %vm1346_vm3, %v2955_v13 }
 0x592   :  { %2972 = vst.msk [vmem:[#allocation3 + $0xe8] sm:$0xff] %vm1346_vm3, %v2955_v13  ;;  %v2840_v1 = vpop.f32.mrf.mxu2  ;;  %v9671_v34 = vpop.f32.mrf.mxu3 }
 0x593   :  { %v2850_v41 = vadd.f32 %v2840_v1, %v2756_v26  ;;  %v7845_v1 = vld [vmem:[%s11033_s3 + $0xb0] sm:$0xff] }
 0x595   :  { %v2944_v17 = vadd.f32 %v9519_v33, %v2850_v41 }
 0x597   :  { %v2956_v7 = vadd.f32 %v9538_v10, %v2944_v17  ;;  %7097 = vmatmul.msk.bf16.vlgmr.msrb.gmra.mxu2 %vm1346_vm3, %v3620_v50  ;;  %7185 = vmatmul.msk.bf16.vlgmr.msra.gmra.mxu3 %vm1346_vm3, %v4006_v60  ;;  %v9687_v10 = vpop.f32.mrf.mxu1  ;;  %v4002_v60 = vld [vmem:[#allocation2 + $0xcc8] sm:$0xff] }
 0x599   :  { %2964 = vst.msk [vmem:[%s11035_s8 + $0x38] sm:$0xff] %vm1346_vm3, %v2956_v7 }
 0x59a   :  { %2973 = vst.msk [vmem:[#allocation3 + $0xf8] sm:$0xff] %vm1346_vm3, %v2956_v7  ;;  %v3125_v33 = vpop.f32.mrf.mxu2  ;;  %v9685_v48 = vpop.f32.mrf.mxu3 }
 0x59b   :  { %v3126_v59 = vadd.f32 %v3125_v33, %v9219_v43  ;;  %v3621_v43 = vpack.c.bf16 %v3615_v21, %v3614_v30  ;;  %v4008_v33 = vpack.c.bf16 %v4003_v47, %v4002_v60 }
 0x59d   :  { %v9691_v23 = vadd.f32 %v9530_v29, %v3126_v59  ;;  %v7823_v29 = vld [vmem:[%s11033_s3] sm:$0xff] }
 0x59e   :  { %3976 = vmatpush.bf16.msra.mxu2 %v7823_v29  ;;  %v7843_v59 = vld [vmem:[%s11033_s3 + $0xa0] sm:$0xff] }
 0x59f   :  { %7333 = vmatmul.msk.bf16.vlgmr.msra.gmra.mxu1 %vm1346_vm3, %v3620_v50  ;;  %v9697_v18 = vpop.f32.mrf.mxu1  ;;  %v3616_v50 = vld [vmem:[#allocation2 + $0x9c8] sm:$0xff] }
 0x5a0   :  { %v3622_v32 = vpack.c.bf16 %v3617_v49, %v3616_v50  ;;  %v7841_v49 = vld [vmem:[%s11033_s3 + $0x90] sm:$0xff] }
 0x5a2   :  { %v3127_v56 = vpop.f32.mrf.mxu2  ;;  %v9694_v62 = vpop.f32.mrf.mxu3 }
 0x5a3   :  { %v3128_v58 = vadd.f32 %v3127_v56, %v9224_v20  ;;  %v7846_v20 = vld [vmem:[%s11033_s3 + $0xb8] sm:$0xff]  ;;  %v7873_v56 = vld [vmem:[%s11033_s3 + $0x70] sm:$0xff] }
 0x5a4   :  { %4340 = vmatpush.bf16.msrb.mxu3 %v7846_v20  ;;  %v3619_v20 = vld [vmem:[#allocation2 + $0x9f8] sm:$0xff] }
 0x5a5   :  { %v9700_v51 = vadd.f32 %v9553_v14, %v3128_v58 }
 0x5a7   :  { %7098 = vmatmul.msk.bf16.gmra.mxu2 %vm1346_vm3, %v3621_v43  ;;  %7186 = vmatmul.msk.bf16.gmra.mxu3 %vm1346_vm3, %v4007_v0  ;;  %v9719_v19 = vpop.f32.mrf.mxu1 }
 0x5a8   :  { %4341 = vmatpush.bf16.msrb.mxu3 %v7845_v1  ;;  %v3618_v1 = vld [vmem:[#allocation2 + $0x9e8] sm:$0xff] }
 0x5aa   :  { %v3130_v9 = vpop.f32.mrf.mxu2  ;;  %v9710_v13 = vpop.f32.mrf.mxu3 }
 0x5ab   :  { %v3131_v14 = vadd.f32 %v3130_v9, %v9236_v61  ;;  %v7874_v61 = vld [vmem:[%s11033_s3 + $0x78] sm:$0xff] }
 0x5ac   :  { %5008 = vmatpush.bf16.msrb.mxu1 %v7874_v61  ;;  %4342 = vmatpush.bf16.msrb.mxu3 %v7844_v42  ;;  %v4005_v9 = vld [vmem:[#allocation2 + $0xcf8] sm:$0xff]  ;;  %v4004_v42 = vld [vmem:[#allocation2 + $0xce8] sm:$0xff]  ;;  %v3623_v61 = vpack.c.bf16 %v3619_v20, %v3618_v1  ;;  %v3324_v1 = vadd.f32 %v9309_v53, %v9700_v51  ;;  %v7839_v53 = vld [vmem:[%s11033_s3 + $0x80] sm:$0xff] }
 0x5ad   :  { %v9714_v26 = vadd.f32 %v9568_v39, %v3131_v14  ;;  %v7858_v51 = vld [vmem:[%s11033_s3 + $0x118] sm:$0xff] }
 0x5af   :  { %7334 = vmatmul.msk.bf16.gmra.mxu1 %vm1346_vm3, %v3621_v43  ;;  %v9748_v21 = vpop.f32.mrf.mxu1  ;;  %v7871_v43 = vld [vmem:[%s11033_s3 + $0x60] sm:$0xff] }
 0x5b0   :  { %4343 = vmatpush.bf16.msrb.mxu3 %v7843_v59  ;;  %5009 = vmatpush.bf16.msrb.mxu1 %v7873_v56  ;;  %v4281_v59 = vld [vmem:[#allocation2 + $0x698] sm:$0xff] }
 0x5b2   :  { %v3132_v39 = vpop.f32.mrf.mxu2  ;;  %v9728_v41 = vpop.f32.mrf.mxu3 }
 0x5b3   :  { %v3133_v17 = vadd.f32 %v3132_v39, %v9250_v11  ;;  %v7842_v11 = vld [vmem:[%s11033_s3 + $0x98] sm:$0xff]  ;;  %v4009_v39 = vpack.c.bf16 %v4005_v9, %v4004_v42 }
 0x5b4   :  { %4246 = vmatpush.bf16.msrb.mxu2 %v7842_v11  ;;  %v3828_v11 = vld [vmem:[#allocation2 + $0xd87] sm:$0xff]  ;;  %4622 = vmatpush.bf16.msra.mxu3 %v7858_v51 }
 0x5b5   :  { %v9732_v7 = vadd.f32 %v9586_v4, %v3133_v17  ;;  %v7872_v4 = vld [vmem:[%s11033_s3 + $0x68] sm:$0xff] }
 0x5b6   :  { %5010 = vmatpush.bf16.msrb.mxu1 %v7872_v4  ;;  %v4280_v4 = vld [vmem:[#allocation2 + $0x688] sm:$0xff] }
 0x5b7   :  { %7099 = vmatmul.msk.bf16.gmra.mxu2 %vm1346_vm3, %v3622_v32  ;;  %7187 = vmatmul.msk.bf16.gmra.mxu3 %vm1346_vm3, %v4008_v33  ;;  %v9762_v14 = vpop.f32.mrf.mxu1  ;;  %v3829_v33 = vld [vmem:[#allocation2 + $0xd97] sm:$0xff] }
 0x5b8   :  { %4247 = vmatpush.bf16.msrb.mxu2 %v7841_v49  ;;  %v3830_v49 = vld [vmem:[#allocation2 + $0xda7] sm:$0xff] }
 0x5ba   :  { %v3135_v16 = vpop.f32.mrf.mxu2  ;;  %v9750_v58 = vpop.f32.mrf.mxu3  ;;  %5011 = vmatpush.bf16.msrb.mxu1 %v7871_v43 }
 0x5bb   :  { %v3136_v30 = vadd.f32 %v3135_v16, %v9268_v35 }
 0x5bd   :  { %v9754_v55 = vadd.f32 %v9610_v12, %v3136_v30  ;;  %v4288_v30 = vpack.c.bf16 %v4281_v59, %v4280_v4 }
 0x5bf   :  { %7335 = vmatmul.msk.bf16.gmra.mxu1 %vm1346_vm3, %v3622_v32  ;;  %v9776_v50 = vpop.f32.mrf.mxu1 }
 0x5c2   :  { %v3137_v0 = vpop.f32.mrf.mxu2  ;;  %v9760_v29 = vpop.f32.mrf.mxu3 }
 0x5c3   :  { %v3138_v35 = vadd.f32 %v3137_v0, %v9276_v46 }
 0x5c5   :  { %v9766_v12 = vadd.f32 %v9639_v25, %v3138_v35 }
 0x5c7   :  { %7100 = vmatmul.msk.bf16.gmra.mxu2 %vm1346_vm3, %v3623_v61  ;;  %7188 = vmatmul.msk.bf16.gmra.mxu3 %vm1346_vm3, %v4009_v39  ;;  %v9788_v43 = vpop.f32.mrf.mxu1  ;;  %v3831_v39 = vld [vmem:[#allocation2 + $0xdb7] sm:$0xff] }
 0x5ca   :  { %v3140_v47 = vpop.f32.mrf.mxu2  ;;  %v9773_v17 = vpop.f32.mrf.mxu3 }
 0x5cb   :  { %v3141_v46 = vadd.f32 %v3140_v47, %v9285_v57  ;;  %v3836_v57 = vpack.c.bf16 %v3829_v33, %v3828_v11  ;;  %v4282_v47 = vld [vmem:[#allocation2 + $0x6a8] sm:$0xff]  ;;  %v3325_v33 = vadd.f32 %v9325_v15, %v9714_v26  ;;  %v7886_v26 = vld [vmem:[%s11033_s3 + $0xd8] sm:$0xff] }
 0x5cc   :  { %v7856_v15 = vld [vmem:[%s11033_s3 + $0x108] sm:$0xff]  ;;  %5288 = vmatpush.bf16.msra.mxu1 %v7886_v26  ;;  %v7883_v26 = vld [vmem:[%s11033_s3 + $0xc0] sm:$0xff] }
 0x5cd   :  { %v9779_v25 = vadd.f32 %v9657_v54, %v3141_v46  ;;  %v7840_v54 = vld [vmem:[%s11033_s3 + $0x88] sm:$0xff] }
 0x5ce   :  { %4248 = vmatpush.bf16.msrb.mxu2 %v7840_v54 }
 0x5cf   :  { %7336 = vmatmul.msk.bf16.gmra.mxu1 %vm1346_vm3, %v3623_v61  ;;  %v9803_v35 = vpop.f32.mrf.mxu1 }
 0x5d2   :  { %v3142_v60 = vpop.f32.mrf.mxu2  ;;  %v9782_v32 = vpop.f32.mrf.mxu3  ;;  %4249 = vmatpush.bf16.msrb.mxu2 %v7839_v53 }
 0x5d3   :  { %v3143_v56 = vadd.f32 %v3142_v60, %v9290_v8  ;;  %v3323_v8 = vadd.f32 %v9300_v27, %v9691_v23  ;;  %v4283_v27 = vld [vmem:[#allocation2 + $0x6b8] sm:$0xff] }
 0x5d4   :  { %v4289_v60 = vpack.c.bf16 %v4283_v27, %v4282_v47  ;;  %v7854_v47 = vld [vmem:[%s11033_s3 + $0xf8] sm:$0xff] }
 0x5d5   :  { %v9786_v16 = vadd.f32 %v9671_v34, %v3143_v56 }
 0x5d7   :  { %7165 = vmatmul.msk.bf16.vlgmr.msra.gmra.mxu2 %vm1346_vm3, %v3836_v57  ;;  %7245 = vmatmul.msk.bf16.vlgmr.msrb.gmra.mxu3 %vm1346_vm3, %v4288_v30  ;;  %v9824_v56 = vpop.f32.mrf.mxu1  ;;  %v7857_v57 = vld [vmem:[%s11033_s3 + $0x110] sm:$0xff] }
 0x5d8   :  { %4623 = vmatpush.bf16.msra.mxu3 %v7857_v57  ;;  %4528 = vmatpush.bf16.msra.mxu2 %v7854_v47 }
 0x5da   :  { %v3397_v0 = vpop.f32.mrf.mxu2  ;;  %v9797_v20 = vpop.f32.mrf.mxu3 }
 0x5db   :  { %v3417_v34 = vadd.f32 %v3397_v0, %v3323_v8  ;;  %v3833_v8 = vld [vmem:[#allocation2 + $0xdd7] sm:$0xff] }
 0x5dc   :  { %v4285_v0 = vld [vmem:[#allocation2 + $0x6d8] sm:$0xff]  ;;  %4624 = vmatpush.bf16.msra.mxu3 %v7856_v15 }
 0x5dd   :  { %v9800_v9 = vadd.f32 %v9685_v48, %v3417_v34  ;;  %v3837_v48 = vpack.c.bf16 %v3831_v39, %v3830_v49 }
 0x5df   :  { %7393 = vmatmul.msk.bf16.vlgmr.msrb.gmra.mxu1 %vm1346_vm3, %v4288_v30  ;;  %v3326_v30 = vadd.f32 %v9343_v63, %v9732_v7  ;;  %v9843_v39 = vpop.f32.mrf.mxu1  ;;  %v7855_v63 = vld [vmem:[%s11033_s3 + $0x100] sm:$0xff]  ;;  %v7885_v7 = vld [vmem:[%s11033_s3 + $0xd0] sm:$0xff] }
 0x5e0   :  { %4625 = vmatpush.bf16.msra.mxu3 %v7855_v63  ;;  %5289 = vmatpush.bf16.msra.mxu1 %v7885_v7  ;;  %v11042_v63 = vld [vmem:[#allocation4_spill] sm:$0xff] }
 0x5e1   :  { %v3330_v7 = vadd.f32 %v11042_v63, %v9786_v16  ;;  %v11043_v16 = vld [vmem:[#allocation5_spill] sm:$0xff]  ;;  %v4565_v63 = vld [vmem:[#allocation2 + $0xeb8] sm:$0xff] }
 0x5e2   :  { %v3399_v42 = vpop.f32.mrf.mxu2  ;;  %v9807_v61 = vpop.f32.mrf.mxu3 }
 0x5e3   :  { %v3418_v23 = vadd.f32 %v3399_v42, %v3324_v1  ;;  %v3832_v1 = vld [vmem:[#allocation2 + $0xdc7] sm:$0xff] }
 0x5e4   :  { %v4284_v42 = vld [vmem:[#allocation2 + $0x6c8] sm:$0xff] }
 0x5e5   :  { %v9810_v46 = vadd.f32 %v9694_v62, %v3418_v23  ;;  %v3838_v23 = vpack.c.bf16 %v3833_v8, %v3832_v1  ;;  %v4290_v49 = vpack.c.bf16 %v4285_v0, %v4284_v42 }
 0x5e7   :  { %7166 = vmatmul.msk.bf16.gmra.mxu2 %vm1346_vm3, %v3837_v48  ;;  %7246 = vmatmul.msk.bf16.gmra.mxu3 %vm1346_vm3, %v4289_v60  ;;  %v3327_v48 = vadd.f32 %v9365_v37, %v9754_v55  ;;  %v3835_v37 = vld [vmem:[#allocation2 + $0xdf7] sm:$0xff] }
 0x5e8   :  { %v4287_v55 = vld [vmem:[#allocation2 + $0x6f8] sm:$0xff] }
 0x5ea   :  { %v3402_v62 = vpop.f32.mrf.mxu2  ;;  %v9822_v59 = vpop.f32.mrf.mxu3 }
 0x5eb   :  { %v3419_v11 = vadd.f32 %v3402_v62, %v3325_v33  ;;  %v9869_v62 = vpop.f32.mrf.mxu1 }
 0x5ed   :  { %v9827_v4 = vadd.f32 %v9710_v13, %v3419_v11  ;;  %v3328_v11 = vadd.f32 %v9377_v45, %v9766_v12  ;;  %v3329_v12 = vadd.f32 %v9390_v52, %v9779_v25  ;;  %v4187_v52 = vld [vmem:[#allocation2 + $0x298] sm:$0xff] }
 0x5ee   :  { %v4563_v25 = vld [vmem:[#allocation2 + $0xe98] sm:$0xff] }
 0x5ef   :  { %7394 = vmatmul.msk.bf16.gmra.mxu1 %vm1346_vm3, %v4289_v60 }
 0x5f2   :  { %v3404_v13 = vpop.f32.mrf.mxu2  ;;  %v9841_v54 = vpop.f32.mrf.mxu3 }
 0x5f3   :  { %v3420_v34 = vadd.f32 %v3404_v13, %v3326_v30  ;;  %v3834_v13 = vld [vmem:[#allocation2 + $0xde7] sm:$0xff]  ;;  %v9884_v45 = vpop.f32.mrf.mxu1 }
 0x5f4   :  { %v3839_v0 = vpack.c.bf16 %v3835_v37, %v3834_v13  ;;  %v7852_v13 = vld [vmem:[%s11033_s3 + $0xe8] sm:$0xff] }
 0x5f5   :  { %v9846_v27 = vadd.f32 %v9728_v41, %v3420_v34  ;;  %v7884_v41 = vld [vmem:[%s11033_s3 + $0xc8] sm:$0xff] }
 0x5f6   :  { %5290 = vmatpush.bf16.msra.mxu1 %v7884_v41 }
 0x5f7   :  { %7167 = vmatmul.msk.bf16.gmra.mxu2 %vm1346_vm3, %v3838_v23  ;;  %7247 = vmatmul.msk.bf16.gmra.mxu3 %vm1346_vm3, %v4290_v49  ;;  %v7853_v23 = vld [vmem:[%s11033_s3 + $0xf0] sm:$0xff] }
 0x5f8   :  { %4529 = vmatpush.bf16.msra.mxu2 %v7853_v23 }
 0x5fa   :  { %v3407_v60 = vpop.f32.mrf.mxu2  ;;  %v9864_v53 = vpop.f32.mrf.mxu3  ;;  %5291 = vmatpush.bf16.msra.mxu1 %v7883_v26 }
 0x5fb   :  { %v3421_v51 = vadd.f32 %v3407_v60, %v3327_v48  ;;  %v9901_v48 = vpop.f32.mrf.mxu1 }
 0x5fc   :  { %4530 = vmatpush.bf16.msra.mxu2 %v7852_v13 }
 0x5fd   :  { %v9867_v33 = vadd.f32 %v9750_v58, %v3421_v51  ;;  %v4286_v58 = vld [vmem:[#allocation2 + $0x6e8] sm:$0xff] }
 0x5fe   :  { %v4291_v34 = vpack.c.bf16 %v4287_v55, %v4286_v58  ;;  %v4186_v51 = vld [vmem:[#allocation2 + $0x288] sm:$0xff]  ;;  %v3603_v55 = vadd.f32 %v11043_v16, %v9800_v9 }
 0x5ff   :  { %7395 = vmatmul.msk.bf16.gmra.mxu1 %vm1346_vm3, %v4290_v49 }
 0x602   :  { %v3409_v57 = vpop.f32.mrf.mxu2  ;;  %v9874_v15 = vpop.f32.mrf.mxu3 }
 0x603   :  { %v3422_v30 = vadd.f32 %v3409_v57, %v3328_v11  ;;  %v4562_v11 = vld [vmem:[#allocation2 + $0xe88] sm:$0xff] }
 0x604   :  { %v4570_v37 = vpack.c.bf16 %v4563_v25, %v4562_v11 }
 0x605   :  { %v9880_v8 = vadd.f32 %v9760_v29, %v3422_v30 }
 0x607   :  { %7168 = vmatmul.msk.bf16.gmra.mxu2 %vm1346_vm3, %v3839_v0  ;;  %7248 = vmatmul.msk.bf16.gmra.mxu3 %vm1346_vm3, %v4291_v34  ;;  %v9920_v0 = vpop.f32.mrf.mxu1 }
 0x60a   :  { %v3412_v1 = vpop.f32.mrf.mxu2  ;;  %v9888_v42 = vpop.f32.mrf.mxu3 }
 0x60b   :  { %v3423_v29 = vadd.f32 %v3412_v1, %v3329_v12  ;;  %v3604_v12 = vadd.f32 %v9424_v24, %v9810_v46  ;;  %v3605_v24 = vadd.f32 %v9445_v31, %v9827_v4 }
 0x60d   :  { %v9894_v49 = vadd.f32 %v9773_v17, %v3423_v29  ;;  %v4194_v17 = vpack.c.bf16 %v4187_v52, %v4186_v51  ;;  %v4189_v29 = vld [vmem:[#allocation2 + $0x2b8] sm:$0xff] }
 0x60f   :  { %7396 = vmatmul.msk.bf16.gmra.mxu1 %vm1346_vm3, %v4291_v34  ;;  %v9935_v51 = vpop.f32.mrf.mxu1 }
 0x612   :  { %v3414_v47 = vpop.f32.mrf.mxu2  ;;  %v9899_v41 = vpop.f32.mrf.mxu3 }
 0x613   :  { %v3424_v60 = vadd.f32 %v3414_v47, %v3330_v7  ;;  %v4188_v7 = vld [vmem:[#allocation2 + $0x2a8] sm:$0xff] }
 0x614   :  { %v4564_v47 = vld [vmem:[#allocation2 + $0xea8] sm:$0xff]  ;;  %v4195_v25 = vpack.c.bf16 %v4189_v29, %v4188_v7 }
 0x615   :  { %v9904_v57 = vadd.f32 %v9782_v32, %v3424_v60  ;;  %v9918_v32 = vld [vmem:[%s11034_s4] ss:$0 sm:$0xff]  ;;  %v4571_v60 = vpack.c.bf16 %v4565_v63, %v4564_v47  ;;  %v4566_v29 = vld [vmem:[#allocation2 + $0xec8] sm:$0xff]  ;;  %v3607_v47 = vadd.f32 %v9489_v2, %v9867_v33 }
 0x616   :  { %v7868_v63 = vld [vmem:[%s11033_s3 + $0x48] sm:$0xff] }
 0x617   :  { %7225 = vmatmul.msk.bf16.vlgmr.msrb.gmra.mxu2 %vm1346_vm3, %v4194_v17  ;;  %7305 = vmatmul.msk.bf16.vlgmr.msra.gmra.mxu3 %vm1346_vm3, %v4570_v37  ;;  %v7851_v17 = vld [vmem:[%s11033_s3 + $0xe0] sm:$0xff]  ;;  %v9958_v4 = vpop.f32.mrf.mxu1 }
 0x618   :  { %4531 = vmatpush.bf16.msra.mxu2 %v7851_v17 }
 0x61a   :  { %v3677_v26 = vpop.f32.mrf.mxu2  ;;  %v9910_v30 = vpop.f32.mrf.mxu3 }
 0x61b   :  { %v3697_v58 = vadd.f32 %v3677_v26, %v3603_v55  ;;  %v3606_v26 = vadd.f32 %v9470_v6, %v9846_v27 }
 0x61d   :  { %v3790_v34 = vadd.f32 %v9797_v20, %v3697_v58 }
 0x61f   :  { %v3802_v9 = vadd.f32 %v9918_v32, %v3790_v34  ;;  %7453 = vmatmul.msk.bf16.vlgmr.msra.gmra.mxu1 %vm1346_vm3, %v4570_v37  ;;  %v7870_v37 = vld [vmem:[%s11033_s3 + $0x58] sm:$0xff] }
 0x620   :  { %4915 = vmatpush.bf16.msrb.mxu3 %v7870_v37  ;;  %v4567_v34 = vld [vmem:[#allocation2 + $0xed8] sm:$0xff] }
 0x621   :  { %7121 = vst.msk [vmem:[%s11035_s8 + $0x40] sm:$0xff] %vm1346_vm3, %v3802_v9 }
 0x622   :  { %3820 = vst.msk [vmem:[#allocation3 + $0x188] sm:$0xff] %vm1346_vm3, %v3802_v9  ;;  %v3679_v1 = vpop.f32.mrf.mxu2  ;;  %v9932_v23 = vpop.f32.mrf.mxu3  ;;  %v7869_v9 = vld [vmem:[%s11033_s3 + $0x50] sm:$0xff] }
 0x623   :  { %v3698_v20 = vadd.f32 %v3679_v1, %v3604_v12  ;;  %v4190_v1 = vld [vmem:[#allocation2 + $0x2c8] sm:$0xff] }
 0x624   :  { %4916 = vmatpush.bf16.msrb.mxu3 %v7869_v9 }
 0x625   :  { %v3791_v52 = vadd.f32 %v9807_v61, %v3698_v20  ;;  %v4572_v20 = vpack.c.bf16 %v4567_v34, %v4566_v29 }
 0x627   :  { %v3803_v11 = vadd.f32 %v9918_v32, %v3791_v52  ;;  %7226 = vmatmul.msk.bf16.gmra.mxu2 %vm1346_vm3, %v4195_v25  ;;  %7306 = vmatmul.msk.bf16.gmra.mxu3 %vm1346_vm3, %v4571_v60  ;;  %v7867_v25 = vld [vmem:[%s11033_s3 + $0x40] sm:$0xff] }
 0x628   :  { %4917 = vmatpush.bf16.msrb.mxu3 %v7868_v63 }
 0x629   :  { %7122 = vst.msk [vmem:[%s11035_s8 + $0x48] sm:$0xff] %vm1346_vm3, %v3803_v11 }
 0x62a   :  { %3821 = vst.msk [vmem:[#allocation3 + $0x198] sm:$0xff] %vm1346_vm3, %v3803_v11  ;;  %v3682_v61 = vpop.f32.mrf.mxu2  ;;  %v9947_v46 = vpop.f32.mrf.mxu3 }
 0x62b   :  { %v3699_v16 = vadd.f32 %v3682_v61, %v3605_v24  ;;  %v9994_v11 = vpop.f32.mrf.mxu1  ;;  %v3608_v61 = vadd.f32 %v9511_v44, %v9880_v8  ;;  %v7861_v44 = vld [vmem:[%s11033_s3 + $0x10] sm:$0xff] }
 0x62c   :  { %4918 = vmatpush.bf16.msrb.mxu3 %v7867_v25  ;;  %v4855_v25 = vld [vmem:[#allocation2 + $0xd88] sm:$0xff] }
 0x62d   :  { %v3792_v55 = vadd.f32 %v9822_v59, %v3699_v16  ;;  %v4191_v59 = vld [vmem:[#allocation2 + $0x2d8] sm:$0xff] }
 0x62e   :  { %v4196_v27 = vpack.c.bf16 %v4191_v59, %v4190_v1  ;;  %v4193_v16 = vld [vmem:[#allocation2 + $0x2f8] sm:$0xff] }
 0x62f   :  { %v3804_v31 = vadd.f32 %v9918_v32, %v3792_v55  ;;  %7454 = vmatmul.msk.bf16.gmra.mxu1 %vm1346_vm3, %v4571_v60  ;;  %v7862_v60 = vld [vmem:[%s11033_s3 + $0x18] sm:$0xff] }
 0x630   :  { %4830 = vmatpush.bf16.msrb.mxu2 %v7862_v60  ;;  %v4569_v55 = vld [vmem:[#allocation2 + $0xef8] sm:$0xff] }
 0x631   :  { %7123 = vst.msk [vmem:[%s11035_s8 + $0x50] sm:$0xff] %vm1346_vm3, %v3804_v31 }
 0x632   :  { %3822 = vst.msk [vmem:[#allocation3 + $0x1a8] sm:$0xff] %vm1346_vm3, %v3804_v31  ;;  %v3684_v13 = vpop.f32.mrf.mxu2  ;;  %v9967_v58 = vpop.f32.mrf.mxu3  ;;  %v4192_v31 = vld [vmem:[#allocation2 + $0x2e8] sm:$0xff] }
 0x633   :  { %v3700_v12 = vadd.f32 %v3684_v13, %v3606_v26  ;;  %v4568_v26 = vld [vmem:[#allocation2 + $0xee8] sm:$0xff]  ;;  %v10008_v13 = vpop.f32.mrf.mxu1  ;;  %v4197_v34 = vpack.c.bf16 %v4193_v16, %v4192_v31 }
 0x634   :  { %v4573_v9 = vpack.c.bf16 %v4569_v55, %v4568_v26  ;;  %4831 = vmatpush.bf16.msrb.mxu2 %v7861_v44  ;;  %v4471_v55 = vld [vmem:[#allocation2 + $0xab8] sm:$0xff]  ;;  %v4470_v26 = vld [vmem:[#allocation2 + $0xaa8] sm:$0xff] }
 0x635   :  { %v3793_v6 = vadd.f32 %v9841_v54, %v3700_v12 }
 0x637   :  { %v3805_v7 = vadd.f32 %v9918_v32, %v3793_v6  ;;  %7227 = vmatmul.msk.bf16.gmra.mxu2 %vm1346_vm3, %v4196_v27  ;;  %7307 = vmatmul.msk.bf16.gmra.mxu3 %vm1346_vm3, %v4572_v20 }
 0x639   :  { %7124 = vst.msk [vmem:[%s11035_s8 + $0x58] sm:$0xff] %vm1346_vm3, %v3805_v7 }
 0x63a   :  { %3823 = vst.msk [vmem:[#allocation3 + $0x1b8] sm:$0xff] %vm1346_vm3, %v3805_v7  ;;  %v3687_v54 = vpop.f32.mrf.mxu2  ;;  %v9986_v52 = vpop.f32.mrf.mxu3  ;;  %v4856_v7 = vld [vmem:[#allocation2 + $0xd98] sm:$0xff] }
 0x63b   :  { %v3701_v24 = vadd.f32 %v3687_v54, %v3607_v47  ;;  %v10027_v6 = vpop.f32.mrf.mxu1  ;;  %v4468_v54 = vld [vmem:[#allocation2 + $0xa88] sm:$0xff] }
 0x63d   :  { %v3794_v2 = vadd.f32 %v9864_v53, %v3701_v24 }
 0x63f   :  { %v3806_v33 = vadd.f32 %v9918_v32, %v3794_v2  ;;  %7455 = vmatmul.msk.bf16.gmra.mxu1 %vm1346_vm3, %v4572_v20  ;;  %v4863_v2 = vpack.c.bf16 %v4856_v7, %v4855_v25  ;;  %v7879_v25 = vld [vmem:[%s11033_s3 + $0xa0] sm:$0xff] }
 0x641   :  { %7125 = vst.msk [vmem:[%s11035_s8 + $0x60] sm:$0xff] %vm1346_vm3, %v3806_v33 }
 0x642   :  { %3824 = vst.msk [vmem:[#allocation3 + $0x1c8] sm:$0xff] %vm1346_vm3, %v3806_v33  ;;  %v3689_v17 = vpop.f32.mrf.mxu2  ;;  %v10006_v37 = vpop.f32.mrf.mxu3 }
 0x643   :  { %v3702_v53 = vadd.f32 %v3689_v17, %v3608_v61 }
 0x645   :  { %v3795_v59 = vadd.f32 %v9874_v15, %v3702_v53  ;;  %v3609_v15 = vadd.f32 %v9521_v28, %v9894_v49  ;;  %v3610_v28 = vadd.f32 %v9542_v36, %v9904_v57  ;;  %v7860_v36 = vld [vmem:[%s11033_s3 + $0x8] sm:$0xff]  ;;  %v4858_v53 = vld [vmem:[#allocation2 + $0xdb8] sm:$0xff] }
 0x646   :  { %4832 = vmatpush.bf16.msrb.mxu2 %v7860_v36 }
 0x647   :  { %v3807_v12 = vadd.f32 %v9918_v32, %v3795_v59  ;;  %7228 = vmatmul.msk.bf16.gmra.mxu2 %vm1346_vm3, %v4197_v34  ;;  %7308 = vmatmul.msk.bf16.gmra.mxu3 %vm1346_vm3, %v4573_v9  ;;  %v4857_v59 = vld [vmem:[#allocation2 + $0xda8] sm:$0xff] }
 0x649   :  { %7126 = vst.msk [vmem:[%s11035_s8 + $0x68] sm:$0xff] %vm1346_vm3, %v3807_v12 }
 0x64a   :  { %3825 = vst.msk [vmem:[#allocation3 + $0x1d8] sm:$0xff] %vm1346_vm3, %v3807_v12  ;;  %v3692_v8 = vpop.f32.mrf.mxu2  ;;  %v10024_v1 = vpop.f32.mrf.mxu3  ;;  %v4864_v12 = vpack.c.bf16 %v4858_v53, %v4857_v59  ;;  %v4861_v53 = vld [vmem:[#allocation2 + $0xde8] sm:$0xff] }
 0x64b   :  { %v3703_v29 = vadd.f32 %v3692_v8, %v3609_v15  ;;  %v7881_v8 = vld [vmem:[%s11033_s3 + $0xb0] sm:$0xff] }
 0x64d   :  { %v3796_v63 = vadd.f32 %v9888_v42, %v3703_v29  ;;  %v4469_v42 = vld [vmem:[#allocation2 + $0xa98] sm:$0xff]  ;;  %v7880_v29 = vld [vmem:[%s11033_s3 + $0xa8] sm:$0xff] }
 0x64e   :  { %v4476_v24 = vpack.c.bf16 %v4469_v42, %v4468_v54 }
 0x64f   :  { %v3808_v27 = vadd.f32 %v9918_v32, %v3796_v63  ;;  %7456 = vmatmul.msk.bf16.gmra.mxu1 %vm1346_vm3, %v4573_v9  ;;  %v4477_v9 = vpack.c.bf16 %v4471_v55, %v4470_v26  ;;  %v4474_v55 = vld [vmem:[#allocation2 + $0xae8] sm:$0xff] }
 0x651   :  { %7127 = vst.msk [vmem:[%s11035_s8 + $0x70] sm:$0xff] %vm1346_vm3, %v3808_v27 }
 0x652   :  { %3826 = vst.msk [vmem:[#allocation3 + $0x1e8] sm:$0xff] %vm1346_vm3, %v3808_v27  ;;  %v3694_v49 = vpop.f32.mrf.mxu2  ;;  %v10038_v20 = vpop.f32.mrf.mxu3 }
 0x653   :  { %v3704_v47 = vadd.f32 %v3694_v49, %v3610_v28  ;;  %v4473_v28 = vld [vmem:[#allocation2 + $0xad8] sm:$0xff] }
 0x654   :  { %v4860_v49 = vld [vmem:[#allocation2 + $0xdd8] sm:$0xff] }
 0x655   :  { %v3797_v60 = vadd.f32 %v9899_v41, %v3704_v47 }
 0x657   :  { %v3809_v33 = vadd.f32 %v9918_v32, %v3797_v60  ;;  %7285 = vmatmul.msk.bf16.vlgmr.msra.gmra.mxu2 %vm1346_vm3, %v4476_v24  ;;  %7373 = vmatmul.msk.bf16.vlgmr.msrb.gmra.mxu3 %vm1346_vm3, %v4863_v2 }
 0x659   :  { %7128 = vst.msk [vmem:[%s11035_s8 + $0x78] sm:$0xff] %vm1346_vm3, %v3809_v33 }
 0x65a   :  { %3827 = vst.msk [vmem:[#allocation3 + $0x1f8] sm:$0xff] %vm1346_vm3, %v3809_v33  ;;  %v3978_v41 = vpop.f32.mrf.mxu2  ;;  %v10052_v57 = vpop.f32.mrf.mxu3 }
 0x65b   :  { %v3979_v32 = vadd.f32 %v3978_v41, %v9559_v40  ;;  %v7859_v40 = vld [vmem:[%s11033_s3] sm:$0xff]  ;;  %v4475_v41 = vld [vmem:[#allocation2 + $0xaf8] sm:$0xff] }
 0x65c   :  { %4833 = vmatpush.bf16.msrb.mxu2 %v7859_v40  ;;  %v4479_v26 = vpack.c.bf16 %v4475_v41, %v4474_v55  ;;  %v4686_v40 = vld [vmem:[#allocation2 + $0xc98] sm:$0xff]  ;;  %v7893_v55 = vld [vmem:[%s11033_s3 + $0x110] sm:$0xff] }
 0x65d   :  { %v10056_v61 = vadd.f32 %v9910_v30, %v3979_v32  ;;  %v7882_v30 = vld [vmem:[%s11033_s3 + $0xb8] sm:$0xff] }
 0x65e   :  { %5195 = vmatpush.bf16.msra.mxu3 %v7882_v30  ;;  %v4862_v32 = vld [vmem:[#allocation2 + $0xdf8] sm:$0xff] }
 0x65f   :  { %v4866_v59 = vpack.c.bf16 %v4862_v32, %v4861_v53  ;;  %v5136_v30 = vld [vmem:[#allocation2 + $0x798] sm:$0xff]  ;;  %v7892_v53 = vld [vmem:[%s11033_s3 + $0x108] sm:$0xff] }
 0x662   :  { %v3980_v17 = vpop.f32.mrf.mxu2  ;;  %v10058_v16 = vpop.f32.mrf.mxu3  ;;  %5196 = vmatpush.bf16.msra.mxu3 %v7881_v8  ;;  %v4685_v8 = vld [vmem:[#allocation2 + $0xc88] sm:$0xff] }
 0x663   :  { %v3981_v31 = vadd.f32 %v3980_v17, %v9594_v38 }
 0x665   :  { %v10062_v34 = vadd.f32 %v9932_v23, %v3981_v31 }
 0x666   :  { %5197 = vmatpush.bf16.msra.mxu3 %v7880_v29  ;;  %v5135_v29 = vld [vmem:[#allocation2 + $0x788] sm:$0xff] }
 0x667   :  { %7286 = vmatmul.msk.bf16.gmra.mxu2 %vm1346_vm3, %v4477_v9  ;;  %7374 = vmatmul.msk.bf16.gmra.mxu3 %vm1346_vm3, %v4864_v12 }
 0x66a   :  { %v3983_v38 = vpop.f32.mrf.mxu2  ;;  %v10072_v44 = vpop.f32.mrf.mxu3  ;;  %5198 = vmatpush.bf16.msra.mxu3 %v7879_v25  ;;  %v5138_v25 = vld [vmem:[#allocation2 + $0x7b8] sm:$0xff] }
 0x66b   :  { %v3984_v23 = vadd.f32 %v3983_v38, %v9624_v3  ;;  %v4472_v3 = vld [vmem:[#allocation2 + $0xac8] sm:$0xff] }
 0x66c   :  { %v4478_v47 = vpack.c.bf16 %v4473_v28, %v4472_v3  ;;  %v4693_v28 = vpack.c.bf16 %v4686_v40, %v4685_v8 }
 0x66d   :  { %v10076_v15 = vadd.f32 %v9947_v46, %v3984_v23  ;;  %v4859_v46 = vld [vmem:[#allocation2 + $0xdc8] sm:$0xff] }
 0x66e   :  { %v4865_v54 = vpack.c.bf16 %v4860_v49, %v4859_v46  ;;  %v5143_v49 = vpack.c.bf16 %v5136_v30, %v5135_v29  ;;  %v4178_v46 = vadd.f32 %v9762_v14, %v10062_v34  ;;  %v7894_v14 = vld [vmem:[%s11033_s3 + $0x118] sm:$0xff] }
 0x66f   :  { %5475 = vmatpush.bf16.msrb.mxu3 %v7894_v14 }
 0x672   :  { %v3985_v63 = vpop.f32.mrf.mxu2  ;;  %v10084_v27 = vpop.f32.mrf.mxu3 }
 0x673   :  { %v3986_v42 = vadd.f32 %v3985_v63, %v9642_v22  ;;  %v7878_v22 = vld [vmem:[%s11033_s3 + $0x98] sm:$0xff]  ;;  %5476 = vmatpush.bf16.msrb.mxu3 %v7893_v55 }
 0x674   :  { %5102 = vmatpush.bf16.msra.mxu2 %v7878_v22 }
 0x675   :  { %v10088_v7 = vadd.f32 %v9967_v58, %v3986_v42 }
 0x677   :  { %7287 = vmatmul.msk.bf16.gmra.mxu2 %vm1346_vm3, %v4478_v47  ;;  %7375 = vmatmul.msk.bf16.gmra.mxu3 %vm1346_vm3, %v4865_v54  ;;  %v4688_v54 = vld [vmem:[#allocation2 + $0xcb8] sm:$0xff] }
 0x678   :  { %5477 = vmatpush.bf16.msrb.mxu3 %v7892_v53  ;;  %v5042_v53 = vld [vmem:[#allocation2 + $0x388] sm:$0xff] }
 0x67a   :  { %v3988_v60 = vpop.f32.mrf.mxu2  ;;  %v10098_v24 = vpop.f32.mrf.mxu3 }
 0x67b   :  { %v3989_v58 = vadd.f32 %v3988_v60, %v9662_v5  ;;  %v7877_v5 = vld [vmem:[%s11033_s3 + $0x90] sm:$0xff]  ;;  %v4687_v60 = vld [vmem:[#allocation2 + $0xca8] sm:$0xff] }
 0x67c   :  { %5103 = vmatpush.bf16.msra.mxu2 %v7877_v5  ;;  %v5140_v5 = vld [vmem:[#allocation2 + $0x7d8] sm:$0xff] }
 0x67d   :  { %v10102_v2 = vadd.f32 %v9986_v52, %v3989_v58  ;;  %v5137_v58 = vld [vmem:[#allocation2 + $0x7a8] sm:$0xff] }
 0x682   :  { %v3990_v33 = vpop.f32.mrf.mxu2  ;;  %v10104_v36 = vpop.f32.mrf.mxu3 }
 0x683   :  { %v3991_v17 = vadd.f32 %v3990_v33, %v9687_v10 }
 0x685   :  { %v10108_v31 = vadd.f32 %v10006_v37, %v3991_v17 }
 0x687   :  { %7288 = vmatmul.msk.bf16.gmra.mxu2 %vm1346_vm3, %v4479_v26  ;;  %7376 = vmatmul.msk.bf16.gmra.mxu3 %vm1346_vm3, %v4866_v59  ;;  %v4180_v26 = vadd.f32 %v9788_v43, %v10088_v7  ;;  %v4690_v59 = vld [vmem:[#allocation2 + $0xcd8] sm:$0xff]  ;;  %v4181_v7 = vadd.f32 %v9803_v35, %v10102_v2  ;;  %v4691_v35 = vld [vmem:[#allocation2 + $0xce8] sm:$0xff] }
 0x688   :  { %v7890_v43 = vld [vmem:[%s11033_s3 + $0xf8] sm:$0xff]  ;;  %v5141_v2 = vld [vmem:[#allocation2 + $0x7e8] sm:$0xff] }
 0x68a   :  { %v3993_v52 = vpop.f32.mrf.mxu2  ;;  %v10115_v9 = vpop.f32.mrf.mxu3 }
 0x68b   :  { %v3994_v10 = vadd.f32 %v3993_v52, %v9697_v18  ;;  %v7876_v18 = vld [vmem:[%s11033_s3 + $0x88] sm:$0xff] }
 0x68c   :  { %5104 = vmatpush.bf16.msra.mxu2 %v7876_v18 }
 0x68d   :  { %v10119_v12 = vadd.f32 %v10024_v1, %v3994_v10  ;;  %v5139_v10 = vld [vmem:[#allocation2 + $0x7c8] sm:$0xff] }
 0x68e   :  { %v5145_v30 = vpack.c.bf16 %v5140_v5, %v5139_v10  ;;  %v10241_v10 = vld [vmem:[%s11034_s4] ss:$0 sm:$0xff] }
 0x692   :  { %v3995_v37 = vpop.f32.mrf.mxu2  ;;  %v10122_v23 = vpop.f32.mrf.mxu3 }
 0x693   :  { %v3996_v38 = vadd.f32 %v3995_v37, %v9719_v19  ;;  %v4177_v19 = vadd.f32 %v9748_v21, %v10056_v61  ;;  %v4694_v21 = vpack.c.bf16 %v4688_v54, %v4687_v60  ;;  %v5144_v61 = vpack.c.bf16 %v5138_v25, %v5137_v58  ;;  %v7900_v58 = vld [vmem:[%s11036_s5 + $0x28] sm:$0xff] }
 0x695   :  { %v10125_v63 = vadd.f32 %v10038_v20, %v3996_v38  ;;  %v7891_v38 = vld [vmem:[%s11033_s3 + $0x100] sm:$0xff] }
 0x696   :  { %5478 = vmatpush.bf16.msrb.mxu3 %v7891_v38  ;;  %v5045_v38 = vld [vmem:[#allocation2 + $0x3b8] sm:$0xff] }
 0x697   :  { %7353 = vmatmul.msk.bf16.vlgmr.msrb.gmra.mxu2 %vm1346_vm3, %v4693_v28  ;;  %7433 = vmatmul.msk.bf16.vlgmr.msra.gmra.mxu3 %vm1346_vm3, %v5143_v49  ;;  %v4182_v49 = vadd.f32 %v9824_v56, %v10108_v31  ;;  %v4184_v14 = vadd.f32 %v9869_v62, %v10125_v63 }
 0x69a   :  { %v4251_v1 = vpop.f32.mrf.mxu2  ;;  %v10137_v20 = vpop.f32.mrf.mxu3 }
 0x69b   :  { %v4271_v42 = vadd.f32 %v4251_v1, %v4177_v19  ;;  %v4692_v19 = vld [vmem:[#allocation2 + $0xcf8] sm:$0xff] }
 0x69c   :  { %v5142_v1 = vld [vmem:[#allocation2 + $0x7f8] sm:$0xff]  ;;  %v4696_v56 = vpack.c.bf16 %v4692_v19, %v4691_v35 }
 0x69d   :  { %v10135_v3 = vadd.f32 %v10052_v57, %v4271_v42  ;;  %v7875_v57 = vld [vmem:[%s11033_s3 + $0x80] sm:$0xff]  ;;  %v7902_v42 = vld [vmem:[%s11036_s5 + $0x38] sm:$0xff]  ;;  %v5146_v31 = vpack.c.bf16 %v5142_v1, %v5141_v2 }
 0x69e   :  { %5105 = vmatpush.bf16.msra.mxu2 %v7875_v57  ;;  %5620 = vmatpush.bf16.msrb.mxu1 %v7902_v42  ;;  %v7887_v2 = vld [vmem:[%s11033_s3 + $0xe0] sm:$0xff] }
 0x69f   :  { %v4459_v62 = vadd.f32 %v9884_v45, %v10135_v3 }
 0x6a2   :  { %v4253_v47 = vpop.f32.mrf.mxu2  ;;  %v10152_v34 = vpop.f32.mrf.mxu3  ;;  %5382 = vmatpush.bf16.msrb.mxu2 %v7890_v43  ;;  %v5418_v43 = vld [vmem:[#allocation2 + $0xfb8] sm:$0xff] }
 0x6a3   :  { %v4272_v22 = vadd.f32 %v4253_v47, %v4178_v46  ;;  %v7901_v47 = vld [vmem:[%s11036_s5 + $0x30] sm:$0xff] }
 0x6a4   :  { %5621 = vmatpush.bf16.msrb.mxu1 %v7901_v47 }
 0x6a5   :  { %v10142_v33 = vadd.f32 %v10058_v16, %v4272_v22  ;;  %v4179_v16 = vadd.f32 %v9776_v50, %v10076_v15  ;;  %v4183_v22 = vadd.f32 %v9843_v39, %v10119_v12 }
 0x6a7   :  { %7354 = vmatmul.msk.bf16.gmra.mxu2 %vm1346_vm3, %v4694_v21  ;;  %7434 = vmatmul.msk.bf16.gmra.mxu3 %vm1346_vm3, %v5144_v61  ;;  %v7899_v61 = vld [vmem:[%s11036_s5 + $0x20] sm:$0xff]  ;;  %v4460_v45 = vadd.f32 %v9901_v48, %v10142_v33  ;;  %v5560_v48 = vld [vmem:[#allocation3 + $0x278] sm:$0xff] }
 0x6a8   :  { %5622 = vmatpush.bf16.msrb.mxu1 %v7900_v58  ;;  %v5047_v58 = vld [vmem:[#allocation2 + $0x3d8] sm:$0xff] }
 0x6aa   :  { %v4256_v41 = vpop.f32.mrf.mxu2  ;;  %v10167_v50 = vpop.f32.mrf.mxu3 }
 0x6ab   :  { %v4273_v32 = vadd.f32 %v4256_v41, %v4179_v16  ;;  %v5043_v41 = vld [vmem:[#allocation2 + $0x398] sm:$0xff] }
 0x6ac   :  { %5623 = vmatpush.bf16.msrb.mxu1 %v7899_v61 }
 0x6ad   :  { %v10157_v17 = vadd.f32 %v10072_v44, %v4273_v32  ;;  %v4689_v44 = vld [vmem:[#allocation2 + $0xcc8] sm:$0xff]  ;;  %v5416_v32 = vld [vmem:[#allocation2 + $0xf98] sm:$0xff] }
 0x6ae   :  { %v4695_v40 = vpack.c.bf16 %v4690_v59, %v4689_v44  ;;  %v5050_v59 = vpack.c.bf16 %v5043_v41, %v5042_v53  ;;  %v7888_v44 = vld [vmem:[%s11033_s3 + $0xe8] sm:$0xff] }
 0x6af   :  { %v4461_v33 = vadd.f32 %v9920_v0, %v10157_v17 }
 0x6b2   :  { %v4258_v15 = vpop.f32.mrf.mxu2  ;;  %v10182_v29 = vpop.f32.mrf.mxu3 }
 0x6b3   :  { %v4274_v52 = vadd.f32 %v4258_v15, %v4180_v26  ;;  %v5415_v26 = vld [vmem:[#allocation2 + $0xf88] sm:$0xff] }
 0x6b5   :  { %v10170_v37 = vadd.f32 %v10084_v27, %v4274_v52 }
 0x6b7   :  { %7355 = vmatmul.msk.bf16.gmra.mxu2 %vm1346_vm3, %v4695_v40  ;;  %7435 = vmatmul.msk.bf16.gmra.mxu3 %vm1346_vm3, %v5145_v30 }
 0x6ba   :  { %v4261_v27 = vpop.f32.mrf.mxu2  ;;  %v10200_v25 = vpop.f32.mrf.mxu3 }
 0x6bb   :  { %v4275_v8 = vadd.f32 %v4261_v27, %v4181_v7 }
 0x6bd   :  { %v10185_v28 = vadd.f32 %v10098_v24, %v4275_v8  ;;  %v10195_v24 = vpop.f32.mrf.mxu1 }
 0x6c2   :  { %v4263_v18 = vpop.f32.mrf.mxu2  ;;  %v10220_v12 = vpop.f32.mrf.mxu3 }
 0x6c3   :  { %v4276_v46 = vadd.f32 %v4263_v18, %v4182_v49  ;;  %v5417_v49 = vld [vmem:[#allocation2 + $0xfa8] sm:$0xff] }
 0x6c4   :  { %v5424_v1 = vpack.c.bf16 %v5418_v43, %v5417_v49 }
 0x6c5   :  { %v10198_v54 = vadd.f32 %v10104_v36, %v4276_v46  ;;  %v7889_v36 = vld [vmem:[%s11033_s3 + $0xf0] sm:$0xff]  ;;  %v10218_v39 = vpop.f32.mrf.mxu1 }
 0x6c6   :  { %5383 = vmatpush.bf16.msrb.mxu2 %v7889_v36  ;;  %v5419_v36 = vld [vmem:[#allocation2 + $0xfc8] sm:$0xff] }
 0x6c7   :  { %7356 = vmatmul.msk.bf16.gmra.mxu2 %vm1346_vm3, %v4696_v56  ;;  %7436 = vmatmul.msk.bf16.gmra.mxu3 %vm1346_vm3, %v5146_v31 }
 0x6ca   :  { %v4266_v60 = vpop.f32.mrf.mxu2  ;;  %v10233_v63 = vpop.f32.mrf.mxu3  ;;  %5384 = vmatpush.bf16.msrb.mxu2 %v7888_v44  ;;  %v7910_v44 = vld [vmem:[%s11036_s5 + $0x78] sm:$0xff] }
 0x6cb   :  { %v4277_v21 = vadd.f32 %v4266_v60, %v4183_v22  ;;  %v4462_v22 = vadd.f32 %v9935_v51, %v10170_v37  ;;  %5863 = vmatpush.bf16.msra.mxu1 %v7910_v44  ;;  %v5804_v44 = vld [vmem:[#allocation3 + $0x197] sm:$0xff] }
 0x6cd   :  { %v10216_v57 = vadd.f32 %v10115_v9, %v4277_v21  ;;  %v5423_v9 = vpack.c.bf16 %v5416_v32, %v5415_v26  ;;  %v10229_v5 = vpop.f32.mrf.mxu1  ;;  %v5420_v21 = vld [vmem:[#allocation2 + $0xfd8] sm:$0xff] }
 0x6ce   :  { %5385 = vmatpush.bf16.msrb.mxu2 %v7887_v2  ;;  %v5425_v32 = vpack.c.bf16 %v5420_v21, %v5419_v36  ;;  %v5322_v36 = vld [vmem:[#allocation2 + $0xb88] sm:$0xff] }
 0x6d2   :  { %v4268_v16 = vpop.f32.mrf.mxu2  ;;  %v10254_v8 = vpop.f32.mrf.mxu3 }
 0x6d3   :  { %v4278_v55 = vadd.f32 %v4268_v16, %v4184_v14  ;;  %v5046_v14 = vld [vmem:[#allocation2 + $0x3c8] sm:$0xff] }
 0x6d4   :  { %v5052_v41 = vpack.c.bf16 %v5047_v58, %v5046_v14 }
 0x6d5   :  { %v10225_v15 = vadd.f32 %v10122_v23, %v4278_v55  ;;  %v10252_v7 = vpop.f32.mrf.mxu1 }
 0x6d7   :  { %7413 = vmatmul.msk.bf16.vlgmr.msra.gmra.mxu2 %vm1346_vm3, %v5050_v59  ;;  %7493 = vmatmul.msk.bf16.vlgmr.msrb.gmra.mxu3 %vm1346_vm3, %v5423_v9 }
 0x6da   :  { %v4533_v52 = vpop.f32.mrf.mxu2  ;;  %v10277_v0 = vpop.f32.mrf.mxu3 }
 0x6db   :  { %v4553_v23 = vadd.f32 %v4533_v52, %v4459_v62 }
 0x6dd   :  { %v4647_v40 = vadd.f32 %v10137_v20, %v4553_v23  ;;  %v5044_v20 = vld [vmem:[#allocation2 + $0x3a8] sm:$0xff]  ;;  %v10274_v56 = vpop.f32.mrf.mxu1 }
 0x6de   :  { %v5051_v19 = vpack.c.bf16 %v5045_v38, %v5044_v20  ;;  %v5422_v38 = vld [vmem:[#allocation2 + $0xff8] sm:$0xff]  ;;  %v5048_v20 = vld [vmem:[#allocation2 + $0x3e8] sm:$0xff] }
 0x6df   :  { %v4659_v30 = vadd.f32 %v10241_v10, %v4647_v40 }
 0x6e1   :  { %7309 = vst.msk [vmem:[%s11035_s8 + $0x80] sm:$0xff] %vm1346_vm3, %v4659_v30 }
 0x6e2   :  { %4677 = vst.msk [vmem:[#allocation3 + $0x288] sm:$0xff] %vm1346_vm3, %v4659_v30  ;;  %v4535_v3 = vpop.f32.mrf.mxu2  ;;  %v10297_v37 = vpop.f32.mrf.mxu3 }
 0x6e3   :  { %v4554_v27 = vadd.f32 %v4535_v3, %v4460_v45  ;;  %v5049_v45 = vld [vmem:[#allocation2 + $0x3f8] sm:$0xff]  ;;  %v5421_v3 = vld [vmem:[#allocation2 + $0xfe8] sm:$0xff] }
 0x6e5   :  { %v4648_v18 = vadd.f32 %v10152_v34, %v4554_v27  ;;  %v10292_v53 = vpop.f32.mrf.mxu1 }
 0x6e7   :  { %v4660_v42 = vadd.f32 %v10241_v10, %v4648_v18  ;;  %7414 = vmatmul.msk.bf16.gmra.mxu2 %vm1346_vm3, %v5051_v19  ;;  %7494 = vmatmul.msk.bf16.gmra.mxu3 %vm1346_vm3, %v5424_v1  ;;  %v5053_v18 = vpack.c.bf16 %v5049_v45, %v5048_v20  ;;  %v5426_v19 = vpack.c.bf16 %v5422_v38, %v5421_v3  ;;  %v5327_v38 = vld [vmem:[#allocation2 + $0xbd8] sm:$0xff] }
 0x6e9   :  { %7310 = vst.msk [vmem:[%s11035_s8 + $0x88] sm:$0xff] %vm1346_vm3, %v4660_v42  ;;  %v10266_v46 = vld [vmem:[#allocation3 + $0x288] sm:$0xff] }
 0x6ea   :  { %4678 = vst.msk [vmem:[#allocation3 + $0x298] sm:$0xff] %vm1346_vm3, %v4660_v42  ;;  %v4538_v34 = vpop.f32.mrf.mxu2  ;;  %v5568_v35 = vpack.c.bf16 %v10266_v46, %v5560_v48  ;;  %v10327_v40 = vpop.f32.mrf.mxu3  ;;  %v7907_v48 = vld [vmem:[%s11036_s5 + $0x60] sm:$0xff] }
 0x6eb   :  { %v4555_v47 = vadd.f32 %v4538_v34, %v4461_v33 }
 0x6ec   :  { %7521 = vmatmul.msk.bf16.vlgmr.msrb.gmra.mxu1 %vm1346_vm3, %v5568_v35 }
 0x6ed   :  { %v4649_v31 = vadd.f32 %v10167_v50, %v4555_v47 }
 0x6ef   :  { %v4661_v17 = vadd.f32 %v10241_v10, %v4649_v31  ;;  %v4466_v31 = vadd.f32 %v10027_v6, %v10225_v15 }
 0x6f1   :  { %7311 = vst.msk [vmem:[%s11035_s8 + $0x90] sm:$0xff] %vm1346_vm3, %v4661_v17  ;;  %v10287_v50 = vld [vmem:[#allocation3 + $0x298] sm:$0xff] }
 0x6f2   :  { %4679 = vst.msk [vmem:[#allocation3 + $0x2a8] sm:$0xff] %vm1346_vm3, %v4661_v17  ;;  %v4540_v60 = vpop.f32.mrf.mxu2  ;;  %v6183_v55 = vpack.c.bf16 %v10287_v50, %v10266_v46  ;;  %v10357_v47 = vpop.f32.mrf.mxu3 }
 0x6f3   :  { %v4556_v61 = vadd.f32 %v4540_v60, %v4462_v22  ;;  %v5323_v22 = vld [vmem:[#allocation2 + $0xb98] sm:$0xff] }
 0x6f5   :  { %v4650_v16 = vadd.f32 %v10182_v29, %v4556_v61  ;;  %v4463_v29 = vadd.f32 %v9958_v4, %v10185_v28  ;;  %v7909_v4 = vld [vmem:[%s11036_s5 + $0x70] sm:$0xff]  ;;  %v10319_v28 = vpop.f32.mrf.mxu1  ;;  %v5330_v61 = vpack.c.bf16 %v5323_v22, %v5322_v36 }
 0x6f6   :  { %5864 = vmatpush.bf16.msra.mxu1 %v7909_v4 }
 0x6f7   :  { %v4662_v51 = vadd.f32 %v10241_v10, %v4650_v16  ;;  %7415 = vmatmul.msk.bf16.gmra.mxu2 %vm1346_vm3, %v5052_v41  ;;  %7495 = vmatmul.msk.bf16.gmra.mxu3 %vm1346_vm3, %v5425_v32 }
 0x6f9   :  { %7312 = vst.msk [vmem:[%s11035_s8 + $0x98] sm:$0xff] %vm1346_vm3, %v4662_v51  ;;  %v10305_v26 = vld [vmem:[#allocation3 + $0x2a8] sm:$0xff] }
 0x6fa   :  { %4680 = vst.msk [vmem:[#allocation3 + $0x2b8] sm:$0xff] %vm1346_vm3, %v4662_v51  ;;  %v4543_v59 = vpop.f32.mrf.mxu2  ;;  %v5569_v9 = vpack.c.bf16 %v10305_v26, %v10287_v50  ;;  %v4930_v14 = vpop.f32.mrf.mxu3 }
 0x6fb   :  { %v4557_v62 = vadd.f32 %v4543_v59, %v4463_v29 }
 0x6fc   :  { %7522 = vmatmul.msk.bf16.gmra.mxu1 %vm1346_vm3, %v5569_v9  ;;  %v5325_v9 = vld [vmem:[#allocation2 + $0xbb8] sm:$0xff] }
 0x6fd   :  { %v4651_v52 = vadd.f32 %v10200_v25, %v4557_v62  ;;  %v4464_v25 = vadd.f32 %v9994_v11, %v10198_v54  ;;  %v7908_v11 = vld [vmem:[%s11036_s5 + $0x68] sm:$0xff]  ;;  %v10355_v35 = vpop.f32.mrf.mxu1 }
 0x6fe   :  { %5865 = vmatpush.bf16.msra.mxu1 %v7908_v11  ;;  %v5324_v62 = vld [vmem:[#allocation2 + $0xba8] sm:$0xff] }
 0x6ff   :  { %v4663_v23 = vadd.f32 %v10241_v10, %v4651_v52  ;;  %v5331_v52 = vpack.c.bf16 %v5325_v9, %v5324_v62  ;;  %v5805_v11 = vld [vmem:[#allocation3 + $0x1a7] sm:$0xff] }
 0x700   :  { %v5809_v9 = vld [vmem:[#allocation3 + $0x1e7] sm:$0xff] }
 0x701   :  { %7313 = vst.msk [vmem:[%s11035_s8 + $0xa0] sm:$0xff] %vm1346_vm3, %v4663_v23  ;;  %v10330_v27 = vld [vmem:[#allocation3 + $0x2b8] sm:$0xff] }
 0x702   :  { %4681 = vst.msk [vmem:[#allocation3 + $0x2c8] sm:$0xff] %vm1346_vm3, %v4663_v23  ;;  %v4545_v30 = vpop.f32.mrf.mxu2  ;;  %v6184_v54 = vpack.c.bf16 %v10330_v27, %v10305_v26  ;;  %5866 = vmatpush.bf16.msra.mxu1 %v7907_v48  ;;  %v10394_v29 = vpop.f32.mrf.mxu3 }
 0x703   :  { %v4558_v43 = vadd.f32 %v4545_v30, %v4464_v25 }
 0x705   :  { %v4652_v49 = vadd.f32 %v10220_v12, %v4558_v43  ;;  %v4465_v12 = vadd.f32 %v10008_v13, %v10216_v57 }
 0x707   :  { %v4664_v1 = vadd.f32 %v10241_v10, %v4652_v49  ;;  %7416 = vmatmul.msk.bf16.gmra.mxu2 %vm1346_vm3, %v5053_v18  ;;  %7496 = vmatmul.msk.bf16.gmra.mxu3 %vm1346_vm3, %v5426_v19  ;;  %v5326_v49 = vld [vmem:[#allocation2 + $0xbc8] sm:$0xff]  ;;  %v5806_v19 = vld [vmem:[#allocation3 + $0x1b7] sm:$0xff] }
 0x708   :  { %v5332_v18 = vpack.c.bf16 %v5327_v38, %v5326_v49  ;;  %v7896_v49 = vld [vmem:[%s11036_s5 + $0x8] sm:$0xff] }
 0x709   :  { %7314 = vst.msk [vmem:[%s11035_s8 + $0xa8] sm:$0xff] %vm1346_vm3, %v4664_v1  ;;  %v10347_v42 = vld [vmem:[#allocation3 + $0x2c8] sm:$0xff] }
 0x70a   :  { %4682 = vst.msk [vmem:[#allocation3 + $0x2d8] sm:$0xff] %vm1346_vm3, %v4664_v1  ;;  %v4548_v33 = vpop.f32.mrf.mxu2  ;;  %v5570_v34 = vpack.c.bf16 %v10347_v42, %v10330_v27  ;;  %v4935_v4 = vpop.f32.mrf.mxu3 }
 0x70b   :  { %v4559_v2 = vadd.f32 %v4548_v33, %v4465_v12 }
 0x70c   :  { %7523 = vmatmul.msk.bf16.gmra.mxu1 %vm1346_vm3, %v5570_v34 }
 0x70d   :  { %v4653_v13 = vadd.f32 %v10233_v63, %v4559_v2  ;;  %v10371_v63 = vpop.f32.mrf.mxu1  ;;  %v5329_v2 = vld [vmem:[#allocation2 + $0xbf8] sm:$0xff] }
 0x70f   :  { %v4665_v57 = vadd.f32 %v10241_v10, %v4653_v13  ;;  %v5328_v13 = vld [vmem:[#allocation2 + $0xbe8] sm:$0xff] }
 0x711   :  { %7315 = vst.msk [vmem:[%s11035_s8 + $0xb0] sm:$0xff] %vm1346_vm3, %v4665_v57  ;;  %v10369_v58 = vld [vmem:[#allocation3 + $0x2d8] sm:$0xff] }
 0x712   :  { %4683 = vst.msk [vmem:[#allocation3 + $0x2e8] sm:$0xff] %vm1346_vm3, %v4665_v57  ;;  %v4550_v17 = vpop.f32.mrf.mxu2  ;;  %v6185_v16 = vpack.c.bf16 %v10369_v58, %v10347_v42  ;;  %v10410_v20 = vpop.f32.mrf.mxu3  ;;  %v5333_v57 = vpack.c.bf16 %v5329_v2, %v5328_v13  ;;  %v7895_v2 = vld [vmem:[%s11036_s5] sm:$0xff] }
 0x713   :  { %v4560_v60 = vadd.f32 %v4550_v17, %v4466_v31  ;;  %v5808_v17 = vld [vmem:[#allocation3 + $0x1d7] sm:$0xff]  ;;  %v7903_v13 = vld [vmem:[%s11036_s5 + $0x40] sm:$0xff] }
 0x715   :  { %v4654_v21 = vadd.f32 %v10254_v8, %v4560_v60  ;;  %v10392_v51 = vpop.f32.mrf.mxu1 }
 0x717   :  { %v4666_v41 = vadd.f32 %v10241_v10, %v4654_v21  ;;  %7473 = vmatmul.msk.bf16.vlgmr.msrb.gmra.mxu2 %vm1346_vm3, %v5330_v61 }
 0x719   :  { %7316 = vst.msk [vmem:[%s11035_s8 + $0xb8] sm:$0xff] %vm1346_vm3, %v4666_v41  ;;  %v10382_v6 = vld [vmem:[#allocation3 + $0x2e8] sm:$0xff] }
 0x71a   :  { %4684 = vst.msk [vmem:[#allocation3 + $0x2f8] sm:$0xff] %vm1346_vm3, %v4666_v41  ;;  %v4835_v15 = vpop.f32.mrf.mxu2  ;;  %v5571_v8 = vpack.c.bf16 %v10382_v6, %v10369_v58  ;;  %v10419_v33 = vpop.f32.mrf.mxu3  ;;  %v7906_v41 = vld [vmem:[%s11036_s5 + $0x58] sm:$0xff] }
 0x71b   :  { %v4836_v32 = vadd.f32 %v4835_v15, %v10195_v24  ;;  %v5803_v24 = vld [vmem:[#allocation3 + $0x187] sm:$0xff]  ;;  %5770 = vmatpush.bf16.msra.mxu3 %v7906_v41 }
 0x71c   :  { %7524 = vmatmul.msk.bf16.gmra.mxu1 %vm1346_vm3, %v5571_v8  ;;  %v5811_v30 = vpack.c.bf16 %v5804_v44, %v5803_v24 }
 0x71d   :  { %v10390_v10 = vadd.f32 %v10277_v0, %v4836_v32  ;;  %v10399_v23 = vpop.f32.mrf.mxu1 }
 0x71f   :  { %v5033_v41 = vadd.f32 %v10371_v63, %v10390_v10  ;;  %v7919_v10 = vld [vmem:[%s11036_s5 + $0xc0] sm:$0xff] }
 0x722   :  { %v10396_v59 = vpop.f32.mrf.mxu2  ;;  %v10426_v22 = vpop.f32.mrf.mxu3 }
 0x725   :  { %v10408_v43 = vpop.f32.mrf.mxu1 }
 0x727   :  { %7474 = vmatmul.msk.bf16.gmra.mxu2 %vm1346_vm3, %v5331_v52 }
 0x72a   :  { %v4840_v25 = vpop.f32.mrf.mxu2  ;;  %v10440_v8 = vpop.f32.mrf.mxu3 }
 0x72b   :  { %v4841_v0 = vadd.f32 %v4840_v25, %v10229_v5  ;;  %v5812_v5 = vpack.c.bf16 %v5806_v19, %v5805_v11  ;;  %v7905_v25 = vld [vmem:[%s11036_s5 + $0x50] sm:$0xff] }
 0x72c   :  { %7581 = vmatmul.msk.bf16.vlgmr.msra.gmra.mxu1 %vm1346_vm3, %v5811_v30  ;;  %5771 = vmatpush.bf16.msra.mxu3 %v7905_v25  ;;  %v7920_v25 = vld [vmem:[%s11036_s5 + $0xc8] sm:$0xff] }
 0x72d   :  { %v10404_v45 = vadd.f32 %v10327_v40, %v4841_v0  ;;  %v10415_v40 = vpop.f32.mrf.mxu1 }
 0x732   :  { %v10406_v3 = vpop.f32.mrf.mxu2  ;;  %v10446_v24 = vpop.f32.mrf.mxu3 }
 0x735   :  { %v10423_v31 = vpop.f32.mrf.mxu1 }
 0x737   :  { %7475 = vmatmul.msk.bf16.gmra.mxu2 %vm1346_vm3, %v5332_v18  ;;  %v7904_v18 = vld [vmem:[%s11036_s5 + $0x48] sm:$0xff] }
 0x738   :  { %5772 = vmatpush.bf16.msra.mxu3 %v7904_v18 }
 0x73a   :  { %v4845_v1 = vpop.f32.mrf.mxu2  ;;  %v10455_v0 = vpop.f32.mrf.mxu3 }
 0x73b   :  { %v4846_v12 = vadd.f32 %v4845_v1, %v10274_v56  ;;  %v5807_v56 = vld [vmem:[#allocation3 + $0x1c7] sm:$0xff] }
 0x73c   :  { %7582 = vmatmul.msk.bf16.gmra.mxu1 %vm1346_vm3, %v5812_v5  ;;  %v5813_v36 = vpack.c.bf16 %v5808_v17, %v5807_v56  ;;  %5773 = vmatpush.bf16.msra.mxu3 %v7903_v13 }
 0x73d   :  { %v10417_v48 = vadd.f32 %v4930_v14, %v4846_v12  ;;  %v7898_v14 = vld [vmem:[%s11036_s5 + $0x18] sm:$0xff]  ;;  %v10438_v15 = vpop.f32.mrf.mxu1 }
 0x73e   :  { %5685 = vmatpush.bf16.msra.mxu2 %v7898_v14  ;;  %v4838_v14 = vadd.f32 %v10396_v59, %v10218_v39  ;;  %v7918_v39 = vld [vmem:[%s11036_s5 + $0xb8] sm:$0xff] }
 0x740   :  { %6049 = vmatpush.bf16.msrb.mxu3 %v7918_v39  ;;  %v5539_v39 = vld [vmem:[#allocation3 + $0x377] sm:$0xff] }
 0x742   :  { %v10421_v34 = vpop.f32.mrf.mxu2  ;;  %v10463_v19 = vpop.f32.mrf.mxu3 }
 0x745   :  { %v10444_v44 = vpop.f32.mrf.mxu1 }
 0x747   :  { %7476 = vmatmul.msk.bf16.gmra.mxu2 %vm1346_vm3, %v5333_v57 }
 0x74a   :  { %v4850_v60 = vpop.f32.mrf.mxu2  ;;  %v10467_v1 = vpop.f32.mrf.mxu3 }
 0x74b   :  { %v4851_v21 = vadd.f32 %v4850_v60, %v10319_v28  ;;  %v5810_v28 = vld [vmem:[#allocation3 + $0x1f7] sm:$0xff] }
 0x74c   :  { %7583 = vmatmul.msk.bf16.gmra.mxu1 %vm1346_vm3, %v5813_v36  ;;  %v5814_v52 = vpack.c.bf16 %v5810_v28, %v5809_v9  ;;  %v7922_v60 = vld [vmem:[%s11036_s5 + $0xd8] sm:$0xff]  ;;  %v7921_v36 = vld [vmem:[%s11036_s5 + $0xd0] sm:$0xff] }
 0x74d   :  { %v10430_v61 = vadd.f32 %v4935_v4, %v4851_v21  ;;  %v7897_v4 = vld [vmem:[%s11036_s5 + $0x10] sm:$0xff]  ;;  %v5293_v17 = vpop.f32.mrf.mxu1  ;;  %6142 = vmatpush.bf16.msrb.mxu1 %v7922_v60  ;;  %v10513_v60 = vld [vmem:[%s11034_s4] ss:$0 sm:$0xff] }
 0x74e   :  { %5686 = vmatpush.bf16.msra.mxu2 %v7897_v4  ;;  %v4941_v4 = vadd.f32 %v10297_v37, %v4838_v14 }
 0x750   :  { %v5034_v37 = vadd.f32 %v10392_v51, %v4941_v4  ;;  %v5035_v51 = vadd.f32 %v10399_v23, %v10404_v45  ;;  %v7917_v23 = vld [vmem:[%s11036_s5 + $0xb0] sm:$0xff] }
 0x751   :  { %6143 = vmatpush.bf16.msrb.mxu1 %v7921_v36  ;;  %6050 = vmatpush.bf16.msrb.mxu3 %v7917_v23 }
 0x752   :  { %v10442_v32 = vpop.f32.mrf.mxu2  ;;  %5687 = vmatpush.bf16.msra.mxu2 %v7896_v49  ;;  %v10479_v57 = vpop.f32.mrf.mxu3 }
 0x755   :  { %v5295_v59 = vpop.f32.mrf.mxu1  ;;  %6144 = vmatpush.bf16.msrb.mxu1 %v7920_v25 }
 0x756   :  { %5688 = vmatpush.bf16.msra.mxu2 %v7895_v2 }
 0x759   :  { %6145 = vmatpush.bf16.msrb.mxu1 %v7919_v10 }
 0x75a   :  { %v5107_v62 = vpop.f32.mrf.mxu2  ;;  %v5480_v21 = vpop.f32.mrf.mxu3 }
 0x75b   :  { %v5127_v28 = vadd.f32 %v5107_v62, %v5033_v41  ;;  %v4843_v41 = vadd.f32 %v10406_v3, %v10252_v7  ;;  %v7913_v7 = vld [vmem:[%s11036_s5 + $0x90] sm:$0xff] }
 0x75c   :  { %7584 = vmatmul.msk.bf16.gmra.mxu1 %vm1346_vm3, %v5814_v52  ;;  %v7914_v52 = vld [vmem:[%s11036_s5 + $0x98] sm:$0xff] }
 0x75d   :  { %5956 = vmatpush.bf16.msrb.mxu2 %v7914_v52  ;;  %v5220_v63 = vadd.f32 %v10419_v33, %v5127_v28  ;;  %v5298_v14 = vpop.f32.mrf.mxu1  ;;  %v4943_v45 = vadd.f32 %v10357_v47, %v4843_v41 }
 0x75f   :  { %v5313_v18 = vadd.f32 %v5293_v17, %v5220_v63  ;;  %v5036_v4 = vadd.f32 %v10408_v43, %v4943_v45 }
 0x761   :  { %5957 = vmatpush.bf16.msrb.mxu2 %v7913_v7 }
 0x762   :  { %v5109_v30 = vpop.f32.mrf.mxu2  ;;  %v5482_v62 = vpop.f32.mrf.mxu3 }
 0x763   :  { %v5128_v49 = vadd.f32 %v5109_v30, %v5034_v37 }
 0x765   :  { %v5221_v33 = vadd.f32 %v10426_v22, %v5128_v49  ;;  %v5300_v63 = vpop.f32.mrf.mxu1 }
 0x767   :  { %v5314_v28 = vadd.f32 %v5295_v59, %v5221_v33  ;;  %v5710_v59 = vld [vmem:[#allocation3 + $0x378] sm:$0xff]  ;;  %v4848_v33 = vadd.f32 %v10421_v34, %v10292_v53  ;;  %v7912_v53 = vld [vmem:[%s11036_s5 + $0x88] sm:$0xff] }
 0x768   :  { %5958 = vmatpush.bf16.msrb.mxu2 %v7912_v53 }
 0x76a   :  { %v5112_v38 = vpop.f32.mrf.mxu2  ;;  %v5485_v52 = vpop.f32.mrf.mxu3 }
 0x76b   :  { %v5129_v17 = vadd.f32 %v5112_v38, %v5035_v51 }
 0x76d   :  { %v5222_v38 = vadd.f32 %v10440_v8, %v5129_v17  ;;  %v5303_v17 = vpop.f32.mrf.mxu1 }
 0x76f   :  { %v5315_v47 = vadd.f32 %v5298_v14, %v5222_v38 }
 0x772   :  { %v10465_v11 = vpop.f32.mrf.mxu2 }
 0x773   :  { %v5130_v10 = vadd.f32 %v10465_v11, %v5036_v4 }
 0x775   :  { %v5223_v11 = vadd.f32 %v10446_v24, %v5130_v10 }
 0x777   :  { %v5316_v51 = vadd.f32 %v5300_v63, %v5223_v11  ;;  %v7915_v63 = vld [vmem:[%s11036_s5 + $0xa0] sm:$0xff] }
 0x77a   :  { %v10469_v5 = vpop.f32.mrf.mxu2 }
 0x782   :  { %v10471_v12 = vpop.f32.mrf.mxu2 }
 0x78a   :  { %v10481_v56 = vpop.f32.mrf.mxu2 }
 0x792   :  { %v10493_v9 = vpop.f32.mrf.mxu2 }
 0x79a   :  { %v5387_v2 = vpop.f32.mrf.mxu2 }
 0x79b   :  { %v5407_v13 = vadd.f32 %v5387_v2, %v5313_v18  ;;  %v5487_v2 = vpop.f32.mrf.mxu3 }
 0x79d   :  { %v5500_v36 = vadd.f32 %v5480_v21, %v5407_v13 }
 0x79f   :  { %v5512_v30 = vadd.f32 %v10513_v60, %v5500_v36  ;;  %v5037_v36 = vadd.f32 %v10415_v40, %v10417_v48  ;;  %v7916_v40 = vld [vmem:[%s11036_s5 + $0xa8] sm:$0xff]  ;;  %v4945_v48 = vadd.f32 %v10394_v29, %v4848_v33 }
 0x7a0   :  { %6051 = vmatpush.bf16.msrb.mxu3 %v7916_v40  ;;  %v7930_v40 = vld [vmem:[%s11036_s5 + $0x118] sm:$0xff] }
 0x7a1   :  { %7497 = vst.msk [vmem:[%s11035_s8 + $0xc0] sm:$0xff] %vm1346_vm3, %v5512_v30  ;;  %v5131_v41 = vadd.f32 %v10469_v5, %v5037_v36  ;;  %v5038_v45 = vadd.f32 %v10423_v31, %v4945_v48 }
 0x7a2   :  { %5530 = vst.msk [vmem:[#allocation3 + $0x388] sm:$0xff] %vm1346_vm3, %v5512_v30  ;;  %v5389_v22 = vpop.f32.mrf.mxu2 }
 0x7a3   :  { %v5408_v3 = vadd.f32 %v5389_v22, %v5314_v28  ;;  %v5490_v7 = vpop.f32.mrf.mxu3  ;;  %v5132_v29 = vadd.f32 %v10471_v12, %v5038_v45  ;;  %v7911_v12 = vld [vmem:[%s11036_s5 + $0x80] sm:$0xff] }
 0x7a4   :  { %5959 = vmatpush.bf16.msrb.mxu2 %v7911_v12  ;;  %6052 = vmatpush.bf16.msrb.mxu3 %v7915_v63 }
 0x7a5   :  { %v5501_v21 = vadd.f32 %v5482_v62, %v5408_v3  ;;  %v5225_v10 = vadd.f32 %v10463_v19, %v5132_v29 }
 0x7a7   :  { %v5513_v25 = vadd.f32 %v10513_v60, %v5501_v21 }
 0x7a9   :  { %7498 = vst.msk [vmem:[%s11035_s8 + $0xc8] sm:$0xff] %vm1346_vm3, %v5513_v25  ;;  %v5540_v37 = vld [vmem:[#allocation3 + $0x387] sm:$0xff] }
 0x7aa   :  { %v10541_v49 = vld [vmem:[#allocation3 + $0x388] sm:$0xff]  ;;  %5531 = vst.msk [vmem:[#allocation3 + $0x398] sm:$0xff] %vm1346_vm3, %v5513_v25  ;;  %v5392_v8 = vpop.f32.mrf.mxu2  ;;  %v5547_v43 = vpack.c.bf16 %v5540_v37, %v5539_v39 }
 0x7ab   :  { %v5718_v62 = vpack.c.bf16 %v10541_v49, %v5710_v59  ;;  %v5409_v18 = vadd.f32 %v5392_v8, %v5315_v47  ;;  %v5305_v59 = vpop.f32.mrf.mxu1  ;;  %v5039_v8 = vadd.f32 %v10438_v15, %v10430_v61 }
 0x7ac   :  { %7541 = vmatmul.msk.bf16.vlgmr.msra.gmra.mxu2 %vm1346_vm3, %v5547_v43  ;;  %v5318_v19 = vadd.f32 %v5305_v59, %v5225_v10  ;;  %v7929_v10 = vld [vmem:[%s11036_s5 + $0x110] sm:$0xff] }
 0x7ad   :  { %7561 = vmatmul.msk.bf16.vlgmr.msra.gmra.mxu3 %vm1346_vm3, %v5718_v62  ;;  %v5502_v13 = vadd.f32 %v5485_v52, %v5409_v18  ;;  %v5224_v52 = vadd.f32 %v10455_v0, %v5131_v41  ;;  %v5492_v62 = vpop.f32.mrf.mxu3  ;;  %v5133_v18 = vadd.f32 %v10481_v56, %v5039_v8  ;;  %v5897_v8 = vld [vmem:[#allocation3 + $0x98] sm:$0xff] }
 0x7ae   :  { %6328 = vmatpush.bf16.msra.mxu3 %v7930_v40 }
 0x7af   :  { %v5514_v14 = vadd.f32 %v10513_v60, %v5502_v13  ;;  %v5317_v38 = vadd.f32 %v5303_v17, %v5224_v52  ;;  %v5226_v15 = vadd.f32 %v10467_v1, %v5133_v18  ;;  %v5989_v18 = vld [vmem:[#allocation3 + $0x188] sm:$0xff] }
 0x7b1   :  { %7499 = vst.msk [vmem:[%s11035_s8 + $0xd0] sm:$0xff] %vm1346_vm3, %v5514_v14  ;;  %v6083_v30 = vld [vmem:[#allocation3 + $0x397] sm:$0xff] }
 0x7b2   :  { %5532 = vst.msk [vmem:[#allocation3 + $0x3a8] sm:$0xff] %vm1346_vm3, %v5514_v14  ;;  %v5394_v24 = vpop.f32.mrf.mxu2  ;;  %v6090_v28 = vpack.c.bf16 %v6083_v30, %v5540_v37  ;;  %v10566_v5 = vld [vmem:[#allocation3 + $0x398] sm:$0xff]  ;;  %v4853_v37 = vadd.f32 %v10442_v32, %v10355_v35  ;;  %6329 = vmatpush.bf16.msra.mxu3 %v7929_v10 }
 0x7b3   :  { %v5410_v34 = vadd.f32 %v5394_v24, %v5316_v51  ;;  %v6276_v23 = vpack.c.bf16 %v10566_v5, %v10541_v49  ;;  %v5308_v33 = vpop.f32.mrf.mxu1 }
 0x7b4   :  { %7641 = vmatmul.msk.bf16.vlgmr.msrb.gmra.mxu1 %vm1346_vm3, %v6090_v28  ;;  %v4947_v35 = vadd.f32 %v10410_v20, %v4853_v37  ;;  %v5319_v20 = vadd.f32 %v5308_v33, %v5226_v15  ;;  %v5898_v15 = vld [vmem:[#allocation3 + $0xa8] sm:$0xff] }
 0x7b5   :  { %v5503_v22 = vadd.f32 %v5487_v2, %v5410_v34  ;;  %v5495_v1 = vpop.f32.mrf.mxu3 }
 0x7b6   :  { %v5040_v14 = vadd.f32 %v10444_v44, %v4947_v35  ;;  %v5899_v35 = vld [vmem:[#allocation3 + $0xb8] sm:$0xff] }
 0x7b7   :  { %v5515_v3 = vadd.f32 %v10513_v60, %v5503_v22  ;;  %v5905_v33 = vpack.c.bf16 %v5899_v35, %v5898_v15 }
 0x7b8   :  { %v5134_v51 = vadd.f32 %v10493_v9, %v5040_v14  ;;  %v7926_v9 = vld [vmem:[%s11036_s5 + $0xf8] sm:$0xff] }
 0x7b9   :  { %7500 = vst.msk [vmem:[%s11035_s8 + $0xd8] sm:$0xff] %vm1346_vm3, %v5515_v3  ;;  %v5542_v21 = vld [vmem:[#allocation3 + $0x3a7] sm:$0xff]  ;;  %6235 = vmatpush.bf16.msra.mxu2 %v7926_v9 }
 0x7ba   :  { %v10579_v0 = vld [vmem:[#allocation3 + $0x3a8] sm:$0xff]  ;;  %5533 = vst.msk [vmem:[#allocation3 + $0x3b8] sm:$0xff] %vm1346_vm3, %v5515_v3  ;;  %v5397_v4 = vpop.f32.mrf.mxu2  ;;  %v5548_v25 = vpack.c.bf16 %v5542_v21, %v6083_v30  ;;  %v5227_v48 = vadd.f32 %v10479_v57, %v5134_v51  ;;  %v7927_v51 = vld [vmem:[%s11036_s5 + $0x100] sm:$0xff] }
 0x7bb   :  { %v5719_v31 = vpack.c.bf16 %v10579_v0, %v10566_v5  ;;  %v5411_v39 = vadd.f32 %v5397_v4, %v5317_v38  ;;  %v5310_v22 = vpop.f32.mrf.mxu1 }
 0x7bc   :  { %7542 = vmatmul.msk.bf16.gmra.mxu2 %vm1346_vm3, %v5548_v25 }
 0x7bd   :  { %7562 = vmatmul.msk.bf16.gmra.mxu3 %vm1346_vm3, %v5719_v31  ;;  %v5504_v47 = vadd.f32 %v5490_v7, %v5411_v39  ;;  %v5320_v7 = vadd.f32 %v5310_v22, %v5227_v48  ;;  %v5497_v57 = vpop.f32.mrf.mxu3  ;;  %v5903_v48 = vld [vmem:[#allocation3 + $0xf8] sm:$0xff]  ;;  %v5995_v22 = vld [vmem:[#allocation3 + $0x1e8] sm:$0xff] }
 0x7bf   :  { %v5516_v43 = vadd.f32 %v10513_v60, %v5504_v47 }
 0x7c1   :  { %7501 = vst.msk [vmem:[%s11035_s8 + $0xe0] sm:$0xff] %vm1346_vm3, %v5516_v43  ;;  %v6085_v2 = vld [vmem:[#allocation3 + $0x3b7] sm:$0xff] }
 0x7c2   :  { %5534 = vst.msk [vmem:[#allocation3 + $0x3c8] sm:$0xff] %vm1346_vm3, %v5516_v43  ;;  %v5399_v11 = vpop.f32.mrf.mxu2  ;;  %v6091_v13 = vpack.c.bf16 %v6085_v2, %v5542_v21  ;;  %v10605_v61 = vld [vmem:[#allocation3 + $0x3b8] sm:$0xff] }
 0x7c3   :  { %v5412_v32 = vadd.f32 %v5399_v11, %v5318_v19  ;;  %v6277_v36 = vpack.c.bf16 %v10605_v61, %v10579_v0  ;;  %v5990_v43 = vld [vmem:[#allocation3 + $0x198] sm:$0xff]  ;;  %v7924_v11 = vld [vmem:[%s11036_s5 + $0xe8] sm:$0xff] }
 0x7c4   :  { %7642 = vmatmul.msk.bf16.gmra.mxu1 %vm1346_vm3, %v6091_v13  ;;  %v7928_v13 = vld [vmem:[%s11036_s5 + $0x108] sm:$0xff] }
 0x7c5   :  { %v5505_v56 = vadd.f32 %v5492_v62, %v5412_v32  ;;  %v5896_v62 = vld [vmem:[#allocation3 + $0x88] sm:$0xff]  ;;  %6330 = vmatpush.bf16.msra.mxu3 %v7928_v13  ;;  %v5992_v32 = vld [vmem:[#allocation3 + $0x1b8] sm:$0xff] }
 0x7c6   :  { %v5904_v19 = vpack.c.bf16 %v5897_v8, %v5896_v62 }
 0x7c7   :  { %v5517_v41 = vadd.f32 %v10513_v60, %v5505_v56  ;;  %v5991_v56 = vld [vmem:[#allocation3 + $0x1a8] sm:$0xff] }
 0x7c8   :  { %v5998_v14 = vpack.c.bf16 %v5992_v32, %v5991_v56 }
 0x7c9   :  { %7502 = vst.msk [vmem:[%s11035_s8 + $0xe8] sm:$0xff] %vm1346_vm3, %v5517_v41  ;;  %v5544_v30 = vld [vmem:[#allocation3 + $0x3c7] sm:$0xff]  ;;  %6331 = vmatpush.bf16.msra.mxu3 %v7927_v51 }
 0x7ca   :  { %v10618_v17 = vld [vmem:[#allocation3 + $0x3c8] sm:$0xff]  ;;  %5535 = vst.msk [vmem:[#allocation3 + $0x3d8] sm:$0xff] %vm1346_vm3, %v5517_v41  ;;  %v5402_v24 = vpop.f32.mrf.mxu2  ;;  %v5549_v28 = vpack.c.bf16 %v5544_v30, %v6085_v2  ;;  %v5997_v2 = vpack.c.bf16 %v5990_v43, %v5989_v18  ;;  %v7923_v41 = vld [vmem:[%s11036_s5 + $0xe0] sm:$0xff]  ;;  %v6182_v18 = vld [vmem:[#allocation3 + $0x2f8] sm:$0xff] }
 0x7cb   :  { %v5720_v44 = vpack.c.bf16 %v10618_v17, %v10605_v61  ;;  %v5413_v53 = vadd.f32 %v5402_v24, %v5319_v20  ;;  %v5625_v20 = vpop.f32.mrf.mxu1  ;;  %v5900_v24 = vld [vmem:[#allocation3 + $0xc8] sm:$0xff]  ;;  %v6186_v58 = vpack.c.bf16 %v6182_v18, %v10382_v6 }
 0x7cc   :  { %7543 = vmatmul.msk.bf16.gmra.mxu2 %vm1346_vm3, %v5549_v28  ;;  %v5993_v28 = vld [vmem:[#allocation3 + $0x1c8] sm:$0xff] }
 0x7cd   :  { %7563 = vmatmul.msk.bf16.gmra.mxu3 %vm1346_vm3, %v5720_v44  ;;  %v5506_v34 = vadd.f32 %v5495_v1, %v5413_v53  ;;  %v5994_v1 = vld [vmem:[#allocation3 + $0x1d8] sm:$0xff] }
 0x7ce   :  { %v5999_v9 = vpack.c.bf16 %v5994_v1, %v5993_v28 }
 0x7cf   :  { %v5518_v52 = vadd.f32 %v10513_v60, %v5506_v34  ;;  %v5996_v34 = vld [vmem:[#allocation3 + $0x1f8] sm:$0xff] }
 0x7d1   :  { %7503 = vst.msk [vmem:[%s11035_s8 + $0xf0] sm:$0xff] %vm1346_vm3, %v5518_v52  ;;  %v6087_v45 = vld [vmem:[#allocation3 + $0x3d7] sm:$0xff] }
 0x7d2   :  { %5536 = vst.msk [vmem:[#allocation3 + $0x3e8] sm:$0xff] %vm1346_vm3, %v5518_v52  ;;  %v5404_v3 = vpop.f32.mrf.mxu2  ;;  %v6092_v29 = vpack.c.bf16 %v6087_v45, %v5544_v30  ;;  %v10638_v21 = vld [vmem:[#allocation3 + $0x3d8] sm:$0xff]  ;;  %v5902_v52 = vld [vmem:[#allocation3 + $0xe8] sm:$0xff] }
 0x7d3   :  { %v5414_v38 = vadd.f32 %v5404_v3, %v5320_v7  ;;  %v6278_v25 = vpack.c.bf16 %v10638_v21, %v10618_v17  ;;  %v5901_v30 = vld [vmem:[#allocation3 + $0xd8] sm:$0xff]  ;;  %v5627_v44 = vpop.f32.mrf.mxu1  ;;  %v5907_v7 = vpack.c.bf16 %v5903_v48, %v5902_v52 }
 0x7d4   :  { %7643 = vmatmul.msk.bf16.gmra.mxu1 %vm1346_vm3, %v6092_v29  ;;  %v5906_v53 = vpack.c.bf16 %v5901_v30, %v5900_v24 }
 0x7d5   :  { %v5507_v4 = vadd.f32 %v5497_v57, %v5414_v38 }
 0x7d7   :  { %v5519_v31 = vadd.f32 %v10513_v60, %v5507_v4  ;;  %v7925_v60 = vld [vmem:[%s11036_s5 + $0xf0] sm:$0xff] }
 0x7d8   :  { %6236 = vmatpush.bf16.msra.mxu2 %v7925_v60 }
 0x7d9   :  { %7504 = vst.msk [vmem:[%s11035_s8 + $0xf8] sm:$0xff] %vm1346_vm3, %v5519_v31  ;;  %v5546_v39 = vld [vmem:[#allocation3 + $0x3e7] sm:$0xff] }
 0x7da   :  { %v10648_v59 = vld [vmem:[#allocation3 + $0x3e8] sm:$0xff]  ;;  %5537 = vst.msk [vmem:[#allocation3 + $0x3f8] sm:$0xff] %vm1346_vm3, %v5519_v31  ;;  %v5550_v12 = vpack.c.bf16 %v5546_v39, %v6087_v45  ;;  %v6000_v45 = vpack.c.bf16 %v5996_v34, %v5995_v22 }
 0x7db   :  { %v5721_v63 = vpack.c.bf16 %v10648_v59, %v10638_v21  ;;  %v5630_v40 = vpop.f32.mrf.mxu1 }
 0x7dc   :  { %7544 = vmatmul.msk.bf16.gmra.mxu2 %vm1346_vm3, %v5550_v12 }
 0x7dd   :  { %7564 = vmatmul.msk.bf16.gmra.mxu3 %vm1346_vm3, %v5721_v63  ;;  %6237 = vmatpush.bf16.msra.mxu2 %v7924_v11 }
 0x7e1   :  { %v6089_v47 = vld [vmem:[#allocation3 + $0x3f7] sm:$0xff]  ;;  %6238 = vmatpush.bf16.msra.mxu2 %v7923_v41 }
 0x7e2   :  { %v6093_v37 = vpack.c.bf16 %v6089_v47, %v5546_v39 }
 0x7e3   :  { %v5632_v3 = vpop.f32.mrf.mxu1 }
 0x7e4   :  { %7644 = vmatmul.msk.bf16.gmra.mxu1 %vm1346_vm3, %v6093_v37 }
 0x7eb   :  { %v5635_v29 = vpop.f32.mrf.mxu1 }
 0x7ec   :  { %7601 = vmatmul.msk.bf16.vlgmr.msrb.gmra.mxu2 %vm1346_vm3, %v5904_v19  ;;  %v6275_v19 = vld [vmem:[#allocation3 + $0x3f8] sm:$0xff] }
 0x7ed   :  { %7621 = vmatmul.msk.bf16.vlgmr.msrb.gmra.mxu3 %vm1346_vm3, %v5997_v2 }
 0x7f3   :  { %v5637_v31 = vpop.f32.mrf.mxu1 }
 0x7fb   :  { %v5640_v47 = vpop.f32.mrf.mxu1 }
 0x7fc   :  { %7602 = vmatmul.msk.bf16.gmra.mxu2 %vm1346_vm3, %v5905_v33 }
 0x7fd   :  { %7622 = vmatmul.msk.bf16.gmra.mxu3 %vm1346_vm3, %v5998_v14 }
 0x803   :  { %v5642_v5 = vpop.f32.mrf.mxu1 }
 0x80c   :  { %7603 = vmatmul.msk.bf16.gmra.mxu2 %vm1346_vm3, %v5906_v53 }
 0x80d   :  { %7623 = vmatmul.msk.bf16.gmra.mxu3 %vm1346_vm3, %v5999_v9 }
 0x81c   :  { %7604 = vmatmul.msk.bf16.gmra.mxu2 %vm1346_vm3, %v5907_v7 }
 0x81d   :  { %7624 = vmatmul.msk.bf16.gmra.mxu3 %vm1346_vm3, %v6000_v45 }
 0x82c   :  { %7661 = vmatmul.msk.bf16.vlgmr.msra.gmra.mxu2 %vm1346_vm3, %v6183_v55 }
 0x82d   :  { %7681 = vmatmul.msk.bf16.vlgmr.msra.gmra.mxu3 %vm1346_vm3, %v6276_v23 }
 0x82f   :  { %v5690_v38 = vpop.f32.mrf.mxu2 }
 0x830   :  { %v5775_v57 = vpop.f32.mrf.mxu3  ;;  %v5691_v4 = vadd.f32 %v5690_v38, %v5625_v20 }
 0x832   :  { %v10690_v39 = vadd.f32 %v5775_v57, %v5691_v4 }
 0x837   :  { %v5692_v12 = vpop.f32.mrf.mxu2 }
 0x838   :  { %v5777_v63 = vpop.f32.mrf.mxu3  ;;  %v5693_v60 = vadd.f32 %v5692_v12, %v5627_v44 }
 0x83a   :  { %v10692_v10 = vadd.f32 %v5777_v63, %v5693_v60 }
 0x83c   :  { %7662 = vmatmul.msk.bf16.gmra.mxu2 %vm1346_vm3, %v6184_v54  ;;  %v5868_v54 = vpop.f32.mrf.mxu1 }
 0x83d   :  { %7682 = vmatmul.msk.bf16.gmra.mxu3 %vm1346_vm3, %v6277_v36 }
 0x83f   :  { %v5695_v46 = vpop.f32.mrf.mxu2 }
 0x840   :  { %v5780_v50 = vpop.f32.mrf.mxu3  ;;  %v5696_v55 = vadd.f32 %v5695_v46, %v5630_v40 }
 0x842   :  { %v10702_v49 = vadd.f32 %v5780_v50, %v5696_v55 }
 0x844   :  { %v5870_v11 = vpop.f32.mrf.mxu1 }
 0x845   :  { %v5889_v12 = vadd.f32 %v5870_v11, %v10692_v10 }
 0x847   :  { %v5697_v23 = vpop.f32.mrf.mxu2 }
 0x848   :  { %v5782_v37 = vpop.f32.mrf.mxu3  ;;  %v5698_v8 = vadd.f32 %v5697_v23, %v5632_v3  ;;  %v5888_v3 = vadd.f32 %v5868_v54, %v10690_v39  ;;  %v10752_v39 = vld [vmem:[%s11037_s6] ss:$0 sm:$0xff] }
 0x84a   :  { %v10704_v43 = vadd.f32 %v5782_v37, %v5698_v8 }
 0x84c   :  { %7663 = vmatmul.msk.bf16.gmra.mxu2 %vm1346_vm3, %v6185_v16  ;;  %v6279_v16 = vpack.c.bf16 %v6275_v19, %v10648_v59  ;;  %v5873_v35 = vpop.f32.mrf.mxu1 }
 0x84d   :  { %7683 = vmatmul.msk.bf16.gmra.mxu3 %vm1346_vm3, %v6278_v25  ;;  %v5890_v10 = vadd.f32 %v5873_v35, %v10702_v49 }
 0x84f   :  { %v5700_v26 = vpop.f32.mrf.mxu2 }
 0x850   :  { %v5785_v27 = vpop.f32.mrf.mxu3  ;;  %v5701_v0 = vadd.f32 %v5700_v26, %v5635_v29 }
 0x852   :  { %v10714_v61 = vadd.f32 %v5785_v27, %v5701_v0 }
 0x854   :  { %v5875_v14 = vpop.f32.mrf.mxu1 }
 0x855   :  { %v5891_v11 = vadd.f32 %v5875_v14, %v10704_v43 }
 0x857   :  { %v5702_v36 = vpop.f32.mrf.mxu2 }
 0x858   :  { %v5787_v62 = vpop.f32.mrf.mxu3  ;;  %v5703_v2 = vadd.f32 %v5702_v36, %v5637_v31 }
 0x85a   :  { %v10716_v42 = vadd.f32 %v5787_v62, %v5703_v2 }
 0x85c   :  { %7664 = vmatmul.msk.bf16.gmra.mxu2 %vm1346_vm3, %v6186_v58  ;;  %v5878_v20 = vpop.f32.mrf.mxu1 }
 0x85d   :  { %7684 = vmatmul.msk.bf16.gmra.mxu3 %vm1346_vm3, %v6279_v16 }
 0x85f   :  { %v5705_v17 = vpop.f32.mrf.mxu2 }
 0x860   :  { %v5790_v21 = vpop.f32.mrf.mxu3  ;;  %v5706_v25 = vadd.f32 %v5705_v17, %v5640_v47  ;;  %v1106_v47 = vpop.trf.xlu2 }
 0x861   :  { %1284 = vst [vmem:[%s11038_s7 + $0x10] sm:$0xff] %v1106_v47 }
 0x862   :  { %v10722_v13 = vadd.f32 %v5790_v21, %v5706_v25 }
 0x864   :  { %v10726_v24 = vpop.f32.mrf.mxu1 }
 0x867   :  { %v5707_v32 = vpop.f32.mrf.mxu2 }
 0x868   :  { %v5792_v15 = vpop.f32.mrf.mxu3  ;;  %v5708_v56 = vadd.f32 %v5707_v32, %v5642_v5  ;;  %v1107_v54 = vpop.trf.xlu2 }
 0x869   :  { %1292 = vst [vmem:[%s11038_s7 + $0x50] sm:$0xff] %v1107_v54 }
 0x86a   :  { %v10724_v33 = vadd.f32 %v5792_v15, %v5708_v56  ;;  %v5892_v56 = vadd.f32 %v5878_v20, %v10714_v61 }
 0x86c   :  { %v10728_v53 = vpop.f32.mrf.mxu1 }
 0x86f   :  { %v5961_v41 = vpop.f32.mrf.mxu2 }
 0x870   :  { %v6054_v6 = vpop.f32.mrf.mxu3  ;;  %v5981_v29 = vadd.f32 %v5961_v41, %v5888_v3  ;;  %v1108_v17 = vpop.trf.xlu2 }
 0x871   :  { %1300 = vst [vmem:[%s11038_s7 + $0x90] sm:$0xff] %v1108_v17 }
 0x872   :  { %v6074_v31 = vadd.f32 %v6054_v6, %v5981_v29 }
 0x874   :  { %v10730_v48 = vpop.f32.mrf.mxu1 }
 0x877   :  { %v5963_v51 = vpop.f32.mrf.mxu2 }
 0x878   :  { %v6056_v59 = vpop.f32.mrf.mxu3  ;;  %v5982_v63 = vadd.f32 %v5963_v51, %v5889_v12  ;;  %v1109_v51 = vpop.trf.xlu2 }
 0x879   :  { %1308 = vst [vmem:[%s11038_s7 + $0xd0] sm:$0xff] %v1109_v51  ;;  %v1074_v12 = vpop.trf.xlu1 }
 0x87a   :  { %v6075_v23 = vadd.f32 %v6056_v59, %v5982_v63  ;;  %1283 = vst [vmem:[%s11038_s7 + $0x8] sm:$0xff] %v1074_v12 }
 0x87c   :  { %v6147_v22 = vpop.f32.mrf.mxu1 }
 0x87d   :  { %v6167_v60 = vadd.f32 %v6147_v22, %v6074_v31 }
 0x87f   :  { %v5966_v30 = vpop.f32.mrf.mxu2 }
 0x880   :  { %v6059_v1 = vpop.f32.mrf.mxu3  ;;  %v5983_v26 = vadd.f32 %v5966_v30, %v5890_v10  ;;  %v1110_v3 = vpop.trf.xlu2  ;;  %v5895_v10 = vadd.f32 %v10730_v48, %v10724_v33 }
 0x881   :  { %1316 = vst [vmem:[%s11038_s7 + $0x110] sm:$0xff] %v1110_v3 }
 0x882   :  { %v6076_v18 = vadd.f32 %v6059_v1, %v5983_v26 }
 0x884   :  { %v6149_v4 = vpop.f32.mrf.mxu1 }
 0x885   :  { %v6168_v27 = vadd.f32 %v6149_v4, %v6075_v23  ;;  %v1075_v23 = vpop.trf.xlu1 }
 0x886   :  { %1291 = vst [vmem:[%s11038_s7 + $0x48] sm:$0xff] %v1075_v23 }
 0x887   :  { %v5968_v28 = vpop.f32.mrf.mxu2 }
 0x888   :  { %v6061_v44 = vpop.f32.mrf.mxu3  ;;  %v5984_v58 = vadd.f32 %v5968_v28, %v5891_v11 }
 0x88a   :  { %v6077_v32 = vadd.f32 %v6061_v44, %v5984_v58  ;;  %v5893_v44 = vadd.f32 %v10726_v24, %v10716_v42 }
 0x88c   :  { %v6152_v5 = vpop.f32.mrf.mxu1 }
 0x88d   :  { %v6169_v16 = vadd.f32 %v6152_v5, %v6076_v18 }
 0x88f   :  { %v5971_v9 = vpop.f32.mrf.mxu2 }
 0x890   :  { %v6064_v40 = vpop.f32.mrf.mxu3  ;;  %v5985_v14 = vadd.f32 %v5971_v9, %v5892_v56 }
 0x892   :  { %v6078_v28 = vadd.f32 %v6064_v40, %v5985_v14  ;;  %v1042_v40 = vpop.trf.xlu0 }
 0x893   :  { %1282 = vst [vmem:[%s11038_s7] sm:$0xff] %v1042_v40 }
 0x894   :  { %v6154_v2 = vpop.f32.mrf.mxu1 }
 0x895   :  { %v6170_v6 = vadd.f32 %v6154_v2, %v6077_v32 }
 0x897   :  { %v10732_v34 = vpop.f32.mrf.mxu2 }
 0x898   :  { %v10734_v52 = vpop.f32.mrf.mxu3  ;;  %v5986_v20 = vadd.f32 %v10732_v34, %v5893_v44  ;;  %v5894_v34 = vadd.f32 %v10728_v53, %v10722_v13 }
 0x89a   :  { %v6079_v42 = vadd.f32 %v10734_v52, %v5986_v20 }
 0x89c   :  { %v6157_v43 = vpop.f32.mrf.mxu1 }
 0x89d   :  { %v6171_v9 = vadd.f32 %v6157_v43, %v6078_v28 }
 0x89f   :  { %v10736_v7 = vpop.f32.mrf.mxu2 }
 0x8a0   :  { %v10738_v45 = vpop.f32.mrf.mxu3  ;;  %v5987_v47 = vadd.f32 %v10736_v7, %v5894_v34 }
 0x8a2   :  { %v6080_v13 = vadd.f32 %v10738_v45, %v5987_v47 }
 0x8a4   :  { %v6159_v63 = vpop.f32.mrf.mxu1 }
 0x8a7   :  { %v10741_v38 = vpop.f32.mrf.mxu2 }
 0x8a8   :  { %v10743_v57 = vpop.f32.mrf.mxu3  ;;  %v5988_v26 = vadd.f32 %v10741_v38, %v5895_v10 }
 0x8aa   :  { %v6081_v33 = vadd.f32 %v10743_v57, %v5988_v26 }
 0x8ac   :  { %v6162_v7 = vpop.f32.mrf.mxu1 }
 0x8af   :  { %v6240_v46 = vpop.f32.mrf.mxu2 }
 0x8b0   :  { %v6333_v50 = vpop.f32.mrf.mxu3  ;;  %v6260_v55 = vadd.f32 %v6240_v46, %v6167_v60  ;;  %v6172_v46 = vadd.f32 %v6159_v63, %v6079_v42 }
 0x8b2   :  { %v6353_v37 = vadd.f32 %v6333_v50, %v6260_v55  ;;  %v1111_v50 = vpop.trf.xlu2 }
 0x8b3   :  { %1324 = vst [vmem:[%s11038_s7 + $0x150] sm:$0xff] %v1111_v50 }
 0x8b4   :  { %v6365_v8 = vadd.f32 %v10752_v39, %v6353_v37  ;;  %v1043_v37 = vpop.trf.xlu0 }
 0x8b5   :  { %1290 = vst [vmem:[%s11038_s7 + $0x40] sm:$0xff] %v1043_v37 }
 0x8b6   :  { %6373 = vxpose.xlu2.b32.start [1/8] (short) %v6365_v8, 128 }
 0x8b7   :  { %v6242_v0 = vpop.f32.mrf.mxu2 }
 0x8b8   :  { %v6335_v36 = vpop.f32.mrf.mxu3  ;;  %v6261_v62 = vadd.f32 %v6242_v0, %v6168_v27  ;;  %v6173_v27 = vadd.f32 %v6162_v7, %v6080_v13 }
 0x8ba   :  { %v6354_v19 = vadd.f32 %v6335_v36, %v6261_v62  ;;  %v1112_v54 = vpop.trf.xlu2  ;;  %v1076_v62 = vpop.trf.xlu1 }
 0x8bb   :  { %1332 = vst [vmem:[%s11038_s7 + $0x190] sm:$0xff] %v1112_v54 }
 0x8bc   :  { %v6366_v49 = vadd.f32 %v10752_v39, %v6354_v19  ;;  %v1044_v18 = vpop.trf.xlu0  ;;  %1299 = vst [vmem:[%s11038_s7 + $0x88] sm:$0xff] %v1076_v62  ;;  %v6164_v19 = vpop.f32.mrf.mxu1 }
 0x8bd   :  { %1298 = vst [vmem:[%s11038_s7 + $0x80] sm:$0xff] %v1044_v18  ;;  %v6174_v2 = vadd.f32 %v6164_v19, %v6081_v33 }
 0x8be   :  { %6374 = vxpose.xlu2.b32.cont [2/8] (short) %v6366_v49, 128 }
 0x8bf   :  { %v6245_v21 = vpop.f32.mrf.mxu2 }
 0x8c0   :  { %v6338_v25 = vpop.f32.mrf.mxu3  ;;  %v6262_v35 = vadd.f32 %v6245_v21, %v6169_v16 }
 0x8c2   :  { %v6355_v15 = vadd.f32 %v6338_v25, %v6262_v35  ;;  %v1113_v11 = vpop.trf.xlu2  ;;  %v1077_v16 = vpop.trf.xlu1 }
 0x8c3   :  { %1340 = vst [vmem:[%s11038_s7 + $0x1d0] sm:$0xff] %v1113_v11 }
 0x8c4   :  { %v6367_v41 = vadd.f32 %v10752_v39, %v6355_v15  ;;  %v1045_v17 = vpop.trf.xlu0  ;;  %1307 = vst [vmem:[%s11038_s7 + $0xc8] sm:$0xff] %v1077_v16 }
 0x8c5   :  { %1306 = vst [vmem:[%s11038_s7 + $0xc0] sm:$0xff] %v1045_v17 }
 0x8c6   :  { %6375 = vxpose.xlu2.b32.cont [3/8] (short) %v6367_v41, 128 }
 0x8c7   :  { %v6247_v59 = vpop.f32.mrf.mxu2 }
 0x8c8   :  { %v6340_v30 = vpop.f32.mrf.mxu3  ;;  %v6263_v1 = vadd.f32 %v6247_v59, %v6170_v6 }
 0x8ca   :  { %v6356_v22 = vadd.f32 %v6340_v30, %v6263_v1  ;;  %v1202_v35 = vpop.trf.xlu2  ;;  %v1078_v32 = vpop.trf.xlu1 }
 0x8cb   :  { %1287 = vst [vmem:[%s11038_s7 + $0x28] sm:$0xff] %v1202_v35 }
 0x8cc   :  { %v6368_v61 = vadd.f32 %v10752_v39, %v6356_v22  ;;  %v1046_v15 = vpop.trf.xlu0  ;;  %1315 = vst [vmem:[%s11038_s7 + $0x108] sm:$0xff] %v1078_v32 }
 0x8cd   :  { %1314 = vst [vmem:[%s11038_s7 + $0x100] sm:$0xff] %v1046_v15 }
 0x8ce   :  { %6376 = vxpose.xlu2.b32.cont [4/8] (short) %v6368_v61, 128 }
 0x8cf   :  { %v6250_v29 = vpop.f32.mrf.mxu2 }
 0x8d0   :  { %v6343_v4 = vpop.f32.mrf.mxu3  ;;  %v6264_v31 = vadd.f32 %v6250_v29, %v6171_v9 }
 0x8d2   :  { %v6357_v24 = vadd.f32 %v6343_v4, %v6264_v31  ;;  %v1203_v56 = vpop.trf.xlu2 }
 0x8d3   :  { %1295 = vst [vmem:[%s11038_s7 + $0x68] sm:$0xff] %v1203_v56 }
 0x8d4   :  { %v6369_v60 = vadd.f32 %v10752_v39, %v6357_v24  ;;  %v1047_v41 = vpop.trf.xlu0 }
 0x8d5   :  { %1322 = vst [vmem:[%s11038_s7 + $0x140] sm:$0xff] %v1047_v41 }
 0x8d6   :  { %6377 = vxpose.xlu2.b32.cont [5/8] (short) %v6369_v60, 128 }
 0x8d7   :  { %v6252_v55 = vpop.f32.mrf.mxu2 }
 0x8d8   :  { %v6345_v5 = vpop.f32.mrf.mxu3  ;;  %v6265_v52 = vadd.f32 %v6252_v55, %v6172_v46 }
 0x8da   :  { %v6358_v53 = vadd.f32 %v6345_v5, %v6265_v52  ;;  %v1204_v43 = vpop.trf.xlu2 }
 0x8db   :  { %1303 = vst [vmem:[%s11038_s7 + $0xa8] sm:$0xff] %v1204_v43 }
 0x8dc   :  { %v6370_v8 = vadd.f32 %v10752_v39, %v6358_v53  ;;  %v1048_v6 = vpop.trf.xlu0 }
 0x8dd   :  { %1330 = vst [vmem:[%s11038_s7 + $0x180] sm:$0xff] %v1048_v6 }
 0x8de   :  { %6378 = vxpose.xlu2.b32.cont [6/8] (short) %v6370_v8, 128 }
 0x8df   :  { %v6255_v0 = vpop.f32.mrf.mxu2 }
 0x8e0   :  { %v6348_v36 = vpop.f32.mrf.mxu3  ;;  %v6266_v45 = vadd.f32 %v6255_v0, %v6173_v27 }
 0x8e2   :  { %v6359_v48 = vadd.f32 %v6348_v36, %v6266_v45  ;;  %v1205_v51 = vpop.trf.xlu2 }
 0x8e3   :  { %1311 = vst [vmem:[%s11038_s7 + $0xe8] sm:$0xff] %v1205_v51 }
 0x8e4   :  { %v6371_v38 = vadd.f32 %v10752_v39, %v6359_v48  ;;  %v1049_v30 = vpop.trf.xlu0 }
 0x8e5   :  { %1338 = vst [vmem:[%s11038_s7 + $0x1c0] sm:$0xff] %v1049_v30 }
 0x8e6   :  { %6379 = vxpose.xlu2.b32.cont [7/8] (short) %v6371_v38, 128 }
 0x8e7   :  { %v6257_v49 = vpop.f32.mrf.mxu2 }
 0x8e8   :  { %v6267_v58 = vadd.f32 %v6257_v49, %v6174_v2  ;;  %v6350_v57 = vpop.f32.mrf.mxu3 }
 0x8ea   :  { %v6360_v21 = vadd.f32 %v6350_v57, %v6267_v58  ;;  %v1206_v1 = vpop.trf.xlu2 }
 0x8eb   :  { %1319 = vst [vmem:[%s11038_s7 + $0x128] sm:$0xff] %v1206_v1 }
 0x8ec   :  { %v6372_v25 = vadd.f32 %v10752_v39, %v6360_v21  ;;  %v1079_v39 = vpop.trf.xlu1  ;;  %v1138_v22 = vpop.trf.xlu0 }
 0x8ed   :  { %1323 = vst [vmem:[%s11038_s7 + $0x148] sm:$0xff] %v1079_v39 }
 0x8ee   :  { %6380 = vxpose.xlu2.b32.end [8/8] (short) %v6372_v25, 128  ;;  %1285 = vst [vmem:[%s11038_s7 + $0x18] sm:$0xff] %v1138_v22 }
 0x8f2   :  { %v1207_v44 = vpop.trf.xlu2 }
 0x8f3   :  { %1327 = vst [vmem:[%s11038_s7 + $0x168] sm:$0xff] %v1207_v44 }
 0x8f4   :  { %v1080_v14 = vpop.trf.xlu1  ;;  %v1139_v3 = vpop.trf.xlu0 }
 0x8f5   :  { %1331 = vst [vmem:[%s11038_s7 + $0x188] sm:$0xff] %v1080_v14 }
 0x8f6   :  { %1293 = vst [vmem:[%s11038_s7 + $0x58] sm:$0xff] %v1139_v3 }
 0x8fa   :  { %v1208_v61 = vpop.trf.xlu2 }
 0x8fb   :  { %1335 = vst [vmem:[%s11038_s7 + $0x1a8] sm:$0xff] %v1208_v61 }
 0x8fc   :  { %v1081_v59 = vpop.trf.xlu1  ;;  %v1140_v4 = vpop.trf.xlu0 }
 0x8fd   :  { %1339 = vst [vmem:[%s11038_s7 + $0x1c8] sm:$0xff] %v1081_v59 }
 0x8fe   :  { %1301 = vst [vmem:[%s11038_s7 + $0x98] sm:$0xff] %v1140_v4 }
 0x902   :  { %v1209_v20 = vpop.trf.xlu2 }
 0x903   :  { %1343 = vst [vmem:[%s11038_s7 + $0x1e8] sm:$0xff] %v1209_v20 }
 0x904   :  { %v1170_v28 = vpop.trf.xlu1  ;;  %v1141_v12 = vpop.trf.xlu0 }
 0x905   :  { %1286 = vst [vmem:[%s11038_s7 + $0x20] sm:$0xff] %v1170_v28 }
 0x906   :  { %1309 = vst [vmem:[%s11038_s7 + $0xd8] sm:$0xff] %v1141_v12 }
 0x90c   :  { %v1171_v9 = vpop.trf.xlu1  ;;  %v1142_v63 = vpop.trf.xlu0 }
 0x90d   :  { %1294 = vst [vmem:[%s11038_s7 + $0x60] sm:$0xff] %v1171_v9 }
 0x90e   :  { %1317 = vst [vmem:[%s11038_s7 + $0x118] sm:$0xff] %v1142_v63 }
 0x914   :  { %v1172_v29 = vpop.trf.xlu1  ;;  %v1143_v34 = vpop.trf.xlu0 }
 0x915   :  { %1302 = vst [vmem:[%s11038_s7 + $0xa0] sm:$0xff] %v1172_v29 }
 0x916   :  { %1325 = vst [vmem:[%s11038_s7 + $0x158] sm:$0xff] %v1143_v34 }
 0x91c   :  { %v1173_v31 = vpop.trf.xlu1  ;;  %v1144_v46 = vpop.trf.xlu0 }
 0x91d   :  { %1310 = vst [vmem:[%s11038_s7 + $0xe0] sm:$0xff] %v1173_v31 }
 0x91e   :  { %1333 = vst [vmem:[%s11038_s7 + $0x198] sm:$0xff] %v1144_v46 }
 0x924   :  { %v1174_v40 = vpop.trf.xlu1  ;;  %v1145_v5 = vpop.trf.xlu0 }
 0x925   :  { %1318 = vst [vmem:[%s11038_s7 + $0x120] sm:$0xff] %v1174_v40 }
 0x926   :  { %1341 = vst [vmem:[%s11038_s7 + $0x1d8] sm:$0xff] %v1145_v5 }
 0x92c   :  { %v1175_v24 = vpop.trf.xlu1  ;;  %v1234_v37 = vpop.trf.xlu0 }
 0x92d   :  { %1326 = vst [vmem:[%s11038_s7 + $0x160] sm:$0xff] %v1175_v24 }
 0x92e   :  { %1288 = vst [vmem:[%s11038_s7 + $0x30] sm:$0xff] %v1234_v37 }
 0x934   :  { %v1176_v47 = vpop.trf.xlu1  ;;  %v1235_v7 = vpop.trf.xlu0 }
 0x935   :  { %1334 = vst [vmem:[%s11038_s7 + $0x1a0] sm:$0xff] %v1176_v47 }
 0x936   :  { %1296 = vst [vmem:[%s11038_s7 + $0x70] sm:$0xff] %v1235_v7 }
 0x93c   :  { %v1177_v55 = vpop.trf.xlu1  ;;  %v1236_v26 = vpop.trf.xlu0 }
 0x93d   :  { %1342 = vst [vmem:[%s11038_s7 + $0x1e0] sm:$0xff] %v1177_v55 }
 0x93e   :  { %1304 = vst [vmem:[%s11038_s7 + $0xb0] sm:$0xff] %v1236_v26 }
 0x944   :  { %v1266_v23 = vpop.trf.xlu1  ;;  %v1237_v0 = vpop.trf.xlu0 }
 0x945   :  { %1289 = vst [vmem:[%s11038_s7 + $0x38] sm:$0xff] %v1266_v23 }
 0x946   :  { %1312 = vst [vmem:[%s11038_s7 + $0xf0] sm:$0xff] %v1237_v0 }
 0x94c   :  { %v1267_v53 = vpop.trf.xlu1  ;;  %v1238_v62 = vpop.trf.xlu0 }
 0x94d   :  { %1297 = vst [vmem:[%s11038_s7 + $0x78] sm:$0xff] %v1267_v53 }
 0x94e   :  { %1320 = vst [vmem:[%s11038_s7 + $0x130] sm:$0xff] %v1238_v62 }
 0x94f   :  { %v6389_v42 = vpop.trf.xlu2 }
 0x950   :  { %6405 = vst.msk [vmem:[%s11039_s9] sm:$0xff] %vm1346_vm3, %v6389_v42 }
 0x954   :  { %v1268_v8 = vpop.trf.xlu1  ;;  %v1239_v48 = vpop.trf.xlu0 }
 0x955   :  { %1305 = vst [vmem:[%s11038_s7 + $0xb8] sm:$0xff] %v1268_v8 }
 0x956   :  { %1328 = vst [vmem:[%s11038_s7 + $0x170] sm:$0xff] %v1239_v48 }
 0x957   :  { %v6390_v60 = vpop.trf.xlu2 }
 0x958   :  { %6406 = vst.msk [vmem:[%s11039_s9 + $0x8] sm:$0xff] %vm1346_vm3, %v6390_v60 }
 0x95c   :  { %v1269_v54 = vpop.trf.xlu1  ;;  %v1240_v2 = vpop.trf.xlu0 }
 0x95d   :  { %1313 = vst [vmem:[%s11038_s7 + $0xf8] sm:$0xff] %v1269_v54 }
 0x95e   :  { %1336 = vst [vmem:[%s11038_s7 + $0x1b0] sm:$0xff] %v1240_v2 }
 0x95f   :  { %v6391_v50 = vpop.trf.xlu2 }
 0x960   :  { %6407 = vst.msk [vmem:[%s11039_s9 + $0x10] sm:$0xff] %vm1346_vm3, %v6391_v50 }
 0x964   :  { %v1270_v45 = vpop.trf.xlu1  ;;  %v1241_v58 = vpop.trf.xlu0 }
 0x965   :  { %1321 = vst [vmem:[%s11038_s7 + $0x138] sm:$0xff] %v1270_v45 }
 0x966   :  { %1344 = vst [vmem:[%s11038_s7 + $0x1f0] sm:$0xff] %v1241_v58 }
 0x967   :  { %v6392_v52 = vpop.trf.xlu2 }
 0x968   :  { %6408 = vst.msk [vmem:[%s11039_s9 + $0x18] sm:$0xff] %vm1346_vm3, %v6392_v52 }
 0x96c   :  { %v1271_v33 = vpop.trf.xlu1 }
 0x96d   :  { %1329 = vst [vmem:[%s11038_s7 + $0x178] sm:$0xff] %v1271_v33 }
 0x96f   :  { %v6393_v13 = vpop.trf.xlu2 }
 0x970   :  { %6409 = vst.msk [vmem:[%s11039_s9 + $0x20] sm:$0xff] %vm1346_vm3, %v6393_v13 }
 0x974   :  { %v1272_v19 = vpop.trf.xlu1 }
 0x975   :  { %1337 = vst [vmem:[%s11038_s7 + $0x1b8] sm:$0xff] %v1272_v19 }
 0x977   :  { %v6394_v10 = vpop.trf.xlu2 }
 0x978   :  { %6410 = vst.msk [vmem:[%s11039_s9 + $0x28] sm:$0xff] %vm1346_vm3, %v6394_v10 }
 0x97c   :  { %v1273_v49 = vpop.trf.xlu1 }
 0x97d   :  { %1345 = vst [vmem:[%s11038_s7 + $0x1f8] sm:$0xff] %v1273_v49 }
 0x97f   :  { %v6395_v27 = vpop.trf.xlu2 }
 0x980   :  { %6411 = vst.msk [vmem:[%s11039_s9 + $0x30] sm:$0xff] %vm1346_vm3, %v6395_v27 }
 0x987   :  { %v6396_v36 = vpop.trf.xlu2 }
 0x988   :  { %6412 = vst.msk [vmem:[%s11039_s9 + $0x38] sm:$0xff] %vm1346_vm3, %v6396_v36 }
 0x98f   :  { %v6397_v18 = vpop.trf.xlu2 }
 0x990   :  { %6413 = vst.msk [vmem:[%s11039_s9 + $0x40] sm:$0xff] %vm1346_vm3, %v6397_v18 }
 0x997   :  { %v6398_v38 = vpop.trf.xlu2 }
 0x998   :  { %6414 = vst.msk [vmem:[%s11039_s9 + $0x48] sm:$0xff] %vm1346_vm3, %v6398_v38 }
 0x99f   :  { %v6399_v11 = vpop.trf.xlu2 }
 0x9a0   :  { %6415 = vst.msk [vmem:[%s11039_s9 + $0x50] sm:$0xff] %vm1346_vm3, %v6399_v11 }
 0x9a7   :  { %v6400_v16 = vpop.trf.xlu2 }
 0x9a8   :  { %6416 = vst.msk [vmem:[%s11039_s9 + $0x58] sm:$0xff] %vm1346_vm3, %v6400_v16 }
 0x9af   :  { %v6401_v17 = vpop.trf.xlu2 }
 0x9b0   :  { %6417 = vst.msk [vmem:[%s11039_s9 + $0x60] sm:$0xff] %vm1346_vm3, %v6401_v17 }
 0x9b7   :  { %v6402_v57 = vpop.trf.xlu2 }
 0x9b8   :  { %6418 = vst.msk [vmem:[%s11039_s9 + $0x68] sm:$0xff] %vm1346_vm3, %v6402_v57 }
 0x9bf   :  { %v6403_v21 = vpop.trf.xlu2 }
 0x9c0   :  { %6419 = vst.msk [vmem:[%s11039_s9 + $0x70] sm:$0xff] %vm1346_vm3, %v6403_v21 }
 0x9c7   :  { %v6404_v25 = vpop.trf.xlu2 }
 0x9c8   :  { %6420 = vst.msk [vmem:[%s11039_s9 + $0x78] sm:$0xff] %vm1346_vm3, %v6404_v25 }

</bundles_post_ra>
